<compile_context>
chip_gen: v5e
topology: v5e:2x2
jax: 0.10.0
libtpu: 0.0.40
codegen_flags: <defaults>
</compile_context>

<pallas_src>
import functools

import jax
import jax.numpy as jnp
import numpy as np
from jax import lax
from jax.experimental import pallas as pl
from jax.experimental.pallas import tpu as pltpu

EPS = 1e-5
_INV_SQRT2 = 0.7071067811865476

# Feed the MXU bf16 operands (f32 accumulation): ~2-4x MXU throughput on
# v5e/v6e/v7x and half the weight DMA/VMEM bytes, ~1e-2 relative numeric cost.
MXU_BF16 = True
_MXU_DTYPE = jnp.bfloat16 if MXU_BF16 else jnp.float32


def _gelu_exact(x):
    # Exact (erf) GELU, matching torch.nn.GELU default.
    return 0.5 * x * (1.0 + lax.erf(x * _INV_SQRT2))


def _mm(a, w):
    # Activations cast to the (possibly bf16) weight dtype; f32 accumulate.
    return jnp.dot(a.astype(w.dtype), w, preferred_element_type=jnp.float32)


# ----------------------------------------------------------------------------
# Fused kernel: whole ConvMixerBlock1 forward for a (B*H, W*C) slab of images.
# ----------------------------------------------------------------------------
def convmixer_block1_kernel(x_ref,                      # (R, W*Ci) f32
                            dwW_ref,                    # (W*Ci, K*W*Ci) bf16
                            pwW_ref,                    # (W*Ci, W*Ci)   bf16
                            c1W_ref,                    # (W*Ci, 3*W*Co) bf16
                            c2W_ref,                    # (W*Co, 3*W*Co) bf16
                            vci_ref,                    # (6, W*Ci) f32
                            vco_ref,                    # (2, W*Co) f32
                            out_ref,                    # (R, W*Co) f32
                            *, H, K):
    x = x_ref[...]                                      # (R, W*Ci)
    R = x.shape[0]
    WCo = out_ref.shape[1]
    p7 = K // 2

    vci = vci_ref[...]          # rows: dw_b, s1, t1, pw_b, s2, t2
    vco = vco_ref[...]          # rows: b3_eff, b4_eff   (BN3/BN4 pre-folded)

    # Row index within its own image: masks rows whose kxk source row falls
    # outside the image (H padding + no inter-image leakage in the slab).
    h_idx = lax.broadcasted_iota(jnp.int32, (R, 1), 0) % H

    def tap_sum(prod_wide, ntaps, width, pad):
        # prod_wide[:, dy*width:(dy+1)*width] = act @ W_dy ; we need
        # out[i] = sum_dy prod_dy[i + dy - pad], zero outside the image.
        acc = None
        for dy in range(ntaps):
            chunk = prod_wide[:, dy * width:(dy + 1) * width]
            shift = pad - dy                             # out[i] = chunk[i-shift]
            if shift != 0:
                chunk = pltpu.roll(chunk, shift % R, axis=0)     # XLU, not MXU
                mask = (h_idx >= shift) & (h_idx < H + shift)
                chunk = jnp.where(mask, chunk, 0.0)
            acc = chunk if acc is None else acc + chunk          # init w/ 1st tap
        return acc

    # --- Residual( depthwise KxK -> +bias -> GELU -> BN1 ) -----------------
    y = tap_sum(_mm(x, dwW_ref[...]), K, x.shape[1], p7)
    y = _gelu_exact(y + vci[0:1])
    res = y * vci[1:2] + vci[2:3] + x                    # BN1 (eval) + residual

    # --- 1x1 conv -> +bias -> GELU -> BN2 -----------------------------------
    # (BN2 cannot be folded into pwW: GELU sits between the conv and the BN.)
    z = _gelu_exact(_mm(res, pwW_ref[...]) + vci[3:4])
    z = z * vci[4:5] + vci[5:6]

    # --- conv_block: (3x3 conv -> BN -> ReLU) x 2, BN folded into weights ---
    u = jnp.maximum(tap_sum(_mm(z, c1W_ref[...]), 3, WCo, 1) + vco[0:1], 0.0)
    out_ref[...] = jnp.maximum(
        tap_sum(_mm(u, c2W_ref[...]), 3, WCo, 1) + vco[1:2], 0.0)


# ----------------------------------------------------------------------------
# One-time weight folding (pure XLA, parameter-derived; keep OUT of the
# per-forward jit path).
# ----------------------------------------------------------------------------
def _bn_scale_shift(gamma, beta, mean, var):
    scale = gamma / jnp.sqrt(var + EPS)
    return scale, beta - mean * scale


def _tile_lane(v, W):
    """Per-channel (C,) -> lane-dense (W*C,), w-major / channel-minor."""
    return jnp.tile(v, W)


def _depthwise_toeplitz_wide(dw_w, W):
    """(C,1,K,K) depthwise kernel -> (W*C, K*W*C); columns grouped by row tap dy.
    The block-banded structure implements the W taps + W padding; the H taps /
    H padding are applied in-kernel via roll + mask."""
    C, _, K, _ = dw_w.shape
    p = K // 2
    k = dw_w[:, 0]                                                 # (C, K, K)
    dx = jnp.arange(W)[:, None] - jnp.arange(W)[None, :] + p       # (Ws, Wd)
    valid = (dx >= 0) & (dx < K)
    tap = k[:, :, jnp.clip(dx, 0, K - 1)]                          # (C,K,Ws,Wd)
    tap = jnp.where(valid[None, None], tap, 0.0)
    tap = jnp.transpose(tap, (1, 2, 3, 0))                         # (K,Ws,Wd,C)
    eye_c = jnp.eye(C, dtype=jnp.float32)
    M = tap[:, :, None, :, :] * eye_c[None, None, :, None, :]      # (K,Ws,Cs,Wd,Cd)
    M = M.reshape(K, W * C, W * C)
    return jnp.transpose(M, (1, 0, 2)).reshape(W * C, K * W * C)


def _conv3x3_toeplitz_wide(cw, W):
    """(Co,Ci,3,3) -> (W*Ci, 3*W*Co); columns grouped by row tap dy."""
    Co, Ci, K, _ = cw.shape
    p = K // 2
    dx = jnp.arange(W)[:, None] - jnp.arange(W)[None, :] + p
    valid = (dx >= 0) & (dx < K)
    t = cw[:, :, :, jnp.clip(dx, 0, K - 1)]                        # (Co,Ci,K,Ws,Wd)
    t = jnp.where(valid[None, None, None], t, 0.0)
    t = jnp.transpose(t, (2, 3, 1, 4, 0))                          # (K,Ws,Ci,Wd,Co)
    A = t.reshape(K, W * Ci, W * Co)
    return jnp.transpose(A, (1, 0, 2)).reshape(W * Ci, K * W * Co)


def _pointwise_blockdiag(pw_w, W):
    """1x1 conv as a (W*Ci, W*Co) block-diagonal matrix."""
    Wmat = pw_w[:, :, 0, 0].T                                      # (Ci, Co)
    Ci, Co = Wmat.shape
    eye_w = jnp.eye(W, dtype=jnp.float32)
    P = eye_w[:, None, :, None] * Wmat[None, :, None, :]           # (Ws,Ci,Wd,Co)
    return P.reshape(W * Ci, W * Co)


def prepare_convmixer_params(P, W):
    """Fold weights / BN once per parameter set and store MXU operands in bf16."""
    s1, t1 = _bn_scale_shift(P["bn1_g"], P["bn1_b"], P["bn1_m"], P["bn1_v"])
    s2, t2 = _bn_scale_shift(P["bn2_g"], P["bn2_b"], P["bn2_m"], P["bn2_v"])
    s3, t3 = _bn_scale_shift(P["bn3_g"], P["bn3_b"], P["bn3_m"], P["bn3_v"])
    s4, t4 = _bn_scale_shift(P["bn4_g"], P["bn4_b"], P["bn4_m"], P["bn4_v"])

    dwW = _depthwise_toeplitz_wide(P["dw_w"], W)           # (WCi, K*WCi)
    pwW = _pointwise_blockdiag(P["pw_w"], W)               # (WCi, WCi)
    c1W = _conv3x3_toeplitz_wide(P["c1_w"], W)             # (WCi, 3*WCo)
    c2W = _conv3x3_toeplitz_wide(P["c2_w"], W)             # (WCo, 3*WCo)

    # BN3/BN4 follow their convs with no nonlinearity in between -> fold the
    # scales into the conv columns and the shifts into the biases (exact).
    c1W = c1W * jnp.tile(_tile_lane(s3, W), 3)[None, :]
    c2W = c2W * jnp.tile(_tile_lane(s4, W), 3)[None, :]
    b3_eff = _tile_lane(P["c1_b"] * s3 + t3, W)
    b4_eff = _tile_lane(P["c2_b"] * s4 + t4, W)

    vci = jnp.stack([_tile_lane(P["dw_b"], W), _tile_lane(s1, W),
                     _tile_lane(t1, W), _tile_lane(P["pw_b"], W),
                     _tile_lane(s2, W), _tile_lane(t2, W)])        # (6, WCi)
    vco = jnp.stack([b3_eff, b4_eff])                              # (2, WCo)

    return {"dwW": dwW.astype(_MXU_DTYPE), "pwW": pwW.astype(_MXU_DTYPE),
            "c1W": c1W.astype(_MXU_DTYPE), "c2W": c2W.astype(_MXU_DTYPE),
            "vci": vci.astype(jnp.float32), "vco": vco.astype(jnp.float32)}


def convmixer_block1_pallas(x_nchw, folded, *, images_per_step=2):
    """ConvMixerBlock1 forward. Input/output: NCHW float32."""
    N, Ci, H, W = x_nchw.shape
    dwW, pwW = folded["dwW"], folded["pwW"]
    c1W, c2W = folded["c1W"], folded["c2W"]
    vci, vco = folded["vci"], folded["vco"]

    WCi = W * Ci
    WCo = c2W.shape[0]
    Co = WCo // W
    K = dwW.shape[1] // WCi

    B = images_per_step
    assert N % B == 0, "batch must divide by images_per_step"
    R = B * H                                    # matmul M rows per grid step

    # Lane-dense layout: all image rows stacked along sublanes -> (N*H, W*Ci).
    x2 = jnp.transpose(x_nchw, (0, 2, 3, 1)).reshape(N * H, WCi)

    kernel = functools.partial(convmixer_block1_kernel, H=H, K=K)

    def _const_spec(a):
        return pl.BlockSpec(a.shape, lambda n, nd=a.ndim: (0,) * nd)

    in_specs = [pl.BlockSpec((R, WCi), lambda n: (n, 0))]
    in_specs += [_const_spec(a) for a in (dwW, pwW, c1W, c2W, vci, vco)]
    out_spec = pl.BlockSpec((R, WCo), lambda n: (n, 0))

    # VMEM budget: grid-invariant weights (double-buffered by default) +
    # double-buffered activation blocks + headroom, capped below the 64 MiB
    # physical VMEM of v7x.
    weight_bytes = sum(int(a.size) * a.dtype.itemsize
                       for a in (dwW, pwW, c1W, c2W, vci, vco))
    act_bytes = R * (WCi + WCo) * 4
    vmem_limit = min(int(2 * weight_bytes + 4 * act_bytes + (4 << 20)), 56 << 20)

    out2 = pl.pallas_call(
        kernel,
        out_shape=jax.ShapeDtypeStruct((N * H, WCo), jnp.float32),
        grid=(N // B,),
        in_specs=in_specs,
        out_specs=out_spec,
        compiler_params=pltpu.CompilerParams(
            dimension_semantics=("parallel",),
            vmem_limit_bytes=vmem_limit),
    )(x2, dwW, pwW, c1W, c2W, vci, vco)

    return jnp.transpose(out2.reshape(N, H, W, Co), (0, 3, 1, 2))


# ----------------------------------------------------------------------------
# Pure-JAX reference (mirrors the PyTorch forward, NCHW) for correctness check
# ----------------------------------------------------------------------------
def reference_forward(x, P):
    dn = ("NCHW", "OIHW", "NCHW")
    p = P["dw_w"].shape[2] // 2

    def bn(z, g, b, m, v):
        g, b, m, v = (a[None, :, None, None] for a in (g, b, m, v))
        return (z - m) / jnp.sqrt(v + EPS) * g + b

    C = x.shape[1]
    y = lax.conv_general_dilated(x, P["dw_w"], (1, 1), [(p, p), (p, p)],
                                 dimension_numbers=dn, feature_group_count=C)
    y = y + P["dw_b"][None, :, None, None]
    y = _gelu_exact(y)
    y = bn(y, P["bn1_g"], P["bn1_b"], P["bn1_m"], P["bn1_v"])
    y = y + x
    y = lax.conv_general_dilated(y, P["pw_w"], (1, 1), [(0, 0), (0, 0)],
                                 dimension_numbers=dn)
    y = y + P["pw_b"][None, :, None, None]
    y = _gelu_exact(y)
    y = bn(y, P["bn2_g"], P["bn2_b"], P["bn2_m"], P["bn2_v"])
    y = lax.conv_general_dilated(y, P["c1_w"], (1, 1), [(1, 1), (1, 1)],
                                 dimension_numbers=dn)
    y = y + P["c1_b"][None, :, None, None]
    y = jnp.maximum(bn(y, P["bn3_g"], P["bn3_b"], P["bn3_m"], P["bn3_v"]), 0.0)
    y = lax.conv_general_dilated(y, P["c2_w"], (1, 1), [(1, 1), (1, 1)],
                                 dimension_numbers=dn)
    y = y + P["c2_b"][None, :, None, None]
    y = jnp.maximum(bn(y, P["bn4_g"], P["bn4_b"], P["bn4_m"], P["bn4_v"]), 0.0)
    return y


def make_params(key, ch_in, ch_out, k):
    keys = jax.random.split(key, 32)
    it = iter(keys)

    def nrm(shape, scale=0.1):
        return scale * jax.random.normal(next(it), shape, jnp.float32)

    def gamma(shape):                      # BN gamma near 1 (realistic)
        return 1.0 + 0.1 * jax.random.normal(next(it), shape, jnp.float32)

    def pos(shape):
        return jnp.abs(jax.random.normal(next(it), shape, jnp.float32)) + 0.5

    return {
        "dw_w": nrm((ch_in, 1, k, k)), "dw_b": nrm((ch_in,)),
        "bn1_g": gamma((ch_in,)), "bn1_b": nrm((ch_in,)),
        "bn1_m": nrm((ch_in,)), "bn1_v": pos((ch_in,)),
        "pw_w": nrm((ch_in, ch_in, 1, 1)), "pw_b": nrm((ch_in,)),
        "bn2_g": gamma((ch_in,)), "bn2_b": nrm((ch_in,)),
        "bn2_m": nrm((ch_in,)), "bn2_v": pos((ch_in,)),
        "c1_w": nrm((ch_out, ch_in, 3, 3)), "c1_b": nrm((ch_out,)),
        "bn3_g": gamma((ch_out,)), "bn3_b": nrm((ch_out,)),
        "bn3_m": nrm((ch_out,)), "bn3_v": pos((ch_out,)),
        "c2_w": nrm((ch_out, ch_out, 3, 3)), "c2_b": nrm((ch_out,)),
        "bn4_g": gamma((ch_out,)), "bn4_b": nrm((ch_out,)),
        "bn4_m": nrm((ch_out,)), "bn4_v": pos((ch_out,)),
    }


if __name__ == "__main__":
    # W * CH_IN = 128 input lanes, W * CH_OUT = 256 output lanes (lane-dense).
    N, CH_IN, CH_OUT, H, W, K = 8, 8, 16, 16, 16, 7
    IMAGES_PER_STEP = 2          # -> 32-row matmuls, 4 "parallel" grid steps.
    # At real sizes pick IMAGES_PER_STEP so B*H >= 128 (v5e) / 256 (v6e/v7x);
    # see the row-chunk TODO at the top if vreg spills appear.

    key = jax.random.PRNGKey(0)
    kx, kp = jax.random.split(key)
    x = jax.random.normal(kx, (N, CH_IN, H, W), jnp.float32)
    params = make_params(kp, CH_IN, CH_OUT, K)

    # One-time weight folding, hoisted out of the per-forward path.
    folded = jax.tree_util.tree_map(jax.block_until_ready,
                                    prepare_convmixer_params(params, W))

    fwd = jax.jit(functools.partial(convmixer_block1_pallas,
                                    images_per_step=IMAGES_PER_STEP))
    out = jax.block_until_ready(fwd(x, folded))

    ref = jax.block_until_ready(reference_forward(x, params))
    assert out.shape == (N, CH_OUT, H, W), out.shape
    # bf16 MXU operands -> relaxed tolerance vs. the f32 reference.
    tol = 5e-2 if MXU_BF16 else 2e-4
    np.testing.assert_allclose(np.asarray(out), np.asarray(ref),
                               rtol=tol, atol=tol)

    print("KERNEL_OK")
</pallas_src>

<mosaic_0001>
module attributes {stable_mosaic.version = 11 : i64} {
  func.func @convmixer_block1_kernel(%arg0: i32, %arg1: memref<32x128xf32, #tpu.memory_space<vmem>>, %arg2: memref<128x896xbf16, #tpu.memory_space<vmem>>, %arg3: memref<128x128xbf16, #tpu.memory_space<vmem>>, %arg4: memref<128x768xbf16, #tpu.memory_space<vmem>>, %arg5: memref<256x768xbf16, #tpu.memory_space<vmem>>, %arg6: memref<6x128xf32, #tpu.memory_space<vmem>>, %arg7: memref<2x256xf32, #tpu.memory_space<vmem>>, %arg8: memref<32x256xf32, #tpu.memory_space<vmem>>) attributes {dimension_semantics = [#tpu.dimension_semantics<parallel>], iteration_bounds = array<i64: 4>, scalar_prefetch = 0 : i64, scratch_operands = 0 : i64, tpu.core_type = #tpu.core_type<tc>, window_params = [{transform_indices = @transform_0, window_bounds = array<i64: 32, 128>}, {pipeline_mode = #tpu.pipeline_mode<synchronous>, transform_indices = @transform_1, window_bounds = array<i64: 128, 896>}, {pipeline_mode = #tpu.pipeline_mode<synchronous>, transform_indices = @transform_2, window_bounds = array<i64: 128, 128>}, {pipeline_mode = #tpu.pipeline_mode<synchronous>, transform_indices = @transform_3, window_bounds = array<i64: 128, 768>}, {pipeline_mode = #tpu.pipeline_mode<synchronous>, transform_indices = @transform_4, window_bounds = array<i64: 256, 768>}, {pipeline_mode = #tpu.pipeline_mode<synchronous>, transform_indices = @transform_5, window_bounds = array<i64: 6, 128>}, {pipeline_mode = #tpu.pipeline_mode<synchronous>, transform_indices = @transform_6, window_bounds = array<i64: 2, 256>}, {transform_indices = @transform_7, window_bounds = array<i64: 32, 256>}]} {
    %c0 = arith.constant 0 : index
    %c0_0 = arith.constant 0 : index
    %0 = vector.load %arg1[%c0, %c0_0] : memref<32x128xf32, #tpu.memory_space<vmem>>, vector<32x128xf32>
    %c0_1 = arith.constant 0 : index
    %c0_2 = arith.constant 0 : index
    %1 = vector.load %arg6[%c0_1, %c0_2] : memref<6x128xf32, #tpu.memory_space<vmem>>, vector<6x128xf32>
    %c0_3 = arith.constant 0 : index
    %c0_4 = arith.constant 0 : index
    %2 = vector.load %arg7[%c0_3, %c0_4] : memref<2x256xf32, #tpu.memory_space<vmem>>, vector<2x256xf32>
    %3 = tpu.iota {dimensions = array<i32: 0>} : vector<32x1xi32>
    %c16_i32 = arith.constant 16 : i32
    %c0_i32 = arith.constant 0 : i32
    %4 = arith.cmpi eq, %c16_i32, %c0_i32 : i32
    %c1_i32 = arith.constant 1 : i32
    %5 = arith.select %4, %c1_i32, %c16_i32 : i32
    %6 = vector.broadcast %5 : i32 to vector<32x1xi32>
    %7 = arith.remsi %3, %6 : vector<32x1xi32>
    %c0_i32_5 = arith.constant 0 : i32
    %8 = vector.broadcast %c0_i32_5 : i32 to vector<32x1xi32>
    %9 = arith.cmpi ne, %7, %8 : vector<32x1xi32>
    %c0_i32_6 = arith.constant 0 : i32
    %10 = vector.broadcast %c0_i32_6 : i32 to vector<32x1xi32>
    %11 = arith.cmpi slt, %7, %10 : vector<32x1xi32>
    %c0_i32_7 = arith.constant 0 : i32
    %12 = arith.cmpi slt, %5, %c0_i32_7 : i32
    %13 = vector.broadcast %12 : i1 to vector<32x1xi1>
    %14 = vector.broadcast %13 : vector<32x1xi1> to vector<32x1xi1>
    %15 = arith.xori %11, %14 : vector<32x1xi1>
    %16 = arith.andi %15, %9 : vector<32x1xi1>
    %17 = vector.broadcast %5 : i32 to vector<32x1xi32>
    %18 = arith.addi %7, %17 : vector<32x1xi32>
    %19 = arith.select %16, %18, %7 : vector<32x1xi1>, vector<32x1xi32>
    %c0_8 = arith.constant 0 : index
    %c0_9 = arith.constant 0 : index
    %20 = vector.load %arg2[%c0_8, %c0_9] : memref<128x896xbf16, #tpu.memory_space<vmem>>, vector<128x896xbf16>
    %21 = arith.truncf %0 : vector<32x128xf32> to vector<32x128xbf16>
    %cst = arith.constant dense<0.000000e+00> : vector<32x896xf32>
    %22 = tpu.matmul %21, %20, %cst {dimension_numbers = #tpu.dot_dimension_numbers<[1], [0], [0], [1], [0, 0, 1, 1], [], []>} : vector<32x128xbf16>, vector<128x896xbf16>, vector<32x896xf32> -> vector<32x896xf32>
    %23 = vector.extract_strided_slice %22 {offsets = [0, 0], sizes = [32, 128], strides = [1, 1]} : vector<32x896xf32> to vector<32x128xf32>
    %c3_i32 = arith.constant 3 : i32
    %24 = tpu.dynamic_rotate %23 by %c3_i32 dim 0 : vector<32x128xf32>, i32 -> vector<32x128xf32>
    %c3_i32_10 = arith.constant 3 : i32
    %25 = vector.broadcast %c3_i32_10 : i32 to vector<32x1xi32>
    %26 = arith.cmpi sge, %19, %25 : vector<32x1xi32>
    %c19_i32 = arith.constant 19 : i32
    %27 = vector.broadcast %c19_i32 : i32 to vector<32x1xi32>
    %28 = arith.cmpi slt, %19, %27 : vector<32x1xi32>
    %29 = arith.andi %26, %28 : vector<32x1xi1>
    %cst_11 = arith.constant 0.000000e+00 : f32
    %30 = vector.shape_cast %29 : vector<32x1xi1> to vector<32x1xi1>
    %31 = vector.broadcast %30 : vector<32x1xi1> to vector<32x128xi1>
    %32 = vector.broadcast %cst_11 : f32 to vector<32x128xf32>
    %33 = arith.select %31, %24, %32 : vector<32x128xi1>, vector<32x128xf32>
    %34 = vector.extract_strided_slice %22 {offsets = [0, 128], sizes = [32, 128], strides = [1, 1]} : vector<32x896xf32> to vector<32x128xf32>
    %c2_i32 = arith.constant 2 : i32
    %35 = tpu.dynamic_rotate %34 by %c2_i32 dim 0 : vector<32x128xf32>, i32 -> vector<32x128xf32>
    %c2_i32_12 = arith.constant 2 : i32
    %36 = vector.broadcast %c2_i32_12 : i32 to vector<32x1xi32>
    %37 = arith.cmpi sge, %19, %36 : vector<32x1xi32>
    %c18_i32 = arith.constant 18 : i32
    %38 = vector.broadcast %c18_i32 : i32 to vector<32x1xi32>
    %39 = arith.cmpi slt, %19, %38 : vector<32x1xi32>
    %40 = arith.andi %37, %39 : vector<32x1xi1>
    %cst_13 = arith.constant 0.000000e+00 : f32
    %41 = vector.shape_cast %40 : vector<32x1xi1> to vector<32x1xi1>
    %42 = vector.broadcast %41 : vector<32x1xi1> to vector<32x128xi1>
    %43 = vector.broadcast %cst_13 : f32 to vector<32x128xf32>
    %44 = arith.select %42, %35, %43 : vector<32x128xi1>, vector<32x128xf32>
    %45 = arith.addf %33, %44 : vector<32x128xf32>
    %46 = vector.extract_strided_slice %22 {offsets = [0, 256], sizes = [32, 128], strides = [1, 1]} : vector<32x896xf32> to vector<32x128xf32>
    %c1_i32_14 = arith.constant 1 : i32
    %47 = tpu.dynamic_rotate %46 by %c1_i32_14 dim 0 : vector<32x128xf32>, i32 -> vector<32x128xf32>
    %c1_i32_15 = arith.constant 1 : i32
    %48 = vector.broadcast %c1_i32_15 : i32 to vector<32x1xi32>
    %49 = arith.cmpi sge, %19, %48 : vector<32x1xi32>
    %c17_i32 = arith.constant 17 : i32
    %50 = vector.broadcast %c17_i32 : i32 to vector<32x1xi32>
    %51 = arith.cmpi slt, %19, %50 : vector<32x1xi32>
    %52 = arith.andi %49, %51 : vector<32x1xi1>
    %cst_16 = arith.constant 0.000000e+00 : f32
    %53 = vector.shape_cast %52 : vector<32x1xi1> to vector<32x1xi1>
    %54 = vector.broadcast %53 : vector<32x1xi1> to vector<32x128xi1>
    %55 = vector.broadcast %cst_16 : f32 to vector<32x128xf32>
    %56 = arith.select %54, %47, %55 : vector<32x128xi1>, vector<32x128xf32>
    %57 = arith.addf %45, %56 : vector<32x128xf32>
    %58 = vector.extract_strided_slice %22 {offsets = [0, 384], sizes = [32, 128], strides = [1, 1]} : vector<32x896xf32> to vector<32x128xf32>
    %59 = arith.addf %57, %58 : vector<32x128xf32>
    %60 = vector.extract_strided_slice %22 {offsets = [0, 512], sizes = [32, 128], strides = [1, 1]} : vector<32x896xf32> to vector<32x128xf32>
    %c31_i32 = arith.constant 31 : i32
    %61 = tpu.dynamic_rotate %60 by %c31_i32 dim 0 : vector<32x128xf32>, i32 -> vector<32x128xf32>
    %c-1_i32 = arith.constant -1 : i32
    %62 = vector.broadcast %c-1_i32 : i32 to vector<32x1xi32>
    %63 = arith.cmpi sge, %19, %62 : vector<32x1xi32>
    %c15_i32 = arith.constant 15 : i32
    %64 = vector.broadcast %c15_i32 : i32 to vector<32x1xi32>
    %65 = arith.cmpi slt, %19, %64 : vector<32x1xi32>
    %66 = arith.andi %63, %65 : vector<32x1xi1>
    %cst_17 = arith.constant 0.000000e+00 : f32
    %67 = vector.shape_cast %66 : vector<32x1xi1> to vector<32x1xi1>
    %68 = vector.broadcast %67 : vector<32x1xi1> to vector<32x128xi1>
    %69 = vector.broadcast %cst_17 : f32 to vector<32x128xf32>
    %70 = arith.select %68, %61, %69 : vector<32x128xi1>, vector<32x128xf32>
    %71 = arith.addf %59, %70 : vector<32x128xf32>
    %72 = vector.extract_strided_slice %22 {offsets = [0, 640], sizes = [32, 128], strides = [1, 1]} : vector<32x896xf32> to vector<32x128xf32>
    %c30_i32 = arith.constant 30 : i32
    %73 = tpu.dynamic_rotate %72 by %c30_i32 dim 0 : vector<32x128xf32>, i32 -> vector<32x128xf32>
    %c-2_i32 = arith.constant -2 : i32
    %74 = vector.broadcast %c-2_i32 : i32 to vector<32x1xi32>
    %75 = arith.cmpi sge, %19, %74 : vector<32x1xi32>
    %c14_i32 = arith.constant 14 : i32
    %76 = vector.broadcast %c14_i32 : i32 to vector<32x1xi32>
    %77 = arith.cmpi slt, %19, %76 : vector<32x1xi32>
    %78 = arith.andi %75, %77 : vector<32x1xi1>
    %cst_18 = arith.constant 0.000000e+00 : f32
    %79 = vector.shape_cast %78 : vector<32x1xi1> to vector<32x1xi1>
    %80 = vector.broadcast %79 : vector<32x1xi1> to vector<32x128xi1>
    %81 = vector.broadcast %cst_18 : f32 to vector<32x128xf32>
    %82 = arith.select %80, %73, %81 : vector<32x128xi1>, vector<32x128xf32>
    %83 = arith.addf %71, %82 : vector<32x128xf32>
    %84 = vector.extract_strided_slice %22 {offsets = [0, 768], sizes = [32, 128], strides = [1, 1]} : vector<32x896xf32> to vector<32x128xf32>
    %c29_i32 = arith.constant 29 : i32
    %85 = tpu.dynamic_rotate %84 by %c29_i32 dim 0 : vector<32x128xf32>, i32 -> vector<32x128xf32>
    %c-3_i32 = arith.constant -3 : i32
    %86 = vector.broadcast %c-3_i32 : i32 to vector<32x1xi32>
    %87 = arith.cmpi sge, %19, %86 : vector<32x1xi32>
    %c13_i32 = arith.constant 13 : i32
    %88 = vector.broadcast %c13_i32 : i32 to vector<32x1xi32>
    %89 = arith.cmpi slt, %19, %88 : vector<32x1xi32>
    %90 = arith.andi %87, %89 : vector<32x1xi1>
    %cst_19 = arith.constant 0.000000e+00 : f32
    %91 = vector.shape_cast %90 : vector<32x1xi1> to vector<32x1xi1>
    %92 = vector.broadcast %91 : vector<32x1xi1> to vector<32x128xi1>
    %93 = vector.broadcast %cst_19 : f32 to vector<32x128xf32>
    %94 = arith.select %92, %85, %93 : vector<32x128xi1>, vector<32x128xf32>
    %95 = arith.addf %83, %94 : vector<32x128xf32>
    %96 = vector.extract_strided_slice %1 {offsets = [0, 0], sizes = [1, 128], strides = [1, 1]} : vector<6x128xf32> to vector<1x128xf32>
    %97 = vector.broadcast %96 : vector<1x128xf32> to vector<32x128xf32>
    %98 = arith.addf %95, %97 : vector<32x128xf32>
    %cst_20 = arith.constant 5.000000e-01 : f32
    %99 = vector.broadcast %cst_20 : f32 to vector<32x128xf32>
    %100 = arith.mulf %99, %98 : vector<32x128xf32>
    %cst_21 = arith.constant 0.707106769 : f32
    %101 = vector.broadcast %cst_21 : f32 to vector<32x128xf32>
    %102 = arith.mulf %98, %101 : vector<32x128xf32>
    %103 = math.erf %102 : vector<32x128xf32>
    %cst_22 = arith.constant 1.000000e+00 : f32
    %104 = vector.broadcast %cst_22 : f32 to vector<32x128xf32>
    %105 = arith.addf %104, %103 : vector<32x128xf32>
    %106 = arith.mulf %100, %105 : vector<32x128xf32>
    %107 = vector.extract_strided_slice %1 {offsets = [1, 0], sizes = [1, 128], strides = [1, 1]} : vector<6x128xf32> to vector<1x128xf32>
    %108 = vector.broadcast %107 : vector<1x128xf32> to vector<32x128xf32>
    %109 = arith.mulf %106, %108 : vector<32x128xf32>
    %110 = vector.extract_strided_slice %1 {offsets = [2, 0], sizes = [1, 128], strides = [1, 1]} : vector<6x128xf32> to vector<1x128xf32>
    %111 = vector.broadcast %110 : vector<1x128xf32> to vector<32x128xf32>
    %112 = arith.addf %109, %111 : vector<32x128xf32>
    %113 = arith.addf %112, %0 : vector<32x128xf32>
    %c0_23 = arith.constant 0 : index
    %c0_24 = arith.constant 0 : index
    %114 = vector.load %arg3[%c0_23, %c0_24] : memref<128x128xbf16, #tpu.memory_space<vmem>>, vector<128x128xbf16>
    %115 = arith.truncf %113 : vector<32x128xf32> to vector<32x128xbf16>
    %cst_25 = arith.constant dense<0.000000e+00> : vector<32x128xf32>
    %116 = tpu.matmul %115, %114, %cst_25 {dimension_numbers = #tpu.dot_dimension_numbers<[1], [0], [0], [1], [0, 0, 1, 1], [], []>} : vector<32x128xbf16>, vector<128x128xbf16>, vector<32x128xf32> -> vector<32x128xf32>
    %117 = vector.extract_strided_slice %1 {offsets = [3, 0], sizes = [1, 128], strides = [1, 1]} : vector<6x128xf32> to vector<1x128xf32>
    %118 = vector.broadcast %117 : vector<1x128xf32> to vector<32x128xf32>
    %119 = arith.addf %116, %118 : vector<32x128xf32>
    %cst_26 = arith.constant 5.000000e-01 : f32
    %120 = vector.broadcast %cst_26 : f32 to vector<32x128xf32>
    %121 = arith.mulf %120, %119 : vector<32x128xf32>
    %cst_27 = arith.constant 0.707106769 : f32
    %122 = vector.broadcast %cst_27 : f32 to vector<32x128xf32>
    %123 = arith.mulf %119, %122 : vector<32x128xf32>
    %124 = math.erf %123 : vector<32x128xf32>
    %cst_28 = arith.constant 1.000000e+00 : f32
    %125 = vector.broadcast %cst_28 : f32 to vector<32x128xf32>
    %126 = arith.addf %125, %124 : vector<32x128xf32>
    %127 = arith.mulf %121, %126 : vector<32x128xf32>
    %128 = vector.extract_strided_slice %1 {offsets = [4, 0], sizes = [1, 128], strides = [1, 1]} : vector<6x128xf32> to vector<1x128xf32>
    %129 = vector.broadcast %128 : vector<1x128xf32> to vector<32x128xf32>
    %130 = arith.mulf %127, %129 : vector<32x128xf32>
    %131 = vector.extract_strided_slice %1 {offsets = [5, 0], sizes = [1, 128], strides = [1, 1]} : vector<6x128xf32> to vector<1x128xf32>
    %132 = vector.broadcast %131 : vector<1x128xf32> to vector<32x128xf32>
    %133 = arith.addf %130, %132 : vector<32x128xf32>
    %c0_29 = arith.constant 0 : index
    %c0_30 = arith.constant 0 : index
    %134 = vector.load %arg4[%c0_29, %c0_30] : memref<128x768xbf16, #tpu.memory_space<vmem>>, vector<128x768xbf16>
    %135 = arith.truncf %133 : vector<32x128xf32> to vector<32x128xbf16>
    %cst_31 = arith.constant dense<0.000000e+00> : vector<32x768xf32>
    %136 = tpu.matmul %135, %134, %cst_31 {dimension_numbers = #tpu.dot_dimension_numbers<[1], [0], [0], [1], [0, 0, 1, 1], [], []>} : vector<32x128xbf16>, vector<128x768xbf16>, vector<32x768xf32> -> vector<32x768xf32>
    %137 = vector.extract_strided_slice %136 {offsets = [0, 0], sizes = [32, 256], strides = [1, 1]} : vector<32x768xf32> to vector<32x256xf32>
    %c1_i32_32 = arith.constant 1 : i32
    %138 = tpu.dynamic_rotate %137 by %c1_i32_32 dim 0 : vector<32x256xf32>, i32 -> vector<32x256xf32>
    %c1_i32_33 = arith.constant 1 : i32
    %139 = vector.broadcast %c1_i32_33 : i32 to vector<32x1xi32>
    %140 = arith.cmpi sge, %19, %139 : vector<32x1xi32>
    %c17_i32_34 = arith.constant 17 : i32
    %141 = vector.broadcast %c17_i32_34 : i32 to vector<32x1xi32>
    %142 = arith.cmpi slt, %19, %141 : vector<32x1xi32>
    %143 = arith.andi %140, %142 : vector<32x1xi1>
    %cst_35 = arith.constant 0.000000e+00 : f32
    %144 = vector.shape_cast %143 : vector<32x1xi1> to vector<32x1xi1>
    %145 = vector.broadcast %144 : vector<32x1xi1> to vector<32x256xi1>
    %146 = vector.broadcast %cst_35 : f32 to vector<32x256xf32>
    %147 = arith.select %145, %138, %146 : vector<32x256xi1>, vector<32x256xf32>
    %148 = vector.extract_strided_slice %136 {offsets = [0, 256], sizes = [32, 256], strides = [1, 1]} : vector<32x768xf32> to vector<32x256xf32>
    %149 = arith.addf %147, %148 : vector<32x256xf32>
    %150 = vector.extract_strided_slice %136 {offsets = [0, 512], sizes = [32, 256], strides = [1, 1]} : vector<32x768xf32> to vector<32x256xf32>
    %c31_i32_36 = arith.constant 31 : i32
    %151 = tpu.dynamic_rotate %150 by %c31_i32_36 dim 0 : vector<32x256xf32>, i32 -> vector<32x256xf32>
    %c-1_i32_37 = arith.constant -1 : i32
    %152 = vector.broadcast %c-1_i32_37 : i32 to vector<32x1xi32>
    %153 = arith.cmpi sge, %19, %152 : vector<32x1xi32>
    %c15_i32_38 = arith.constant 15 : i32
    %154 = vector.broadcast %c15_i32_38 : i32 to vector<32x1xi32>
    %155 = arith.cmpi slt, %19, %154 : vector<32x1xi32>
    %156 = arith.andi %153, %155 : vector<32x1xi1>
    %cst_39 = arith.constant 0.000000e+00 : f32
    %157 = vector.shape_cast %156 : vector<32x1xi1> to vector<32x1xi1>
    %158 = vector.broadcast %157 : vector<32x1xi1> to vector<32x256xi1>
    %159 = vector.broadcast %cst_39 : f32 to vector<32x256xf32>
    %160 = arith.select %158, %151, %159 : vector<32x256xi1>, vector<32x256xf32>
    %161 = arith.addf %149, %160 : vector<32x256xf32>
    %162 = vector.extract_strided_slice %2 {offsets = [0, 0], sizes = [1, 256], strides = [1, 1]} : vector<2x256xf32> to vector<1x256xf32>
    %163 = vector.broadcast %162 : vector<1x256xf32> to vector<32x256xf32>
    %164 = arith.addf %161, %163 : vector<32x256xf32>
    %cst_40 = arith.constant 0.000000e+00 : f32
    %165 = vector.broadcast %cst_40 : f32 to vector<32x256xf32>
    %166 = arith.maximumf %164, %165 : vector<32x256xf32>
    %c0_41 = arith.constant 0 : index
    %c0_42 = arith.constant 0 : index
    %167 = vector.load %arg5[%c0_41, %c0_42] : memref<256x768xbf16, #tpu.memory_space<vmem>>, vector<256x768xbf16>
    %168 = arith.truncf %166 : vector<32x256xf32> to vector<32x256xbf16>
    %cst_43 = arith.constant dense<0.000000e+00> : vector<32x768xf32>
    %169 = tpu.matmul %168, %167, %cst_43 {dimension_numbers = #tpu.dot_dimension_numbers<[1], [0], [0], [1], [0, 0, 1, 1], [], []>} : vector<32x256xbf16>, vector<256x768xbf16>, vector<32x768xf32> -> vector<32x768xf32>
    %170 = vector.extract_strided_slice %169 {offsets = [0, 0], sizes = [32, 256], strides = [1, 1]} : vector<32x768xf32> to vector<32x256xf32>
    %c1_i32_44 = arith.constant 1 : i32
    %171 = tpu.dynamic_rotate %170 by %c1_i32_44 dim 0 : vector<32x256xf32>, i32 -> vector<32x256xf32>
    %c1_i32_45 = arith.constant 1 : i32
    %172 = vector.broadcast %c1_i32_45 : i32 to vector<32x1xi32>
    %173 = arith.cmpi sge, %19, %172 : vector<32x1xi32>
    %c17_i32_46 = arith.constant 17 : i32
    %174 = vector.broadcast %c17_i32_46 : i32 to vector<32x1xi32>
    %175 = arith.cmpi slt, %19, %174 : vector<32x1xi32>
    %176 = arith.andi %173, %175 : vector<32x1xi1>
    %cst_47 = arith.constant 0.000000e+00 : f32
    %177 = vector.shape_cast %176 : vector<32x1xi1> to vector<32x1xi1>
    %178 = vector.broadcast %177 : vector<32x1xi1> to vector<32x256xi1>
    %179 = vector.broadcast %cst_47 : f32 to vector<32x256xf32>
    %180 = arith.select %178, %171, %179 : vector<32x256xi1>, vector<32x256xf32>
    %181 = vector.extract_strided_slice %169 {offsets = [0, 256], sizes = [32, 256], strides = [1, 1]} : vector<32x768xf32> to vector<32x256xf32>
    %182 = arith.addf %180, %181 : vector<32x256xf32>
    %183 = vector.extract_strided_slice %169 {offsets = [0, 512], sizes = [32, 256], strides = [1, 1]} : vector<32x768xf32> to vector<32x256xf32>
    %c31_i32_48 = arith.constant 31 : i32
    %184 = tpu.dynamic_rotate %183 by %c31_i32_48 dim 0 : vector<32x256xf32>, i32 -> vector<32x256xf32>
    %c-1_i32_49 = arith.constant -1 : i32
    %185 = vector.broadcast %c-1_i32_49 : i32 to vector<32x1xi32>
    %186 = arith.cmpi sge, %19, %185 : vector<32x1xi32>
    %c15_i32_50 = arith.constant 15 : i32
    %187 = vector.broadcast %c15_i32_50 : i32 to vector<32x1xi32>
    %188 = arith.cmpi slt, %19, %187 : vector<32x1xi32>
    %189 = arith.andi %186, %188 : vector<32x1xi1>
    %cst_51 = arith.constant 0.000000e+00 : f32
    %190 = vector.shape_cast %189 : vector<32x1xi1> to vector<32x1xi1>
    %191 = vector.broadcast %190 : vector<32x1xi1> to vector<32x256xi1>
    %192 = vector.broadcast %cst_51 : f32 to vector<32x256xf32>
    %193 = arith.select %191, %184, %192 : vector<32x256xi1>, vector<32x256xf32>
    %194 = arith.addf %182, %193 : vector<32x256xf32>
    %195 = vector.extract_strided_slice %2 {offsets = [1, 0], sizes = [1, 256], strides = [1, 1]} : vector<2x256xf32> to vector<1x256xf32>
    %196 = vector.broadcast %195 : vector<1x256xf32> to vector<32x256xf32>
    %197 = arith.addf %194, %196 : vector<32x256xf32>
    %cst_52 = arith.constant 0.000000e+00 : f32
    %198 = vector.broadcast %cst_52 : f32 to vector<32x256xf32>
    %199 = arith.maximumf %197, %198 : vector<32x256xf32>
    %c0_53 = arith.constant 0 : index
    %c0_54 = arith.constant 0 : index
    %200 = vector.load %arg8[%c0_53, %c0_54] : memref<32x256xf32, #tpu.memory_space<vmem>>, vector<32x256xf32>
    tpu.vector_store %arg8[%c0_53, %c0_54], %199 {strides = array<i32>} : memref<32x256xf32, #tpu.memory_space<vmem>>, vector<32x256xf32>,
    return
  }
  func.func @transform_0(%arg0: i32) -> (i32, i32) {
    %c0_i32 = arith.constant 0 : i32
    %c0_i32_0 = arith.constant 0 : i32
    return %arg0, %c0_i32 : i32, i32
  }
  func.func @transform_1(%arg0: i32) -> (i32, i32) {
    %c0_i32 = arith.constant 0 : i32
    %c0_i32_0 = arith.constant 0 : i32
    %c0_i32_1 = arith.constant 0 : i32
    return %c0_i32, %c0_i32_0 : i32, i32
  }
  func.func @transform_2(%arg0: i32) -> (i32, i32) {
    %c0_i32 = arith.constant 0 : i32
    %c0_i32_0 = arith.constant 0 : i32
    %c0_i32_1 = arith.constant 0 : i32
    return %c0_i32, %c0_i32_0 : i32, i32
  }
  func.func @transform_3(%arg0: i32) -> (i32, i32) {
    %c0_i32 = arith.constant 0 : i32
    %c0_i32_0 = arith.constant 0 : i32
    %c0_i32_1 = arith.constant 0 : i32
    return %c0_i32, %c0_i32_0 : i32, i32
  }
  func.func @transform_4(%arg0: i32) -> (i32, i32) {
    %c0_i32 = arith.constant 0 : i32
    %c0_i32_0 = arith.constant 0 : i32
    %c0_i32_1 = arith.constant 0 : i32
    return %c0_i32, %c0_i32_0 : i32, i32
  }
  func.func @transform_5(%arg0: i32) -> (i32, i32) {
    %c0_i32 = arith.constant 0 : i32
    %c0_i32_0 = arith.constant 0 : i32
    %c0_i32_1 = arith.constant 0 : i32
    return %c0_i32, %c0_i32_0 : i32, i32
  }
  func.func @transform_6(%arg0: i32) -> (i32, i32) {
    %c0_i32 = arith.constant 0 : i32
    %c0_i32_0 = arith.constant 0 : i32
    %c0_i32_1 = arith.constant 0 : i32
    return %c0_i32, %c0_i32_0 : i32, i32
  }
  func.func @transform_7(%arg0: i32) -> (i32, i32) {
    %c0_i32 = arith.constant 0 : i32
    %c0_i32_0 = arith.constant 0 : i32
    return %arg0, %c0_i32 : i32, i32
  }
}

</mosaic_0001>

<bundles_post_ra>
// kernel: convmixer_block1_pallas.1
= control target key start
LH: loop header
LB: loop body
LE: loop exit
PB: predicated region body
PF: predicated region fallthrough
CT: control target
= control target key end

     0   :  { %s4120_s24 = smov 0   ;;  %s6200_s0 = inlined_call_operand.vmem [shape: f32[128,128], index: 0, kind: input, shape index: {}]   ;;  %s6201_s1 = inlined_call_operand.vmem [shape: bf16[128,896], index: 1, kind: input, shape index: {}]   ;;  %s6202_s2 = inlined_call_operand.vmem [shape: bf16[128,128], index: 2, kind: input, shape index: {}]   ;;  %s6203_s3 = inlined_call_operand.vmem [shape: bf16[128,768], index: 3, kind: input, shape index: {}]   ;;  %s6204_s4 = inlined_call_operand.vmem [shape: bf16[256,768], index: 4, kind: input, shape index: {}]   ;;  %s6205_s5 = inlined_call_operand.vmem [shape: f32[6,128], index: 5, kind: input, shape index: {}]   ;;  %s6206_s6 = inlined_call_operand.vmem [shape: f32[2,256], index: 6, kind: input, shape index: {}]   ;;  %s6207_s7 = inlined_call_operand.vmem [shape: f32[128,256], index: 7, kind: output, shape index: {}]  }
   0x1 LB: > { %s2970_s25 = sadd.s32 4294967295, %s4078_s24   ;;  %p2974_p0 = scmp.ge.s32.totalorder %s4078_s24, 1  ;;  %s4078_s24 = sphi %s4120_s24, %s17_s24  }
   0x2   : > { %p238_p1 = scmp.lt.s32.totalorder %s4078_s24, 5 }
   0x4   : > { %p239_p2 = pnand %p2974_p0, %p238_p1 }
   0x5   : > { %s2975_s23 = sshll.u32 (!%p239_p2), %s2970_s25, 2 }
   0x6   : > { %242 = sbr.rel (%p239_p2) target bundleno = 932 (0x3a4), region = 48  ;;  %p272_p3 = scmp.lt.s32.totalorder (!%p239_p2), %s2975_s23, 15 }
   0xb   : > { %v3178_v0 = vld [vmem:[%s6201_s1 + $0x188] sm:$0xf]  ;;  %v3875_v1 = vld [vmem:[%s6201_s1 + $0x1a0] sm:$0xf0]  ;;  %v3872_v2 = vld [vmem:[%s6201_s1 + $0x18c] sm:$0xf] }
   0xc   : > { %v3179_v3 = vor.u32 %v3875_v1, %v3178_v0  ;;  %v3180_v4 = vld [vmem:[%s6201_s1 + $0x1a4] sm:$0xf0]  ;;  %v3186_v5 = vld [vmem:[%s6201_s1 + $0x190] sm:$0xf]  ;;  %v3876_v6 = vld [vmem:[%s6201_s1 + $0x1a8] sm:$0xf0] }
   0xd   : > { %v3183_v7 = vor.u32 %v3872_v2, %v3180_v4  ;;  %v3187_v8 = vor.u32 %v3876_v6, %v3186_v5  ;;  %v3150_v9 = vld [vmem:[%s6201_s1 + $0x150] sm:$0xf]  ;;  %v3868_v10 = vld [vmem:[%s6201_s1 + $0x168] sm:$0xf0]  ;;  %v3865_v11 = vld [vmem:[%s6201_s1 + $0x154] sm:$0xf] }
   0xe   : > { %697 = vmatpush.bf16.msra.mxu0 %v3179_v3  ;;  %v3151_v12 = vor.u32 %v3868_v10, %v3150_v9  ;;  %v3152_v13 = vld [vmem:[%s6201_s1 + $0x16c] sm:$0xf0]  ;;  %v3158_v14 = vld [vmem:[%s6201_s1 + $0x158] sm:$0xf]  ;;  %v3869_v15 = vld [vmem:[%s6201_s1 + $0x170] sm:$0xf0] }
   0xf   : > { %716 = vmatpush.bf16.msra.mxu1 %v3183_v7  ;;  %735 = vmatpush.bf16.msra.mxu2 %v3187_v8  ;;  %v3155_v16 = vor.u32 %v3865_v11, %v3152_v13  ;;  %v3159_v17 = vor.u32 %v3869_v15, %v3158_v14  ;;  %v3873_v18 = vld [vmem:[%s6201_s1 + $0x194] sm:$0xf]  ;;  %v3188_v19 = vld [vmem:[%s6201_s1 + $0x1ac] sm:$0xf0]  ;;  %v3122_v20 = vld [vmem:[%s6201_s1 + $0x118] sm:$0xf] }
  0x10   : > { %v3191_v21 = vor.u32 %v3873_v18, %v3188_v19  ;;  %v3861_v22 = vld [vmem:[%s6201_s1 + $0x130] sm:$0xf0]  ;;  %v3858_v23 = vld [vmem:[%s6201_s1 + $0x11c] sm:$0xf]  ;;  %v3124_v24 = vld [vmem:[%s6201_s1 + $0x134] sm:$0xf0] }
  0x11   : > { %v3130_v25 = vld [vmem:[%s6201_s1 + $0x120] sm:$0xf]  ;;  %v3862_v26 = vld [vmem:[%s6201_s1 + $0x138] sm:$0xf0]  ;;  %v3123_v28 = vor.u32 %v3861_v22, %v3122_v20  ;;  %v3160_v29 = vld [vmem:[%s6201_s1 + $0x174] sm:$0xf0]  ;;  %v3127_v32 = vor.u32 %v3858_v23, %v3124_v24 }
  0x12   : > { %v3866_v27 = vld [vmem:[%s6201_s1 + $0x15c] sm:$0xf]  ;;  %698 = vmatpush.bf16.msra.mxu0 %v3151_v12  ;;  %754 = vmatpush.bf16.msra.mxu3 %v3191_v21  ;;  %v3094_v30 = vld [vmem:[%s6201_s1 + $0xe0] sm:$0xf]  ;;  %v3131_v33 = vor.u32 %v3862_v26, %v3130_v25  ;;  %v3851_v35 = vld [vmem:[%s6201_s1 + $0xe4] sm:$0xf] }
  0x13   : > { %v3854_v31 = vld [vmem:[%s6201_s1 + $0xf8] sm:$0xf0]  ;;  %717 = vmatpush.bf16.msra.mxu1 %v3155_v16  ;;  %736 = vmatpush.bf16.msra.mxu2 %v3159_v17  ;;  %v3163_v34 = vor.u32 %v3866_v27, %v3160_v29  ;;  %v3096_v36 = vld [vmem:[%s6201_s1 + $0xfc] sm:$0xf0]  ;;  %v3102_v37 = vld [vmem:[%s6201_s1 + $0xe8] sm:$0xf] }
  0x14   : > { %v3855_v38 = vld [vmem:[%s6201_s1 + $0x100] sm:$0xf0]  ;;  %v3132_v40 = vld [vmem:[%s6201_s1 + $0x13c] sm:$0xf0]  ;;  %v3095_v41 = vor.u32 %v3854_v31, %v3094_v30  ;;  %v3066_v43 = vld [vmem:[%s6201_s1 + $0xa8] sm:$0xf]  ;;  %v3099_v45 = vor.u32 %v3851_v35, %v3096_v36 }
  0x15   : > { %v3859_v39 = vld [vmem:[%s6201_s1 + $0x124] sm:$0xf]  ;;  %v3103_v46 = vor.u32 %v3855_v38, %v3102_v37  ;;  %v3844_v47 = vld [vmem:[%s6201_s1 + $0xac] sm:$0xf]  ;;  %v3104_v49 = vld [vmem:[%s6201_s1 + $0x104] sm:$0xf0] }
  0x16   : > { %699 = vmatpush.bf16.msra.mxu0 %v3123_v28  ;;  %755 = vmatpush.bf16.msra.mxu3 %v3163_v34  ;;  %v3135_v42 = vor.u32 %v3859_v39, %v3132_v40  ;;  %v3847_v44 = vld [vmem:[%s6201_s1 + $0xc0] sm:$0xf0]  ;;  %v3852_v48 = vld [vmem:[%s6201_s1 + $0xec] sm:$0xf]  ;;  %v3068_v50 = vld [vmem:[%s6201_s1 + $0xc4] sm:$0xf0] }
  0x17   : > { %718 = vmatpush.bf16.msra.mxu1 %v3127_v32  ;;  %737 = vmatpush.bf16.msra.mxu2 %v3131_v33  ;;  %v3074_v51 = vld [vmem:[%s6201_s1 + $0xb0] sm:$0xf]  ;;  %v3848_v52 = vld [vmem:[%s6201_s1 + $0xc8] sm:$0xf0]  ;;  %v3067_v53 = vor.u32 %v3847_v44, %v3066_v43  ;;  %v3107_v54 = vor.u32 %v3852_v48, %v3104_v49  ;;  %v3071_v57 = vor.u32 %v3844_v47, %v3068_v50  ;;  %v3837_v59 = vld [vmem:[%s6201_s1 + $0x74] sm:$0xf] }
  0x18   : > { %v3038_v55 = vld [vmem:[%s6201_s1 + $0x70] sm:$0xf]  ;;  %v3840_v56 = vld [vmem:[%s6201_s1 + $0x88] sm:$0xf0]  ;;  %v3075_v58 = vor.u32 %v3848_v52, %v3074_v51  ;;  %v3845_v60 = vld [vmem:[%s6201_s1 + $0xb4] sm:$0xf] }
  0x19   : > { %v3076_v61 = vld [vmem:[%s6201_s1 + $0xcc] sm:$0xf0]  ;;  %v3046_v63 = vld [vmem:[%s6201_s1 + $0x78] sm:$0xf]  ;;  %v3841_v0 = vld [vmem:[%s6201_s1 + $0x90] sm:$0xf0]  ;;  %v3039_v2 = vor.u32 %v3840_v56, %v3038_v55 }
  0x1a   : > { %700 = vmatpush.bf16.msra.mxu0 %v3095_v41  ;;  %756 = vmatpush.bf16.msra.mxu3 %v3135_v42  ;;  %v3040_v62 = vld [vmem:[%s6201_s1 + $0x8c] sm:$0xf0]  ;;  %v3010_v1 = vld [vmem:[%s6201_s1 + $0x38] sm:$0xf]  ;;  %v3079_v3 = vor.u32 %v3845_v60, %v3076_v61  ;;  %v3833_v4 = vld [vmem:[%s6201_s1 + $0x50] sm:$0xf0]  ;;  %v3047_v8 = vor.u32 %v3841_v0, %v3046_v63 }
  0x1b   : > { %719 = vmatpush.bf16.msra.mxu1 %v3099_v45  ;;  %738 = vmatpush.bf16.msra.mxu2 %v3103_v46  ;;  %v3830_v5 = vld [vmem:[%s6201_s1 + $0x3c] sm:$0xf]  ;;  %v3012_v6 = vld [vmem:[%s6201_s1 + $0x54] sm:$0xf0]  ;;  %v3043_v7 = vor.u32 %v3837_v59, %v3040_v62  ;;  %v3018_v11 = vld [vmem:[%s6201_s1 + $0x40] sm:$0xf]  ;;  %v3011_v15 = vor.u32 %v3833_v4, %v3010_v1 }
  0x1c   : > { %v3838_v9 = vld [vmem:[%s6201_s1 + $0x7c] sm:$0xf]  ;;  %v3048_v10 = vld [vmem:[%s6201_s1 + $0x94] sm:$0xf0]  ;;  %v2982_v13 = vld [vmem:[%s6201_s1] sm:$0xf]  ;;  %v3015_v20 = vor.u32 %v3830_v5, %v3012_v6 }
  0x1d   : > { %v3834_v12 = vld [vmem:[%s6201_s1 + $0x58] sm:$0xf0]  ;;  %v3051_v16 = vor.u32 %v3838_v9, %v3048_v10  ;;  %v3823_v17 = vld [vmem:[%s6201_s1 + $0x4] sm:$0xf]  ;;  %v2984_v18 = vld [vmem:[%s6201_s1 + $0x1c] sm:$0xf0] }
  0x1e   : > { %701 = vmatpush.bf16.msra.mxu0 %v3067_v53  ;;  %757 = vmatpush.bf16.msra.mxu3 %v3107_v54  ;;  %v3826_v14 = vld [vmem:[%s6201_s1 + $0x18] sm:$0xf0]  ;;  %v2990_v19 = vld [vmem:[%s6201_s1 + $0x8] sm:$0xf]  ;;  %s6213_s23 = smov (!%p272_p3, %s2975_s23), 15  ;;  %v3019_v21 = vor.u32 %v3834_v12, %v3018_v11  ;;  %v2987_v35 = vor.u32 %v3823_v17, %v2984_v18 }
  0x1f   : > { %720 = vmatpush.bf16.msra.mxu1 %v3071_v57  ;;  %739 = vmatpush.bf16.msra.mxu2 %v3075_v58  ;;  %v3827_v22 = vld [vmem:[%s6201_s1 + $0x20] sm:$0xf0]  ;;  %v3020_v24 = vld [vmem:[%s6201_s1 + $0x5c] sm:$0xf0]  ;;  %s2976_s22 = sshll.u32 %s6213_s23, 3  ;;  %v2983_v30 = vor.u32 %v3826_v14, %v2982_v13  ;;  %s3822_s12 = sshll.u32 %s6213_s23, 4 }
  0x20   : > { %v3831_v23 = vld [vmem:[%s6201_s1 + $0x44] sm:$0xf]  ;;  %v3202_v25 = vld [vmem:[%s6201_s1 + $0x1a0] sm:$0xf]  ;;  %v3878_v26 = vld [vmem:[%s6201_s1 + $0x1b8] sm:$0xf0]  ;;  %s4328_s9 = scalar_lea.vmem %s6200_s0, %s2976_s22  ;;  %v2991_v36 = vor.u32 %v3827_v22, %v2990_v19  ;;  %s6134_s15 = scalar_lea.vmem %s6207_s7, %s3822_s12 }
  0x21   : > { %v3194_v27 = vld [vmem:[%s6201_s1 + $0x198] sm:$0xf]  ;;  %v3877_v28 = vld [vmem:[%s6201_s1 + $0x1b0] sm:$0xf0]  ;;  %v3874_v29 = vld [vmem:[%s6201_s1 + $0x19c] sm:$0xf]  ;;  %v3023_v31 = vor.u32 %v3831_v23, %v3020_v24  ;;  %v3203_v37 = vor.u32 %v3878_v26, %v3202_v25 }
  0x22   : > { %702 = vmatpush.bf16.msra.mxu0 %v3039_v2  ;;  %758 = vmatpush.bf16.msra.mxu3 %v3079_v3  ;;  %v4340_v32 = vld [vmem:[%s4328_s9] sm:$0xff]  ;;  %v4343_v33 = vld [vmem:[%s4328_s9 + $0x8] sm:$0xff]  ;;  %v3196_v34 = vld [vmem:[%s6201_s1 + $0x1b4] sm:$0xf0]  ;;  %v3195_v38 = vor.u32 %v3877_v28, %v3194_v27 }
  0x23   : > { %721 = vmatpush.bf16.msra.mxu1 %v3043_v7  ;;  %740 = vmatpush.bf16.msra.mxu2 %v3047_v8  ;;  %v3824_v39 = vld [vmem:[%s6201_s1 + $0xc] sm:$0xf]  ;;  %v2992_v40 = vld [vmem:[%s6201_s1 + $0x24] sm:$0xf0]  ;;  %v4359_v42 = vpack.c.bf16 %v4343_v33, %v4340_v32  ;;  %v3199_v43 = vor.u32 %v3874_v29, %v3196_v34  ;;  %v3871_v44 = vld [vmem:[%s6201_s1 + $0x180] sm:$0xf0] }
  0x24   : > { %v3174_v41 = vld [vmem:[%s6201_s1 + $0x168] sm:$0xf]  ;;  %v3166_v45 = vld [vmem:[%s6201_s1 + $0x160] sm:$0xf]  ;;  %v3870_v46 = vld [vmem:[%s6201_s1 + $0x178] sm:$0xf0]  ;;  %v2995_v49 = vor.u32 %v3824_v39, %v2992_v40 }
  0x25   : > { %v3867_v47 = vld [vmem:[%s6201_s1 + $0x164] sm:$0xf]  ;;  %v3168_v48 = vld [vmem:[%s6201_s1 + $0x17c] sm:$0xf0]  ;;  %v3175_v50 = vor.u32 %v3871_v44, %v3174_v41  ;;  %v3167_v51 = vor.u32 %v3870_v46, %v3166_v45  ;;  %v3146_v52 = vld [vmem:[%s6201_s1 + $0x130] sm:$0xf] }
  0x26   : > { %703 = vmatpush.bf16.msra.mxu0 %v3011_v15  ;;  %759 = vmatpush.bf16.msra.mxu3 %v3051_v16  ;;  %v3171_v53 = vor.u32 %v3867_v47, %v3168_v48  ;;  %v3864_v54 = vld [vmem:[%s6201_s1 + $0x148] sm:$0xf0]  ;;  %v3138_v55 = vld [vmem:[%s6201_s1 + $0x128] sm:$0xf]  ;;  %v3863_v56 = vld [vmem:[%s6201_s1 + $0x140] sm:$0xf0] }
  0x27   : > { %722 = vmatpush.bf16.msra.mxu1 %v3015_v20  ;;  %741 = vmatpush.bf16.msra.mxu2 %v3019_v21  ;;  %v3860_v57 = vld [vmem:[%s6201_s1 + $0x12c] sm:$0xf]  ;;  %v3140_v58 = vld [vmem:[%s6201_s1 + $0x144] sm:$0xf0]  ;;  %v3147_v59 = vor.u32 %v3864_v54, %v3146_v52  ;;  %v3139_v60 = vor.u32 %v3863_v56, %v3138_v55  ;;  %v3118_v61 = vld [vmem:[%s6201_s1 + $0xf8] sm:$0xf] }
  0x28   : > { %v3143_v62 = vor.u32 %v3860_v57, %v3140_v58  ;;  %v3857_v63 = vld [vmem:[%s6201_s1 + $0x110] sm:$0xf0]  ;;  %v3110_v0 = vld [vmem:[%s6201_s1 + $0xf0] sm:$0xf]  ;;  %v3856_v1 = vld [vmem:[%s6201_s1 + $0x108] sm:$0xf0]  ;;  %v290_v57 = vlaneseq }
  0x29   : > { %v3853_v2 = vld [vmem:[%s6201_s1 + $0xf4] sm:$0xf]  ;;  %v3112_v3 = vld [vmem:[%s6201_s1 + $0x10c] sm:$0xf0]  ;;  %v3119_v4 = vor.u32 %v3857_v63, %v3118_v61  ;;  %v3111_v5 = vor.u32 %v3856_v1, %v3110_v0  ;;  %v3090_v7 = vld [vmem:[%s6201_s1 + $0xc0] sm:$0xf] }
  0x2a   : > { %704 = vmatpush.bf16.msra.mxu0 %v2983_v30  ;;  %760 = vmatpush.bf16.msra.mxu3 %v3023_v31  ;;  %v4417_v6 = vld [vmem:[%s4328_s9 + $0x10] sm:$0xff]  ;;  %v3115_v8 = vor.u32 %v3853_v2, %v3112_v3  ;;  %v3850_v9 = vld [vmem:[%s6201_s1 + $0xd8] sm:$0xf0]  ;;  %v3082_v10 = vld [vmem:[%s6201_s1 + $0xb8] sm:$0xf] }
  0x2b   : > { %723 = vmatpush.bf16.msra.mxu1 %v2987_v35  ;;  %742 = vmatpush.bf16.msra.mxu2 %v2991_v36  ;;  %v3849_v11 = vld [vmem:[%s6201_s1 + $0xd0] sm:$0xf0]  ;;  %v4432_v12 = vld [vmem:[%s4328_s9 + $0x18] sm:$0xff]  ;;  %v3091_v15 = vor.u32 %v3850_v9, %v3090_v7  ;;  %v3062_v17 = vld [vmem:[%s6201_s1 + $0x88] sm:$0xf] }
  0x2c   : > { %v3846_v13 = vld [vmem:[%s6201_s1 + $0xbc] sm:$0xf]  ;;  %v3084_v14 = vld [vmem:[%s6201_s1 + $0xd4] sm:$0xf0]  ;;  %v3083_v16 = vor.u32 %v3849_v11, %v3082_v10  ;;  %v408_v18 = vpack.c.bf16 %v4432_v12, %v4417_v6  ;;  %v3843_v20 = vld [vmem:[%s6201_s1 + $0xa0] sm:$0xf0] }
  0x2d   : > { %705 = vmatmul.bf16.vlgmr.msra.gmra.mxu0 %v4359_v42  ;;  %v3087_v19 = vor.u32 %v3846_v13, %v3084_v14  ;;  %v3054_v21 = vld [vmem:[%s6201_s1 + $0x80] sm:$0xf]  ;;  %v3842_v22 = vld [vmem:[%s6201_s1 + $0x98] sm:$0xf0]  ;;  %v3839_v23 = vld [vmem:[%s6201_s1 + $0x84] sm:$0xf]  ;;  %v3063_v25 = vor.u32 %v3843_v20, %v3062_v17 }
  0x2e   : > { %773 = vmatpush.bf16.msrb.mxu0 %v3195_v38  ;;  %724 = vmatmul.bf16.vlgmr.msra.gmra.mxu1 %v4359_v42  ;;  %v3056_v24 = vld [vmem:[%s6201_s1 + $0x9c] sm:$0xf0]  ;;  %v3055_v26 = vor.u32 %v3842_v22, %v3054_v21  ;;  %v3034_v27 = vld [vmem:[%s6201_s1 + $0x50] sm:$0xf]  ;;  %v3836_v29 = vld [vmem:[%s6201_s1 + $0x68] sm:$0xf0] }
  0x2f   : > { %811 = vmatpush.bf16.msrb.mxu2 %v3203_v37  ;;  %792 = vmatpush.bf16.msrb.mxu1 %v3199_v43  ;;  %v3059_v28 = vor.u32 %v3839_v23, %v3056_v24  ;;  %v3026_v30 = vld [vmem:[%s6201_s1 + $0x48] sm:$0xf]  ;;  %v3835_v31 = vld [vmem:[%s6201_s1 + $0x60] sm:$0xf0]  ;;  %v3832_v34 = vld [vmem:[%s6201_s1 + $0x4c] sm:$0xf]  ;;  %v3035_v36 = vor.u32 %v3836_v29, %v3034_v27 }
  0x30   : > { %743 = vmatmul.bf16.vlgmr.msra.gmra.mxu2 %v4359_v42  ;;  %761 = vmatpush.bf16.msra.mxu3 %v2995_v49  ;;  %v3028_v35 = vld [vmem:[%s6201_s1 + $0x64] sm:$0xf0]  ;;  %v3027_v37 = vor.u32 %v3835_v31, %v3026_v30  ;;  %v3006_v38 = vld [vmem:[%s6201_s1 + $0x18] sm:$0xf]  ;;  %v3829_v40 = vld [vmem:[%s6201_s1 + $0x30] sm:$0xf0] }
  0x31   : > { %v3031_v39 = vor.u32 %v3832_v34, %v3028_v35  ;;  %v2998_v41 = vld [vmem:[%s6201_s1 + $0x10] sm:$0xf]  ;;  %v3828_v43 = vld [vmem:[%s6201_s1 + $0x28] sm:$0xf0]  ;;  %v3825_v44 = vld [vmem:[%s6201_s1 + $0x14] sm:$0xf]  ;;  %v3007_v46 = vor.u32 %v3829_v40, %v3006_v38 }
  0x32   : > { %774 = vmatpush.bf16.msrb.mxu0 %v3167_v51  ;;  %v3000_v45 = vld [vmem:[%s6201_s1 + $0x2c] sm:$0xf0]  ;;  %v2999_v47 = vor.u32 %v3828_v43, %v2998_v41 }
  0x33   : > { %812 = vmatpush.bf16.msrb.mxu2 %v3175_v50  ;;  %793 = vmatpush.bf16.msrb.mxu1 %v3171_v53  ;;  %v3003_v48 = vor.u32 %v3825_v44, %v3000_v45  ;;  %v4576_v44 = vld [vmem:[%s6205_s5] sm:$0x3f] }
  0x34   : > { %762 = vmatmul.bf16.vlgmr.msra.gmra.mxu3 %v4359_v42 }
  0x36   : > { %775 = vmatpush.bf16.msrb.mxu0 %v3139_v60 }
  0x37   : > { %813 = vmatpush.bf16.msrb.mxu2 %v3147_v59  ;;  %794 = vmatpush.bf16.msrb.mxu1 %v3143_v62 }
  0x3a   : > { %776 = vmatpush.bf16.msrb.mxu0 %v3111_v5 }
  0x3b   : > { %814 = vmatpush.bf16.msrb.mxu2 %v3119_v4  ;;  %795 = vmatpush.bf16.msrb.mxu1 %v3115_v8 }
  0x3d   : > { %710 = vmatmul.bf16.gmra.mxu0 %v408_v18 }
  0x3e   : > { %777 = vmatpush.bf16.msrb.mxu0 %v3083_v16  ;;  %729 = vmatmul.bf16.gmra.mxu1 %v408_v18 }
  0x3f   : > { %815 = vmatpush.bf16.msrb.mxu2 %v3091_v15  ;;  %796 = vmatpush.bf16.msrb.mxu1 %v3087_v19 }
  0x40   : > { %748 = vmatmul.bf16.gmra.mxu2 %v408_v18 }
  0x42   : > { %778 = vmatpush.bf16.msrb.mxu0 %v3055_v26 }
  0x43   : > { %816 = vmatpush.bf16.msrb.mxu2 %v3063_v25  ;;  %797 = vmatpush.bf16.msrb.mxu1 %v3059_v28 }
  0x44   : > { %767 = vmatmul.bf16.gmra.mxu3 %v408_v18 }
  0x46   : > { %779 = vmatpush.bf16.msrb.mxu0 %v3027_v37 }
  0x47   : > { %817 = vmatpush.bf16.msrb.mxu2 %v3035_v36  ;;  %798 = vmatpush.bf16.msrb.mxu1 %v3031_v39 }
  0x4a   : > { %780 = vmatpush.bf16.msrb.mxu0 %v2999_v47 }
  0x4b   : > { %818 = vmatpush.bf16.msrb.mxu2 %v3007_v46  ;;  %799 = vmatpush.bf16.msrb.mxu1 %v3003_v48 }
  0x4d   : > { %781 = vmatmul.bf16.vlgmr.msrb.gmra.mxu0 %v4359_v42 }
  0x4e   : > { %800 = vmatmul.bf16.vlgmr.msrb.gmra.mxu1 %v4359_v42 }
  0x50   : > { %819 = vmatmul.bf16.vlgmr.msrb.gmra.mxu2 %v4359_v42  ;;  %v4509_v42 = vshrl.u32 %v290_v57, 7 }
  0x52   : > { %v4514_v62 = vand.u32 15, %v4509_v42  ;;  %vm834_vm0 = vcmp.lt.s32.totalorder %v4509_v42, 3  ;;  %vm867_vm1 = vcmp.lt.s32.totalorder %v4509_v42, 2  ;;  %vm904_vm4 = vcmp.lt.s32.totalorder %v4509_v42, 1 }
  0x53   : > { %v293_v14 = vadd.s32 16, %v4509_v42  ;;  %vm945_vm6 = vcmp.lt.s32.totalorder %v4509_v42, 7  ;;  %v292_v31 = vadd.s32 8, %v4509_v42  ;;  %vm982_vm9 = vcmp.lt.s32.totalorder %v4509_v42, 6 }
  0x54   : > { %vm839_vm2 = vcmp.ge.s32.totalorder %v4514_v62, 3  ;;  %vm872_vm3 = vcmp.ge.s32.totalorder %v4514_v62, 2  ;;  %vm909_vm5 = vcmp.ge.s32.totalorder %v4514_v62, 1  ;;  %vm1019_vm11 = vcmp.lt.s32.totalorder %v4509_v42, 5 }
  0x55   : > { %v4546_v21 = vand.u32 15, %v293_v14  ;;  %v4579_v47 = vand.u32 15, %v292_v31 }
  0x57   : > { %vm841_vm7 = vcmp.ge.s32.totalorder %v4546_v21, 3  ;;  %vm874_vm8 = vcmp.ge.s32.totalorder %v4546_v21, 2  ;;  %vm911_vm10 = vcmp.ge.s32.totalorder %v4546_v21, 1  ;;  %vm955_vm12 = vcmp.lt.s32.totalorder %v4579_v47, 15 }
  0x58   : > { %vm992_vm13 = vcmp.lt.s32.totalorder %v4579_v47, 14  ;;  %vm1029_vm14 = vcmp.lt.s32.totalorder %v4579_v47, 13 }
  0x5d   : > { %786 = vmatmul.bf16.gmra.mxu0 %v408_v18 }
  0x5e   : > { %805 = vmatmul.bf16.gmra.mxu1 %v408_v18 }
  0x60   : > { %824 = vmatmul.bf16.gmra.mxu2 %v408_v18 }
  0xaa   : > { %v706_v49 = vpop.f32.mrf.mxu0 }
  0xab   : > { %v725_v50 = vpop.f32.mrf.mxu1  ;;  %v830_v1 = vrot.slane %v706_v49, 5 }
  0xac   : > { %v863_v2 = vrot.slane %v725_v50, 6 }
  0xb2   : > { %v708_v52 = vpop.f32.mrf.mxu0 }
  0xb3   : > { %v744_v51 = vpop.f32.mrf.mxu2  ;;  %v727_v53 = vpop.f32.mrf.mxu1  ;;  %v831_v19 = vrot.slane %v708_v52, 5 }
  0xb4   : > { %v900_v7 = vrot.slane %v744_v51, 7  ;;  %v864_v20 = vrot.slane %v727_v53, 6 }
  0xb5   : > { %v837_v34 = vsel %vm834_vm0, %v830_v1, %v831_v19 }
  0xb6   : > { %v870_v35 = vsel %vm867_vm1, %v863_v2, %v864_v20 }
  0xb7   : > { %v763_v61 = vpop.f32.mrf.mxu3  ;;  %v897_v45 = vadd.f32 %v870_v35, %v837_v34 }
  0xba   : > { %v4501_v55 = vpop.f32.mrf.mxu0 }
  0xbb   : > { %v4499_v54 = vpop.f32.mrf.mxu2  ;;  %v4503_v56 = vpop.f32.mrf.mxu1  ;;  %v832_v25 = vrot.slane %v4501_v55, 5 }
  0xbc   : > { %v901_v22 = vrot.slane %v4499_v54, 7  ;;  %v865_v26 = vrot.slane %v4503_v56, 6  ;;  %v4589_v54 = vperm.slane %v4576_v44, 0 }
  0xbd   : > { %v836_v39 = vsel %vm834_vm0, %v831_v19, %v832_v25 }
  0xbe   : > { %v907_v36 = vsel %vm904_vm4, %v900_v7, %v901_v22  ;;  %v869_v40 = vsel %vm867_vm1, %v864_v20, %v865_v26  ;;  %v861_v51 = vsel %vm841_vm7, %v836_v39, 0.0 }
  0xbf   : > { %v765_v17 = vpop.f32.mrf.mxu3  ;;  %v934_v49 = vadd.f32 %v907_v36, %v897_v45  ;;  %v894_v52 = vsel %vm874_vm8, %v869_v40, 0.0 }
  0xc2   : > { %v4507_v59 = vpop.f32.mrf.mxu0 }
  0xc3   : > { %v4505_v58 = vpop.f32.mrf.mxu2  ;;  %v4511_v60 = vpop.f32.mrf.mxu1  ;;  %v833_v63 = vrot.slane %v4507_v59, 5 }
  0xc4   : > { %v866_v0 = vrot.slane %v4511_v60, 6  ;;  %v902_v41 = vrot.slane %v4505_v58, 7 }
  0xc5   : > { %v838_v3 = vsel %vm834_vm0, %v833_v63, %v830_v1 }
  0xc6   : > { %v871_v4 = vsel %vm867_vm1, %v866_v0, %v863_v2  ;;  %v859_v11 = vsel %vm839_vm2, %v838_v3, 0.0  ;;  %v906_v55 = vsel %vm904_vm4, %v901_v22, %v902_v41  ;;  %v868_v14 = vsel %vm867_vm1, %v865_v26, %v866_v0 }
  0xc7   : > { %v892_v13 = vsel %vm872_vm3, %v871_v4, 0.0  ;;  %v768_v50 = vpop.f32.mrf.mxu3  ;;  %v294_v4 = vadd.s32 24, %v4509_v42 }
  0xc8   : > { %v896_v18 = vadd.f32 %v892_v13, %v859_v11 }
  0xc9   : > { %v4626_v0 = vand.u32 15, %v294_v4 }
  0xca   : > { %v4533_v9 = vpop.f32.mrf.mxu0 }
  0xcb   : > { %v4530_v5 = vpop.f32.mrf.mxu2  ;;  %v4537_v10 = vpop.f32.mrf.mxu1  ;;  %v941_v28 = vrot.slane %v4533_v9, 1  ;;  %vm957_vm15 = vcmp.lt.s32.totalorder %v4626_v0, 15  ;;  %vm1031_vm1 = vcmp.lt.s32.totalorder %v4626_v0, 13 }
  0xcc   : > { %v903_v8 = vrot.slane %v4530_v5, 7  ;;  %v978_v48 = vrot.slane %v4537_v10, 2 }
  0xce   : > { %v908_v15 = vsel %vm904_vm4, %v903_v8, %v900_v7  ;;  %v835_v7 = vsel %vm834_vm0, %v832_v25, %v833_v63  ;;  %v898_v63 = vadd.f32 %v894_v52, %v861_v51  ;;  %v905_v60 = vsel %vm904_vm4, %v902_v41, %v903_v8 }
  0xcf   : > { %v929_v16 = vsel %vm909_vm5, %v908_v15, 0.0  ;;  %v931_v15 = vsel %vm911_vm10, %v906_v55, 0.0  ;;  %vm994_vm0 = vcmp.lt.s32.totalorder %v4626_v0, 14 }
  0xd0   : > { %v933_v23 = vadd.f32 %v929_v16, %v896_v18  ;;  %v938_v18 = vadd.f32 %v934_v49, %v765_v17  ;;  %v935_v22 = vadd.f32 %v931_v15, %v898_v63  ;;  %v3885_v15 = vld [vmem:[%s6202_s2 + $0x30] sm:$0xff] }
  0xd2   : > { %v784_v27 = vpop.f32.mrf.mxu0  ;;  %v937_v37 = vadd.f32 %v933_v23, %v763_v61  ;;  %v899_v23 = vadd.f32 %v868_v14, %v835_v7 }
  0xd3   : > { %v4549_v24 = vpop.f32.mrf.mxu2  ;;  %v942_v29 = vrot.slane %v784_v27, 1  ;;  %v803_v30 = vpop.f32.mrf.mxu1 }
  0xd4   : > { %v979_v43 = vrot.slane %v803_v30, 2  ;;  %v1015_v56 = vrot.slane %v4549_v24, 3  ;;  %v936_v27 = vadd.f32 %v905_v60, %v899_v23  ;;  %v770_v30 = vpop.f32.mrf.mxu3  ;;  %v3884_v24 = vld [vmem:[%s6202_s2 + $0x28] sm:$0xff] }
  0xd5   : > { %v948_v38 = vsel %vm945_vm6, %v941_v28, %v942_v29 }
  0xd6   : > { %v974_v46 = vadd.f32 %v948_v38, %v937_v37  ;;  %v985_v57 = vsel %vm982_vm9, %v978_v48, %v979_v43  ;;  %v939_v37 = vadd.f32 %v935_v22, %v768_v50  ;;  %v940_v49 = vadd.f32 %v936_v27, %v770_v30 }
  0xd8   : > { %v1011_v1 = vadd.f32 %v985_v57, %v974_v46  ;;  %v3886_v57 = vld [vmem:[%s6202_s2 + $0x38] sm:$0xff] }
  0xd9   : > { %1314 = vmatpush.bf16.msrb.mxu3 %v3886_v57 }
  0xda   : > { %v787_v61 = vpop.f32.mrf.mxu0 }
  0xdb   : > { %v822_v53 = vpop.f32.mrf.mxu2  ;;  %v943_v2 = vrot.slane %v787_v61, 1  ;;  %v806_v3 = vpop.f32.mrf.mxu1 }
  0xdc   : > { %v1016_v58 = vrot.slane %v822_v53, 3  ;;  %v980_v13 = vrot.slane %v806_v3, 2 }
  0xdd   : > { %v947_v59 = vsel %vm945_vm6, %v942_v29, %v943_v2  ;;  %1315 = vmatpush.bf16.msrb.mxu3 %v3885_v15 }
  0xde   : > { %v1022_v11 = vsel %vm1019_vm11, %v1015_v56, %v1016_v58  ;;  %v971_v19 = vsel %vm955_vm12, %v947_v59, 0.0  ;;  %v984_v17 = vsel %vm982_vm9, %v979_v43, %v980_v13 }
  0xdf   : > { %v1048_v16 = vadd.f32 %v1022_v11, %v1011_v1  ;;  %v975_v25 = vadd.f32 %v971_v19, %v938_v18  ;;  %v1008_v34 = vsel %vm992_vm13, %v984_v17, 0.0 }
  0xe1   : > { %v4623_v20 = vadd.f32 %v4589_v54, %v1048_v16  ;;  %v1012_v38 = vadd.f32 %v1008_v34, %v975_v25  ;;  %1316 = vmatpush.bf16.msrb.mxu3 %v3884_v24 }
  0xe2   : > { %v789_v8 = vpop.f32.mrf.mxu0 }
  0xe3   : > { %v4631_v26 = vmul.f32 0.70710677, %v4623_v20  ;;  %v825_v5 = vpop.f32.mrf.mxu2  ;;  %v944_v35 = vrot.slane %v789_v8, 1  ;;  %v808_v36 = vpop.f32.mrf.mxu1  ;;  %v3883_v8 = vld [vmem:[%s6202_s2 + $0x20] sm:$0xff] }
  0xe4   : > { %v1017_v29 = vrot.slane %v825_v5, 3  ;;  %v981_v40 = vrot.slane %v808_v36, 2 }
  0xe5   : > { %v1065_v31 = vmul.f32 %v4631_v26, %v4631_v26  ;;  %v946_v45 = vsel %vm945_vm6, %v943_v2, %v944_v35  ;;  %v949_v46 = vsel %vm945_vm6, %v944_v35, %v941_v28  ;;  %1317 = vmatpush.bf16.msrb.mxu3 %v3883_v8 }
  0xe6   : > { %v1021_v39 = vsel %vm1019_vm11, %v1016_v58, %v1017_v29  ;;  %v973_v50 = vsel %vm957_vm15, %v949_v46, 0.0  ;;  %v976_v55 = vadd.f32 %v946_v45, %v939_v37  ;;  %v986_v28 = vsel %vm982_vm9, %v981_v40, %v978_v48 }
  0xe7   : > { %v4639_v41 = vmin.f32 %v1065_v31, 16.0  ;;  %v1045_v43 = vsel %vm1029_vm14, %v1021_v39, 0.0  ;;  %v977_v9 = vadd.f32 %v973_v50, %v940_v49  ;;  %v983_v4 = vsel %vm982_vm9, %v980_v13, %v981_v40  ;;  %v3882_v40 = vld [vmem:[%s6202_s2 + $0x18] sm:$0xff] }
  0xe8   : > { %v1049_v51 = vadd.f32 %v1045_v43, %v1012_v38  ;;  %v1010_v48 = vsel %vm994_vm0, %v986_v28, 0.0  ;;  %v1013_v14 = vadd.f32 %v983_v4, %v976_v55 }
  0xe9   : > { %v1067_v52 = vmul.f32 2.1237322e-06, %v4639_v41  ;;  %v1078_v53 = vmul.f32 3.8918573e-05, %v4639_v41  ;;  %v1014_v59 = vadd.f32 %v1010_v48, %v977_v9  ;;  %1318 = vmatpush.bf16.msrb.mxu3 %v3882_v40  ;;  %v3881_v9 = vld [vmem:[%s6202_s2 + $0x10] sm:$0xff] }
  0xea   : > { %v4655_v58 = vadd.f32 %v4589_v54, %v1049_v51 }
  0xeb   : > { %v1068_v61 = vadd.f32 0.00028619796, %v1067_v52  ;;  %v1079_v1 = vadd.f32 0.001143296, %v1078_v53  ;;  %v827_v2 = vpop.f32.mrf.mxu2 }
  0xec   : > { %v4663_v3 = vmul.f32 0.70710677, %v4655_v58  ;;  %v1018_v7 = vrot.slane %v827_v2, 3 }
  0xed   : > { %v1069_v10 = vmul.f32 %v1068_v61, %v4639_v41  ;;  %v1080_v11 = vmul.f32 %v1079_v1, %v4639_v41  ;;  %1319 = vmatpush.bf16.msrb.mxu3 %v3881_v9 }
  0xee   : > { %v1105_v16 = vmul.f32 %v4663_v3, %v4663_v3  ;;  %v1020_v13 = vsel %vm1019_vm11, %v1017_v29, %v1018_v7  ;;  %v1023_v18 = vsel %vm1019_vm11, %v1018_v7, %v1015_v56 }
  0xef   : > { %v1081_v63 = vadd.f32 0.014752088, %v1080_v11  ;;  %v1047_v19 = vsel %vm1031_vm1, %v1023_v18, 0.0  ;;  %v1050_v60 = vadd.f32 %v1020_v13, %v1013_v14  ;;  %v1070_v25 = vadd.f32 0.0036580483, %v1069_v10  ;;  %v3880_v11 = vld [vmem:[%s6202_s2 + $0x8] sm:$0xff] }
  0xf0   : > { %v4681_v22 = vmin.f32 %v1105_v16, 16.0  ;;  %v1051_v23 = vadd.f32 %v1047_v19, %v1014_v59 }
  0xf1   : > { %v1082_v17 = vmul.f32 %v1081_v63, %v4639_v41  ;;  %v4685_v5 = vadd.f32 %v4589_v54, %v1050_v60  ;;  %v1071_v31 = vmul.f32 %v1070_v25, %v4639_v41  ;;  %1320 = vmatpush.bf16.msrb.mxu3 %v3880_v11 }
  0xf2   : > { %v1107_v27 = vmul.f32 2.1237322e-06, %v4681_v22  ;;  %v4692_v56 = vadd.f32 %v4589_v54, %v1051_v23  ;;  %v1118_v36 = vmul.f32 3.8918573e-05, %v4681_v22  ;;  %v3879_v23 = vld [vmem:[%s6202_s2] sm:$0xff] }
  0xf3   : > { %v1083_v29 = vadd.f32 0.112945676, %v1082_v17  ;;  %v4698_v30 = vmul.f32 0.70710677, %v4685_v5  ;;  %v1072_v46 = vadd.f32 0.05243302, %v1071_v31 }
  0xf4   : > { %v4703_v35 = vmul.f32 0.70710677, %v4692_v56  ;;  %v1108_v54 = vadd.f32 0.00028619796, %v1107_v27  ;;  %v1119_v43 = vadd.f32 0.001143296, %v1118_v36 }
  0xf5   : > { %v1084_v34 = vmul.f32 %v1083_v29, %v4639_v41  ;;  %v1145_v37 = vmul.f32 %v4698_v30, %v4698_v30  ;;  %v1073_v2 = vmul.f32 %v1072_v46, %v4639_v41  ;;  %1321 = vmatpush.bf16.msrb.mxu3 %v3879_v23 }
  0xf6   : > { %v1185_v39 = vmul.f32 %v4703_v35, %v4703_v35  ;;  %v1120_v50 = vmul.f32 %v1119_v43, %v4681_v22  ;;  %v1109_v52 = vmul.f32 %v1108_v54, %v4681_v22 }
  0xf7   : > { %v1085_v38 = vadd.f32 0.4994258, %v1084_v34  ;;  %v4713_v45 = vmin.f32 %v1145_v37, 16.0  ;;  %v1074_v15 = vadd.f32 0.18741608, %v1073_v2 }
  0xf8   : > { %v4716_v51 = vmin.f32 %v1185_v39, 16.0  ;;  %v1121_v1 = vadd.f32 0.014752088, %v1120_v50  ;;  %v1110_v4 = vadd.f32 0.0036580483, %v1109_v52 }
  0xf9   : > { %v1086_v49 = vmul.f32 %v1085_v38, %v4639_v41  ;;  %v1147_v53 = vmul.f32 2.1237322e-06, %v4713_v45  ;;  %v1158_v28 = vmul.f32 3.8918573e-05, %v4713_v45  ;;  %v1075_v29 = vmul.f32 %v1074_v15, %v4639_v41 }
  0xfa   : > { %v1187_v57 = vmul.f32 2.1237322e-06, %v4716_v51  ;;  %v1122_v48 = vmul.f32 %v1121_v1, %v4681_v22  ;;  %v1198_v13 = vmul.f32 3.8918573e-05, %v4716_v51  ;;  %v1111_v18 = vmul.f32 %v1110_v4, %v4681_v22 }
  0xfb   : > { %v1087_v55 = vadd.f32 1.0, %v1086_v49  ;;  %v1148_v61 = vadd.f32 0.00028619796, %v1147_v53  ;;  %v1159_v14 = vadd.f32 0.001143296, %v1158_v28 }
  0xfc   : > { %v1188_v10 = vadd.f32 0.00028619796, %v1187_v57  ;;  %v1123_v16 = vadd.f32 0.112945676, %v1122_v48  ;;  %v1199_v24 = vadd.f32 0.001143296, %v1198_v13 }
  0xfd   : > { %4055 = vrcp.f32 %v1087_v55  ;;  %v1149_v7 = vmul.f32 %v1148_v61, %v4713_v45  ;;  %v1160_v59 = vmul.f32 %v1159_v14, %v4713_v45  ;;  %v1099_v54 = vand.u32 2147483648, %v1087_v55 }
  0xfe   : > { %v1189_v60 = vmul.f32 %v1188_v10, %v4716_v51  ;;  %v1124_v25 = vmul.f32 %v1123_v16, %v4681_v22  ;;  %v1200_v34 = vmul.f32 %v1199_v24, %v4716_v51  ;;  %v1112_v37 = vadd.f32 0.05243302, %v1111_v18 }
  0xff   : > { %v1150_v63 = vadd.f32 0.0036580483, %v1149_v7  ;;  %v1161_v17 = vadd.f32 0.014752088, %v1160_v59  ;;  %v1097_v50 = vand.u32 2147483647, %v1087_v55  ;;  %vm1093_vm3 = vweird.f32 %v1087_v55 }
 0x100   : > { %v1125_v8 = vadd.f32 0.4994258, %v1124_v25  ;;  %v1190_v39 = vadd.f32 0.0036580483, %v1189_v60  ;;  %v1201_v46 = vadd.f32 0.014752088, %v1200_v34  ;;  %v1113_v28 = vmul.f32 %v1112_v37, %v4681_v22 }
 0x101   : > { %v1162_v31 = vmul.f32 %v1161_v17, %v4713_v45  ;;  %v1151_v38 = vmul.f32 %v1150_v63, %v4713_v45  ;;  %v1076_v57 = vadd.f32 1.1283791, %v1075_v29  ;;  %v1100_v61 = vor.u32 1.1754944e-38, %v1099_v54 }
 0x102   : > { %v1126_v40 = vmul.f32 %v1125_v8, %v4681_v22  ;;  %v1202_v53 = vmul.f32 %v1201_v46, %v4716_v51  ;;  %v1191_v2 = vmul.f32 %v1190_v39, %v4716_v51  ;;  %vm1098_vm8 = vcmp.eq.f32.partialorder %v1097_v50, 8.507059e+37 }
 0x103   : > { %v4056_v19 = vpop.eup %4055  ;;  %v1163_v43 = vadd.f32 0.112945676, %v1162_v31  ;;  %v1152_v1 = vadd.f32 0.05243302, %v1151_v38  ;;  %v1077_v48 = vmul.f32 %v1076_v57, %v4631_v26  ;;  %v1114_v14 = vadd.f32 0.18741608, %v1113_v28 }
 0x104   : > { %v1089_v27 = vmul.f32 %v4056_v19, %v1087_v55  ;;  %vm1094_vm2 = vweird.f32 %v4056_v19  ;;  %v1127_v41 = vadd.f32 1.0, %v1126_v40  ;;  %v1203_v11 = vadd.f32 0.112945676, %v1202_v53 }
 0x105   : > { %v1164_v52 = vmul.f32 %v1163_v43, %v4713_v45  ;;  %vm1095_vm7 = vmor %vm1093_vm3, %vm1094_vm2  ;;  %v1153_v55 = vmul.f32 %v1152_v1, %v4713_v45  ;;  %v1192_v16 = vadd.f32 0.05243302, %v1191_v2  ;;  %v1057_v46 = vmul.f32 0.5, %v4623_v20 }
 0x106   : > { %v1090_v36 = vsub.f32 1.0, %v1089_v27  ;;  %4057 = vrcp.f32 %v1127_v41  ;;  %v1204_v59 = vmul.f32 %v1203_v11, %v4716_v51  ;;  %v1139_v29 = vand.u32 2147483648, %v1127_v41 }
 0x107   : > { %v1165_v7 = vadd.f32 0.4994258, %v1164_v52  ;;  %v1154_v25 = vadd.f32 0.18741608, %v1153_v55  ;;  %v1193_v17 = vmul.f32 %v1192_v16, %v4716_v51  ;;  %vm1133_vm11 = vweird.f32 %v1127_v41 }
 0x108   : > { %v1091_v49 = vmul.f32 %v4056_v19, %v1090_v36  ;;  %v1205_v60 = vadd.f32 0.4994258, %v1204_v59  ;;  %v1137_v36 = vand.u32 2147483647, %v1127_v41  ;;  %v1140_v40 = vor.u32 1.1754944e-38, %v1139_v29 }
 0x109   : > { %v1166_v15 = vmul.f32 %v1165_v7, %v4713_v45  ;;  %v1155_v54 = vmul.f32 %v1154_v25, %v4713_v45  ;;  %v1194_v37 = vadd.f32 0.18741608, %v1193_v17  ;;  %v1058_v20 = vmul.f32 0.5, %v4655_v58 }
 0x10a   : > { %v1092_v9 = vadd.f32 %v4056_v19, %v1091_v49  ;;  %v1206_v26 = vmul.f32 %v1205_v60, %v4716_v51  ;;  %vm1138_vm14 = vcmp.eq.f32.partialorder %v1137_v36, 8.507059e+37  ;;  %v1059_v36 = vmul.f32 0.5, %v4685_v5 }
 0x10b   : > { %v1167_v18 = vadd.f32 1.0, %v1166_v15  ;;  %v1156_v52 = vadd.f32 1.1283791, %v1155_v54  ;;  %v1195_v53 = vmul.f32 %v1194_v37, %v4716_v51 }
 0x10c   : > { %v1096_v4 = vsel %vm1095_vm7, %v4056_v19, %v1092_v9  ;;  %v4058_v63 = vpop.eup %4057  ;;  %v1115_v19 = vmul.f32 %v1114_v14, %v4681_v22  ;;  %v4756_v8 = vadd.f32 1.0, %v1206_v26 }
 0x10d   : > { %v1101_v10 = vsel %vm1098_vm8, %v1100_v61, %v1096_v4  ;;  %v1129_v23 = vmul.f32 %v4058_v63, %v1127_v41  ;;  %4059 = vrcp.f32 %v1167_v18  ;;  %vm1134_vm9 = vweird.f32 %v4058_v63 }
 0x10e   : > { %v1102_v13 = vmul.f32 %v1101_v10, %v1077_v48  ;;  %v1116_v31 = vadd.f32 1.1283791, %v1115_v19  ;;  %4061 = vrcp.f32 %v4756_v8  ;;  %vm1135_vm13 = vmor %vm1133_vm11, %vm1134_vm9  ;;  %v1233_v61 = vperm.slane %v4576_v44, 1 }
 0x10f   : > { %v1130_v27 = vsub.f32 1.0, %v1129_v23  ;;  %v1179_v41 = vand.u32 2147483648, %v1167_v18  ;;  %v1177_v4 = vand.u32 2147483647, %v1167_v18  ;;  %v1157_v51 = vmul.f32 %v1156_v52, %v4698_v30 }
 0x110   : > { %v3204_v24 = vclamps-f32 %v1102_v13, 1.0  ;;  %v1117_v49 = vmul.f32 %v1116_v31, %v4663_v3  ;;  %v1238_v3 = vperm.slane %v4576_v44, 2  ;;  %v1196_v11 = vadd.f32 1.1283791, %v1195_v53 }
 0x111   : > { %v1131_v34 = vmul.f32 %v4058_v63, %v1130_v27  ;;  %vm1173_vm1 = vweird.f32 %v1167_v18  ;;  %v1180_v55 = vor.u32 1.1754944e-38, %v1179_v41  ;;  %vm1178_vm3 = vcmp.eq.f32.partialorder %v1177_v4, 8.507059e+37  ;;  %v3414_v41 = vld [vmem:[%s6203_s3 + $0x150] sm:$0xf]  ;;  %v3416_v4 = vld [vmem:[%s6203_s3 + $0x168] sm:$0xf0] }
 0x112   : > { %v1225_v39 = vadd.f32 1.0, %v3204_v24  ;;  %v1217_v13 = vand.u32 2147483647, %v4756_v8  ;;  %v1219_v58 = vand.u32 2147483648, %v4756_v8  ;;  %vm1213_vm8 = vweird.f32 %v4756_v8 }
 0x113   : > { %v4060_v22 = vpop.eup %4059  ;;  %v1132_v38 = vadd.f32 %v4058_v63, %v1131_v34  ;;  %v1197_v24 = vmul.f32 %v1196_v11, %v4703_v35  ;;  %v3422_v11 = vld [vmem:[%s6203_s3 + $0x158] sm:$0xf] }
 0x114   : > { %v1169_v43 = vmul.f32 %v4060_v22, %v1167_v18  ;;  %v1229_v28 = vmul.f32 %v1225_v39, %v1057_v46  ;;  %v4062_v1 = vpop.eup %4061  ;;  %vm1174_vm0 = vweird.f32 %v4060_v22  ;;  %v1220_v26 = vor.u32 1.1754944e-38, %v1219_v58 }
 0x115   : > { %v1136_v50 = vsel %vm1135_vm13, %v4058_v63, %v1132_v38  ;;  %v1209_v10 = vmul.f32 %v4062_v1, %v4756_v8  ;;  %vm1175_vm2 = vmor %vm1173_vm1, %vm1174_vm0  ;;  %vm1214_vm7 = vweird.f32 %v4062_v1  ;;  %vm1218_vm11 = vcmp.eq.f32.partialorder %v1217_v13, 8.507059e+37  ;;  %v3390_v13 = vld [vmem:[%s6203_s3 + $0x120] sm:$0xf] }
 0x116   : > { %v1141_v45 = vsel %vm1138_vm14, %v1140_v40, %v1136_v50  ;;  %v1170_v57 = vsub.f32 1.0, %v1169_v43  ;;  %v1234_v15 = vmul.f32 %v1233_v61, %v1229_v28  ;;  %vm1215_vm9 = vmor %vm1213_vm8, %vm1214_vm7  ;;  %v1060_v40 = vmul.f32 0.5, %v4692_v56 }
 0x117   : > { %v1142_v9 = vmul.f32 %v1141_v45, %v1117_v49  ;;  %v1210_v16 = vsub.f32 1.0, %v1209_v10 }
 0x118   : > { %v1171_v2 = vmul.f32 %v4060_v22, %v1170_v57  ;;  %v1239_v25 = vadd.f32 %v1238_v3, %v1234_v15 }
 0x119   : > { %v3205_v7 = vclamps-f32 %v1142_v9, 1.0  ;;  %v1211_v19 = vmul.f32 %v4062_v1, %v1210_v16  ;;  %v3930_v16 = vld [vmem:[%s6203_s3 + $0x15c] sm:$0xf] }
 0x11a   : > { %v1172_v48 = vadd.f32 %v4060_v22, %v1171_v2  ;;  %v1243_v54 = vadd.f32 %v1239_v25, %v4340_v32  ;;  %v3929_v2 = vld [vmem:[%s6203_s3 + $0x154] sm:$0xf] }
 0x11b   : > { %v1226_v14 = vadd.f32 1.0, %v3205_v7  ;;  %v1212_v17 = vadd.f32 %v4062_v1, %v1211_v19  ;;  %v3923_v19 = vld [vmem:[%s6203_s3 + $0x124] sm:$0xf] }
 0x11c   : > { %v1176_v59 = vsel %vm1175_vm2, %v4060_v22, %v1172_v48  ;;  %v3933_v48 = vld [vmem:[%s6203_s3 + $0x16c] sm:$0xf0] }
 0x11d   : > { %v1230_v63 = vmul.f32 %v1226_v14, %v1058_v20  ;;  %v1181_v60 = vsel %vm1178_vm3, %v1180_v55, %v1176_v59  ;;  %v1216_v29 = vsel %vm1215_vm9, %v4062_v1, %v1212_v17  ;;  %v3932_v1 = vld [vmem:[%s6203_s3 + $0x164] sm:$0xf0]  ;;  %v3423_v55 = vor.u32 %v3933_v48, %v3422_v11  ;;  %v3424_v59 = vld [vmem:[%s6203_s3 + $0x170] sm:$0xf0] }
 0x11e   : > { %v1182_v23 = vmul.f32 %v1181_v60, %v1157_v51  ;;  %v1221_v31 = vsel %vm1218_vm11, %v1220_v26, %v1216_v29  ;;  %v3419_v51 = vor.u32 %v3929_v2, %v3416_v4  ;;  %v3926_v60 = vld [vmem:[%s6203_s3 + $0x134] sm:$0xf0]  ;;  %v3398_v26 = vld [vmem:[%s6203_s3 + $0x128] sm:$0xf]  ;;  %v3927_v29 = vld [vmem:[%s6203_s3 + $0x13c] sm:$0xf0] }
 0x11f   : > { %v1235_v30 = vmul.f32 %v1233_v61, %v1230_v63  ;;  %v1222_v22 = vmul.f32 %v1221_v31, %v1197_v24  ;;  %v3427_v63 = vor.u32 %v3930_v16, %v3424_v59  ;;  %1847 = vmatpush.bf16.msra.mxu2 %v3423_v55  ;;  %v3391_v17 = vor.u32 %v3926_v60, %v3390_v13  ;;  %v3924_v31 = vld [vmem:[%s6203_s3 + $0x12c] sm:$0xf]  ;;  %v3918_v2 = vld [vmem:[%s6203_s3 + $0xfc] sm:$0xf]  ;;  %v3342_v55 = vld [vmem:[%s6203_s3 + $0xc0] sm:$0xf] }
 0x120   : > { %v3206_v18 = vclamps-f32 %v1182_v23, 1.0  ;;  %1828 = vmatpush.bf16.msra.mxu1 %v3419_v51  ;;  %v3392_v23 = vld [vmem:[%s6203_s3 + $0x138] sm:$0xf0]  ;;  %v3376_v51 = vld [vmem:[%s6203_s3 + $0x110] sm:$0xf0] }
 0x121   : > { %v1240_v27 = vadd.f32 %v1238_v3, %v1235_v30  ;;  %v3207_v39 = vclamps-f32 %v1222_v22, 1.0  ;;  %1866 = vmatpush.bf16.msra.mxu3 %v3427_v63  ;;  %v3400_v22 = vld [vmem:[%s6203_s3 + $0x140] sm:$0xf0] }
 0x122   : > { %v1227_v34 = vadd.f32 1.0, %v3206_v18  ;;  %v3395_v18 = vor.u32 %v3923_v19, %v3392_v23  ;;  %v3911_v63 = vld [vmem:[%s6203_s3 + $0xc4] sm:$0xf] }
 0x123   : > { %v1244_v37 = vadd.f32 %v1240_v27, %v4343_v33  ;;  %v1228_v43 = vadd.f32 1.0, %v3207_v39  ;;  %v4779_v33 = vperm.slane %v4576_v44, 3  ;;  %v3920_v39 = vld [vmem:[%s6203_s3 + $0x104] sm:$0xf0] }
 0x124   : > { %v1231_v8 = vmul.f32 %v1227_v34, %v1059_v36  ;;  %1829 = vmatpush.bf16.msra.mxu1 %v3395_v18 }
 0x125   : > { %v1263_v38 = vpack.c.bf16 %v1244_v37, %v1243_v54  ;;  %v1232_v35 = vmul.f32 %v1228_v43, %v1060_v40  ;;  %v3399_v37 = vor.u32 %v3927_v29, %v3398_v26  ;;  %v3403_v43 = vor.u32 %v3924_v31, %v3400_v22  ;;  %v3915_v26 = vld [vmem:[%s6203_s3 + $0xdc] sm:$0xf0] }
 0x126   : > { %v1236_v46 = vmul.f32 %v1233_v61, %v1231_v8 }
 0x127   : > { %1322 = vmatmul.bf16.vlgmr.msrb.gmra.mxu3 %v1263_v38  ;;  %v1237_v49 = vmul.f32 %v1233_v61, %v1232_v35  ;;  %v3366_v38 = vld [vmem:[%s6203_s3 + $0xf0] sm:$0xf]  ;;  %1848 = vmatpush.bf16.msra.mxu2 %v3399_v37 }
 0x128   : > { %v1241_v50 = vadd.f32 %v1238_v3, %v1236_v46  ;;  %v3367_v35 = vor.u32 %v3920_v39, %v3366_v38  ;;  %1867 = vmatpush.bf16.msra.mxu3 %v3403_v43  ;;  %v3912_v39 = vld [vmem:[%s6203_s3 + $0xcc] sm:$0xf] }
 0x129   : > { %v1242_v52 = vadd.f32 %v1238_v3, %v1237_v49  ;;  %v3415_v3 = vor.u32 %v3932_v1, %v3414_v41  ;;  %v3921_v1 = vld [vmem:[%s6203_s3 + $0x10c] sm:$0xf0] }
 0x12a   : > { %v1245_v53 = vadd.f32 %v1241_v50, %v4417_v6  ;;  %v3917_v50 = vld [vmem:[%s6203_s3 + $0xf4] sm:$0xf] }
 0x12b   : > { %v1246_v5 = vadd.f32 %v1242_v52, %v4432_v12  ;;  %1809 = vmatpush.bf16.msra.mxu0 %v3415_v3 }
 0x12d   : > { %v1264_v32 = vpack.c.bf16 %v1246_v5, %v1245_v53 }
 0x12f   : > { %1810 = vmatpush.bf16.msra.mxu0 %v3391_v17 }
 0x133   : > { %1811 = vmatpush.bf16.msra.mxu0 %v3367_v35 }
 0x137   : > { %1327 = vmatmul.bf16.gmra.mxu3 %v1264_v32 }
 0x1aa   : > { %v1323_v45 = vpop.f32.mrf.mxu3 }
 0x1ab   : > { %v4782_v57 = vadd.f32 %v1323_v45, %v4779_v33 }
 0x1ad   : > { %v4785_v56 = vmul.f32 0.70710677, %v4782_v57 }
 0x1af   : > { %v1341_v9 = vmul.f32 %v4785_v56, %v4785_v56 }
 0x1b1   : > { %v4789_v28 = vmin.f32 %v1341_v9, 16.0  ;;  %v3368_v9 = vld [vmem:[%s6203_s3 + $0x108] sm:$0xf0] }
 0x1b2   : > { %v1325_v6 = vpop.f32.mrf.mxu3  ;;  %v3371_v41 = vor.u32 %v3917_v50, %v3368_v9 }
 0x1b3   : > { %v1343_v12 = vmul.f32 2.1237322e-06, %v4789_v28  ;;  %v1354_v61 = vmul.f32 3.8918573e-05, %v4789_v28  ;;  %v4794_v44 = vadd.f32 %v1325_v6, %v4779_v33  ;;  %v3374_v6 = vld [vmem:[%s6203_s3 + $0xf8] sm:$0xf] }
 0x1b4   : > { %v3375_v3 = vor.u32 %v3921_v1, %v3374_v6  ;;  %1830 = vmatpush.bf16.msra.mxu1 %v3371_v41  ;;  %v3908_v6 = vld [vmem:[%s6203_s3 + $0xa4] sm:$0xf0] }
 0x1b5   : > { %v1344_v20 = vadd.f32 0.00028619796, %v1343_v12  ;;  %v1355_v7 = vadd.f32 0.001143296, %v1354_v61  ;;  %v4809_v10 = vmul.f32 0.70710677, %v4794_v44 }
 0x1b6   : > { %1849 = vmatpush.bf16.msra.mxu2 %v3375_v3 }
 0x1b7   : > { %v1345_v14 = vmul.f32 %v1344_v20, %v4789_v28  ;;  %v1356_v15 = vmul.f32 %v1355_v7, %v4789_v28  ;;  %v1381_v58 = vmul.f32 %v4809_v10, %v4809_v10 }
 0x1b9   : > { %v1346_v30 = vadd.f32 0.0036580483, %v1345_v14  ;;  %v1357_v25 = vadd.f32 0.014752088, %v1356_v15  ;;  %v4842_v24 = vmin.f32 %v1381_v58, 16.0  ;;  %v3379_v15 = vor.u32 %v3918_v2, %v3376_v51 }
 0x1ba   : > { %v1328_v27 = vpop.f32.mrf.mxu3  ;;  %v3914_v58 = vld [vmem:[%s6203_s3 + $0xd4] sm:$0xf0] }
 0x1bb   : > { %v1347_v34 = vmul.f32 %v1346_v30, %v4789_v28  ;;  %v1358_v36 = vmul.f32 %v1357_v25, %v4789_v28  ;;  %v4853_v54 = vadd.f32 %v1328_v27, %v4779_v33  ;;  %v1383_v8 = vmul.f32 2.1237322e-06, %v4842_v24  ;;  %1868 = vmatpush.bf16.msra.mxu3 %v3379_v15  ;;  %v3350_v30 = vld [vmem:[%s6203_s3 + $0xc8] sm:$0xf] }
 0x1bc   : > { %v1394_v40 = vmul.f32 3.8918573e-05, %v4842_v24  ;;  %v3343_v23 = vor.u32 %v3914_v58, %v3342_v55  ;;  %v3351_v35 = vor.u32 %v3915_v26, %v3350_v30  ;;  %v3294_v30 = vld [vmem:[%s6203_s3 + $0x60] sm:$0xf] }
 0x1bd   : > { %v1348_v46 = vadd.f32 0.05243302, %v1347_v34  ;;  %v1359_v49 = vadd.f32 0.112945676, %v1358_v36  ;;  %v1384_v52 = vadd.f32 0.00028619796, %v1383_v8 }
 0x1be   : > { %v1395_v53 = vadd.f32 0.001143296, %v1394_v40  ;;  %v4872_v45 = vmul.f32 0.70710677, %v4853_v54  ;;  %1812 = vmatpush.bf16.msra.mxu0 %v3343_v23  ;;  %v3352_v8 = vld [vmem:[%s6203_s3 + $0xe0] sm:$0xf0]  ;;  %1850 = vmatpush.bf16.msra.mxu2 %v3351_v35 }
 0x1bf   : > { %v1349_v5 = vmul.f32 %v1348_v46, %v4789_v28  ;;  %v1360_v32 = vmul.f32 %v1359_v49, %v4789_v28  ;;  %v1385_v12 = vmul.f32 %v1384_v52, %v4842_v24  ;;  %v3318_v46 = vld [vmem:[%s6203_s3 + $0x90] sm:$0xf]  ;;  %v3355_v9 = vor.u32 %v3912_v39, %v3352_v8  ;;  %v3296_v39 = vld [vmem:[%s6203_s3 + $0x78] sm:$0xf0]  ;;  %v3302_v8 = vld [vmem:[%s6203_s3 + $0x68] sm:$0xf] }
 0x1c0   : > { %v1396_v61 = vmul.f32 %v1395_v53, %v4842_v24  ;;  %v1421_v7 = vmul.f32 %v4872_v45, %v4872_v45  ;;  %v3319_v2 = vor.u32 %v3908_v6, %v3318_v46  ;;  %v3270_v6 = vld [vmem:[%s6203_s3 + $0x30] sm:$0xf] }
 0x1c1   : > { %v1350_v4 = vadd.f32 0.18741608, %v1349_v5  ;;  %v1361_v20 = vadd.f32 0.4994258, %v1360_v32  ;;  %v1386_v11 = vadd.f32 0.0036580483, %v1385_v12  ;;  %1869 = vmatpush.bf16.msra.mxu3 %v3355_v9 }
 0x1c2   : > { %v1397_v48 = vadd.f32 0.014752088, %v1396_v61  ;;  %v1330_v14 = vpop.f32.mrf.mxu3  ;;  %v4898_v13 = vmin.f32 %v1421_v7, 16.0  ;;  %v3905_v12 = vld [vmem:[%s6203_s3 + $0x94] sm:$0xf]  ;;  %1813 = vmatpush.bf16.msra.mxu0 %v3319_v2 }
 0x1c3   : > { %v1351_v16 = vmul.f32 %v1350_v4, %v4789_v28  ;;  %v1362_v59 = vmul.f32 %v1361_v20, %v4789_v28  ;;  %v1387_v60 = vmul.f32 %v1386_v11, %v4842_v24  ;;  %v3344_v28 = vld [vmem:[%s6203_s3 + $0xd8] sm:$0xf0]  ;;  %v4918_v18 = vadd.f32 %v1330_v14, %v4779_v33  ;;  %v3320_v61 = vld [vmem:[%s6203_s3 + $0xa8] sm:$0xf0]  ;;  %v3326_v4 = vld [vmem:[%s6203_s3 + $0x98] sm:$0xf] }
 0x1c4   : > { %v1398_v19 = vmul.f32 %v1397_v48, %v4842_v24  ;;  %v1423_v17 = vmul.f32 2.1237322e-06, %v4898_v13  ;;  %v1434_v31 = vmul.f32 3.8918573e-05, %v4898_v13  ;;  %v3347_v34 = vor.u32 %v3911_v63, %v3344_v28  ;;  %v3909_v20 = vld [vmem:[%s6203_s3 + $0xac] sm:$0xf0] }
 0x1c5   : > { %v4914_v25 = vadd.f32 1.0, %v1362_v59  ;;  %v1388_v27 = vadd.f32 0.05243302, %v1387_v60  ;;  %v1352_v36 = vadd.f32 1.1283791, %v1351_v16  ;;  %v3323_v11 = vor.u32 %v3905_v12, %v3320_v61 }
 0x1c6   : > { %v1399_v29 = vadd.f32 0.112945676, %v1398_v19  ;;  %v1424_v38 = vadd.f32 0.00028619796, %v1423_v17  ;;  %1831 = vmatpush.bf16.msra.mxu1 %v3347_v34  ;;  %v1435_v40 = vadd.f32 0.001143296, %v1434_v31  ;;  %v3327_v48 = vor.u32 %v3909_v20, %v3326_v4 }
 0x1c7   : > { %4063 = vrcp.f32 %v4914_v25  ;;  %v1373_v37 = vand.u32 2147483647, %v4914_v25  ;;  %v1389_v22 = vmul.f32 %v1388_v27, %v4842_v24  ;;  %v4935_v43 = vmul.f32 0.70710677, %v4918_v18  ;;  %v3906_v16 = vld [vmem:[%s6203_s3 + $0x9c] sm:$0xf] }
 0x1c8   : > { %v1400_v33 = vmul.f32 %v1399_v29, %v4842_v24  ;;  %v1375_v49 = vand.u32 2147483648, %v4914_v25  ;;  %v1425_v53 = vmul.f32 %v1424_v38, %v4898_v13  ;;  %v1436_v5 = vmul.f32 %v1435_v40, %v4898_v13  ;;  %v3328_v59 = vld [vmem:[%s6203_s3 + $0xb0] sm:$0xf0]  ;;  %1851 = vmatpush.bf16.msra.mxu2 %v3327_v48  ;;  %v3902_v17 = vld [vmem:[%s6203_s3 + $0x74] sm:$0xf0] }
 0x1c9   : > { %v1390_v50 = vadd.f32 0.18741608, %v1389_v22  ;;  %v1461_v32 = vmul.f32 %v4935_v43, %v4935_v43  ;;  %vm4978_vm13 = vcmp.eq.f32.partialorder %v1373_v37, 8.507059e+37  ;;  %v3331_v29 = vor.u32 %v3906_v16, %v3328_v59  ;;  %v3896_v12 = vld [vmem:[%s6203_s3 + $0x44] sm:$0xf0] }
 0x1ca   : > { %v1401_v52 = vadd.f32 0.4994258, %v1400_v33  ;;  %v1426_v1 = vadd.f32 0.0036580483, %v1425_v53  ;;  %v1437_v3 = vadd.f32 0.014752088, %v1436_v5  ;;  %1832 = vmatpush.bf16.msra.mxu1 %v3323_v11  ;;  %vm1369_vm0 = vweird.f32 %v4914_v25 }
 0x1cb   : > { %v4961_v51 = vmin.f32 %v1461_v32, 16.0  ;;  %v1391_v15 = vmul.f32 %v1390_v50, %v4842_v24  ;;  %v1376_v26 = vor.u32 1.1754944e-38, %v1375_v49  ;;  %1870 = vmatpush.bf16.msra.mxu3 %v3331_v29  ;;  %v3295_v38 = vor.u32 %v3902_v17, %v3294_v30  ;;  %v3903_v49 = vld [vmem:[%s6203_s3 + $0x7c] sm:$0xf0]  ;;  %v3900_v50 = vld [vmem:[%s6203_s3 + $0x6c] sm:$0xf] }
 0x1cc   : > { %v1402_v41 = vmul.f32 %v1401_v52, %v4842_v24  ;;  %v1427_v58 = vmul.f32 %v1426_v1, %v4898_v13  ;;  %v1438_v63 = vmul.f32 %v1437_v3, %v4898_v13  ;;  %v1353_v24 = vmul.f32 %v1352_v36, %v4785_v56  ;;  %v3899_v56 = vld [vmem:[%s6203_s3 + $0x64] sm:$0xf]  ;;  %v3893_v48 = vld [vmem:[%s6203_s3 + $0x34] sm:$0xf] }
 0x1cd   : > { %v4064_v7 = vpop.eup %4063  ;;  %v1463_v60 = vmul.f32 2.1237322e-06, %v4961_v51  ;;  %v1474_v19 = vmul.f32 3.8918573e-05, %v4961_v51  ;;  %v4993_v22 = vadd.f32 1.1283791, %v1391_v15  ;;  %1814 = vmatpush.bf16.msra.mxu0 %v3295_v38  ;;  %v3299_v5 = vor.u32 %v3899_v56, %v3296_v39 }
 0x1ce   : > { %v1365_v14 = vmul.f32 %v4064_v7, %v4914_v25  ;;  %v4965_v55 = vadd.f32 1.0, %v1402_v41  ;;  %vm1370_vm14 = vweird.f32 %v4064_v7  ;;  %v1428_v27 = vadd.f32 0.05243302, %v1427_v58  ;;  %v3304_v52 = vld [vmem:[%s6203_s3 + $0x80] sm:$0xf0] }
 0x1cf   : > { %v1439_v34 = vadd.f32 0.112945676, %v1438_v63  ;;  %v1464_v36 = vadd.f32 0.00028619796, %v1463_v60  ;;  %v1475_v37 = vadd.f32 0.001143296, %v1474_v19  ;;  %vm1371_vm1 = vmor %vm1369_vm0, %vm1370_vm14  ;;  %v3303_v32 = vor.u32 %v3903_v49, %v3302_v8  ;;  %1833 = vmatpush.bf16.msra.mxu1 %v3299_v5 }
 0x1d0   : > { %v1366_v23 = vsub.f32 1.0, %v1365_v14  ;;  %4065 = vrcp.f32 %v4965_v55  ;;  %v1429_v33 = vmul.f32 %v1428_v27, %v4898_v13  ;;  %v1413_v53 = vand.u32 2147483647, %v4965_v55  ;;  %v3278_v58 = vld [vmem:[%s6203_s3 + $0x38] sm:$0xf] }
 0x1d1   : > { %v1440_v35 = vmul.f32 %v1439_v34, %v4898_v13  ;;  %v1465_v46 = vmul.f32 %v1464_v36, %v4961_v51  ;;  %v1476_v25 = vmul.f32 %v1475_v37, %v4961_v51  ;;  %v3307_v9 = vor.u32 %v3900_v50, %v3304_v52  ;;  %1852 = vmatpush.bf16.msra.mxu2 %v3303_v32  ;;  %v3897_v63 = vld [vmem:[%s6203_s3 + $0x4c] sm:$0xf0]  ;;  %v3280_v56 = vld [vmem:[%s6203_s3 + $0x50] sm:$0xf0]  ;;  %v3890_v34 = vld [vmem:[%s6203_s3 + $0x14] sm:$0xf0] }
 0x1d2   : > { %v1367_v31 = vmul.f32 %v4064_v7, %v1366_v23  ;;  %v1415_v11 = vand.u32 2147483648, %v4965_v55  ;;  %v1430_v15 = vadd.f32 0.18741608, %v1429_v33  ;;  %v3271_v23 = vor.u32 %v3896_v12, %v3270_v6  ;;  %v3891_v49 = vld [vmem:[%s6203_s3 + $0x1c] sm:$0xf0] }
 0x1d3   : > { %v1441_v1 = vadd.f32 0.4994258, %v1440_v35  ;;  %v1466_v2 = vadd.f32 0.0036580483, %v1465_v46  ;;  %v1477_v4 = vadd.f32 0.014752088, %v1476_v25  ;;  %1871 = vmatpush.bf16.msra.mxu3 %v3307_v9  ;;  %v3279_v29 = vor.u32 %v3897_v63, %v3278_v58 }
 0x1d4   : > { %v1368_v40 = vadd.f32 %v4064_v7, %v1367_v31  ;;  %1815 = vmatpush.bf16.msra.mxu0 %v3271_v23  ;;  %v3246_v31 = vld [vmem:[%s6203_s3] sm:$0xf]  ;;  %v1333_v36 = vmul.f32 0.5, %v4782_v57  ;;  %v5057_v37 = vmul.f32 0.5, %v4794_v44  ;;  %vm5059_vm3 = vcmp.eq.f32.partialorder %v1413_v53, 8.507059e+37 }
 0x1d5   : > { %v1442_v16 = vmul.f32 %v1441_v1, %v4898_v13  ;;  %v1478_v59 = vmul.f32 %v1477_v4, %v4961_v51  ;;  %v1467_v19 = vmul.f32 %v1466_v2, %v4961_v51  ;;  %vm1409_vm7 = vweird.f32 %v4965_v55  ;;  %1853 = vmatpush.bf16.msra.mxu2 %v3279_v29  ;;  %v3887_v57 = vld [vmem:[%s6203_s3 + $0x4] sm:$0xf]  ;;  %v3248_v44 = vld [vmem:[%s6203_s3 + $0x18] sm:$0xf0]  ;;  %v3888_v32 = vld [vmem:[%s6203_s3 + $0xc] sm:$0xf] }
 0x1d6   : > { %v4066_v61 = vpop.eup %4065  ;;  %v1372_v41 = vsel %vm1371_vm1, %v4064_v7, %v1368_v40  ;;  %v3272_v7 = vld [vmem:[%s6203_s3 + $0x48] sm:$0xf0]  ;;  %v1416_v35 = vor.u32 1.1754944e-38, %v1415_v11  ;;  %v3247_v25 = vor.u32 %v3890_v34, %v3246_v31  ;;  %v1393_v50 = vmul.f32 %v4993_v22, %v4809_v10  ;;  %v3256_v9 = vld [vmem:[%s6203_s3 + $0x20] sm:$0xf0] }
 0x1d7   : > { %v1377_v20 = vsel %vm4978_vm13, %v1376_v26, %v1372_v41  ;;  %v1405_v3 = vmul.f32 %v4066_v61, %v4965_v55  ;;  %v3275_v28 = vor.u32 %v3893_v48, %v3272_v7  ;;  %v5041_v30 = vadd.f32 1.0, %v1442_v16  ;;  %v3894_v26 = vld [vmem:[%s6203_s3 + $0x3c] sm:$0xf]  ;;  %v3254_v55 = vld [vmem:[%s6203_s3 + $0x8] sm:$0xf] }
 0x1d8   : > { %v1378_v14 = vmul.f32 %v1377_v20, %v1353_v24  ;;  %v1479_v17 = vadd.f32 0.112945676, %v1478_v59  ;;  %vm1410_vm2 = vweird.f32 %v4066_v61  ;;  %v1468_v39 = vadd.f32 0.05243302, %v1467_v19  ;;  %1816 = vmatpush.bf16.msra.mxu0 %v3247_v25  ;;  %v3430_v10 = vld [vmem:[%s6203_s3 + $0x160] sm:$0xf] }
 0x1d9   : > { %v1406_v60 = vsub.f32 1.0, %v1405_v3  ;;  %1834 = vmatpush.bf16.msra.mxu1 %v3275_v28  ;;  %4067 = vrcp.f32 %v5041_v30  ;;  %vm1411_vm8 = vmor %vm1409_vm7, %vm1410_vm2  ;;  %v3283_v46 = vor.u32 %v3894_v26, %v3280_v56  ;;  %v1431_v53 = vmul.f32 %v1430_v15, %v4898_v13  ;;  %v3934_v13 = vld [vmem:[%s6203_s3 + $0x174] sm:$0xf0]  ;;  %v3931_v22 = vld [vmem:[%s6203_s3 + $0x164] sm:$0xf] }
 0x1da   : > { %v3240_v24 = vclamps-f32 %v1378_v14, 1.0  ;;  %v1480_v8 = vmul.f32 %v1479_v17, %v4961_v51  ;;  %v3251_v12 = vor.u32 %v3887_v57, %v3248_v44  ;;  %v3255_v1 = vor.u32 %v3891_v49, %v3254_v55  ;;  %v3432_v2 = vld [vmem:[%s6203_s3 + $0x178] sm:$0xf0]  ;;  %v3406_v4 = vld [vmem:[%s6203_s3 + $0x130] sm:$0xf] }
 0x1db   : > { %v1407_v27 = vmul.f32 %v4066_v61, %v1406_v60  ;;  %1872 = vmatpush.bf16.msra.mxu3 %v3283_v46  ;;  %v3928_v20 = vld [vmem:[%s6203_s3 + $0x144] sm:$0xf0]  ;;  %v4071_v11 = vld [vmem:[%s6205_s5] sm:$0x3f]  ;;  %v3259_v7 = vor.u32 %v3888_v32, %v3256_v9  ;;  %v3431_v14 = vor.u32 %v3934_v13, %v3430_v10  ;;  %v3435_v15 = vor.u32 %v3931_v22, %v3432_v2  ;;  %v3925_v16 = vld [vmem:[%s6203_s3 + $0x134] sm:$0xf] }
 0x1dc   : > { %v1501_v40 = vadd.f32 1.0, %v3240_v24  ;;  %v1481_v5 = vadd.f32 0.4994258, %v1480_v8  ;;  %v5112_v48 = vperm.slane %v4071_v11, 4  ;;  %v3408_v59 = vld [vmem:[%s6203_s3 + $0x148] sm:$0xf0]  ;;  %1854 = vmatpush.bf16.msra.mxu2 %v3255_v1  ;;  %v1469_v28 = vmul.f32 %v1468_v39, %v4961_v51 }
 0x1dd   : > { %v1408_v38 = vadd.f32 %v4066_v61, %v1407_v27  ;;  %1835 = vmatpush.bf16.msra.mxu1 %v3251_v12  ;;  %v1432_v60 = vadd.f32 1.1283791, %v1431_v53  ;;  %v1453_v23 = vand.u32 2147483647, %v5041_v30  ;;  %1885 = vmatpush.bf16.msrb.mxu0 %v3431_v14  ;;  %v3407_v17 = vor.u32 %v3928_v20, %v3406_v4  ;;  %v3382_v56 = vld [vmem:[%s6203_s3 + $0x100] sm:$0xf] }
 0x1de   : > { %v1482_v41 = vmul.f32 %v1481_v5, %v4961_v51  ;;  %v1505_v58 = vmul.f32 %v1501_v40, %v1333_v36  ;;  %v3411_v29 = vor.u32 %v3925_v16, %v3408_v59  ;;  %v3922_v31 = vld [vmem:[%s6203_s3 + $0x114] sm:$0xf0]  ;;  %v5131_v34 = vperm.slane %v4071_v11, 5  ;;  %v3919_v33 = vld [vmem:[%s6203_s3 + $0x104] sm:$0xf] }
 0x1df   : > { %v1412_v52 = vsel %vm1411_vm8, %v4066_v61, %v1408_v38  ;;  %v4068_v3 = vpop.eup %4067  ;;  %1873 = vmatpush.bf16.msra.mxu3 %v3259_v7  ;;  %v1455_v36 = vand.u32 2147483648, %v5041_v30  ;;  %v3384_v38 = vld [vmem:[%s6203_s3 + $0x118] sm:$0xf0]  ;;  %v1470_v44 = vadd.f32 0.18741608, %v1469_v28  ;;  %v3383_v40 = vor.u32 %v3922_v31, %v3382_v56 }
 0x1e0   : > { %v1417_v6 = vsel %vm5059_vm3, %v1416_v35, %v1412_v52  ;;  %v1445_v19 = vmul.f32 %v4068_v3, %v5041_v30  ;;  %v5123_v24 = vadd.f32 1.0, %v1482_v41  ;;  %v1510_v39 = vmul.f32 %v5112_v48, %v1505_v58  ;;  %v3358_v55 = vld [vmem:[%s6203_s3 + $0xd0] sm:$0xf]  ;;  %v3913_v52 = vld [vmem:[%s6203_s3 + $0xd4] sm:$0xf] }
 0x1e1   : > { %v1418_v61 = vmul.f32 %v1417_v6, %v1393_v50  ;;  %1904 = vmatpush.bf16.msrb.mxu1 %v3435_v15  ;;  %vm1450_vm9 = vweird.f32 %v4068_v3  ;;  %1886 = vmatpush.bf16.msrb.mxu0 %v3407_v17  ;;  %vm1449_vm11 = vweird.f32 %v5041_v30  ;;  %v3387_v25 = vor.u32 %v3919_v33, %v3384_v38  ;;  %v3360_v30 = vld [vmem:[%s6203_s3 + $0xe8] sm:$0xf0]  ;;  %v3334_v41 = vld [vmem:[%s6203_s3 + $0xa0] sm:$0xf]  ;;  %v3910_v1 = vld [vmem:[%s6203_s3 + $0xb4] sm:$0xf0] }
 0x1e2   : > { %v1446_v27 = vsub.f32 1.0, %v1445_v19  ;;  %4069 = vrcp.f32 %v5123_v24  ;;  %v1433_v49 = vmul.f32 %v1432_v60, %v4872_v45  ;;  %vm1451_vm13 = vmor %vm1449_vm11, %vm1450_vm9  ;;  %v1456_v50 = vor.u32 1.1754944e-38, %v1455_v36  ;;  %v3336_v2 = vld [vmem:[%s6203_s3 + $0xb8] sm:$0xf0]  ;;  %v3310_v59 = vld [vmem:[%s6203_s3 + $0x70] sm:$0xf] }
 0x1e3   : > { %v3241_v63 = vclamps-f32 %v1418_v61, 1.0  ;;  %v1515_v53 = vadd.f32 %v5131_v34, %v1510_v39  ;;  %vm1454_vm14 = vcmp.eq.f32.partialorder %v1453_v23, 8.507059e+37  ;;  %v1471_v45 = vmul.f32 %v1470_v44, %v4961_v51  ;;  %v3907_v51 = vld [vmem:[%s6203_s3 + $0xa4] sm:$0xf]  ;;  %v3904_v58 = vld [vmem:[%s6203_s3 + $0x84] sm:$0xf0] }
 0x1e4   : > { %v1447_v57 = vmul.f32 %v4068_v3, %v1446_v27  ;;  %v3363_v61 = vor.u32 %v3913_v52, %v3360_v30  ;;  %v1495_v11 = vand.u32 2147483648, %v5123_v24  ;;  %v3335_v7 = vor.u32 %v3910_v1, %v3334_v41  ;;  %v3312_v60 = vld [vmem:[%s6203_s3 + $0x88] sm:$0xf0]  ;;  %v3286_v56 = vld [vmem:[%s6203_s3 + $0x40] sm:$0xf] }
 0x1e5   : > { %v1502_v26 = vadd.f32 1.0, %v3241_v63  ;;  %1905 = vmatpush.bf16.msrb.mxu1 %v3411_v29  ;;  %1887 = vmatpush.bf16.msrb.mxu0 %v3383_v40  ;;  %v1472_v20 = vadd.f32 1.1283791, %v1471_v45  ;;  %v3339_v16 = vor.u32 %v3907_v51, %v3336_v2  ;;  %v3901_v63 = vld [vmem:[%s6203_s3 + $0x74] sm:$0xf]  ;;  %vm1489_vm1 = vweird.f32 %v5123_v24 }
 0x1e6   : > { %v1448_v46 = vadd.f32 %v4068_v3, %v1447_v57  ;;  %v1496_v28 = vor.u32 1.1754944e-38, %v1495_v11  ;;  %v3311_v27 = vor.u32 %v3904_v58, %v3310_v59  ;;  %v3315_v29 = vor.u32 %v3901_v63, %v3312_v60  ;;  %v3288_v36 = vld [vmem:[%s6203_s3 + $0x58] sm:$0xf0]  ;;  %v3262_v40 = vld [vmem:[%s6203_s3 + $0x10] sm:$0xf] }
 0x1e7   : > { %v1506_v8 = vmul.f32 %v1502_v26, %v5057_v37  ;;  %v3916_v37 = vld [vmem:[%s6203_s3 + $0xe4] sm:$0xf0]  ;;  %v1473_v23 = vmul.f32 %v1472_v20, %v4935_v43  ;;  %v3895_v43 = vld [vmem:[%s6203_s3 + $0x44] sm:$0xf]  ;;  %v1335_v33 = vmul.f32 0.5, %v4853_v54 }
 0x1e8   : > { %v1452_v32 = vsel %vm1451_vm13, %v4068_v3, %v1448_v46  ;;  %v4070_v9 = vpop.eup %4069  ;;  %v3359_v12 = vor.u32 %v3916_v37, %v3358_v55  ;;  %v1493_v3 = vand.u32 2147483647, %v5123_v24  ;;  %v3291_v44 = vor.u32 %v3895_v43, %v3288_v36  ;;  %v3889_v46 = vld [vmem:[%s6203_s3 + $0x14] sm:$0xf]  ;;  %v3264_v54 = vld [vmem:[%s6203_s3 + $0x28] sm:$0xf0] }
 0x1e9   : > { %v1511_v35 = vmul.f32 %v5112_v48, %v1506_v8  ;;  %v1457_v6 = vsel %vm1454_vm14, %v1456_v50, %v1452_v32  ;;  %v1485_v22 = vmul.f32 %v4070_v9, %v5123_v24  ;;  %1906 = vmatpush.bf16.msrb.mxu1 %v3387_v25  ;;  %vm1490_vm0 = vweird.f32 %v4070_v9  ;;  %v3898_v24 = vld [vmem:[%s6203_s3 + $0x54] sm:$0xf0]  ;;  %v4025_v41 = vld [vmem:[%s6204_s4 + $0x2d4] sm:$0xf]  ;;  %v3800_v1 = vld [vmem:[%s6204_s4 + $0x2e8] sm:$0xf0] }
 0x1ea   : > { %v1458_v13 = vmul.f32 %v1457_v6, %v1433_v49  ;;  %1888 = vmatpush.bf16.msrb.mxu0 %v3359_v12  ;;  %vm1491_vm2 = vmor %vm1489_vm1, %vm1490_vm0  ;;  %vm1494_vm3 = vcmp.eq.f32.partialorder %v1493_v3, 8.507059e+37  ;;  %v3287_v57 = vor.u32 %v3898_v24, %v3286_v56  ;;  %v1336_v25 = vmul.f32 0.5, %v4918_v18  ;;  %v3798_v6 = vld [vmem:[%s6204_s4 + $0x2d0] sm:$0xf]  ;;  %v4028_v12 = vld [vmem:[%s6204_s4 + $0x2e4] sm:$0xf0] }
 0x1eb   : > { %v1516_v5 = vadd.f32 %v5131_v34, %v1511_v35  ;;  %v1486_v4 = vsub.f32 1.0, %v1485_v22  ;;  %v3892_v35 = vld [vmem:[%s6203_s3 + $0x24] sm:$0xf0]  ;;  %v3267_v52 = vor.u32 %v3889_v46, %v3264_v54  ;;  %v3799_v22 = vor.u32 %v4028_v12, %v3798_v6  ;;  %v3582_v2 = vld [vmem:[%s6204_s4 + $0x120] sm:$0xf] }
 0x1ec   : > { %v3242_v14 = vclamps-f32 %v1458_v13, 1.0  ;;  %v3263_v37 = vor.u32 %v3892_v35, %v3262_v40  ;;  %v3608_v13 = vld [vmem:[%s6204_s4 + $0x168] sm:$0xf0]  ;;  %v3803_v51 = vor.u32 %v4025_v41, %v3800_v1  ;;  %v3774_v20 = vld [vmem:[%s6204_s4 + $0x2a0] sm:$0xf] }
 0x1ed   : > { %v5161_v10 = vpack.c.bf16 %v1516_v5, %v1515_v53  ;;  %v1487_v15 = vmul.f32 %v4070_v9, %v1486_v4  ;;  %1907 = vmatpush.bf16.msrb.mxu1 %v3363_v61  ;;  %2609 = vmatpush.bf16.msrb.mxu3 %v3799_v22  ;;  %v3974_v4 = vld [vmem:[%s6204_s4 + $0x134] sm:$0xf0]  ;;  %v4019_v59 = vld [vmem:[%s6204_s4 + $0x2a4] sm:$0xf]  ;;  %v3776_v58 = vld [vmem:[%s6204_s4 + $0x2b8] sm:$0xf0] }
 0x1ee   : > { %v1503_v17 = vadd.f32 1.0, %v3242_v14  ;;  %1889 = vmatpush.bf16.msrb.mxu0 %v3335_v7  ;;  %v3583_v3 = vor.u32 %v3974_v4, %v3582_v2  ;;  %v4022_v11 = vld [vmem:[%s6204_s4 + $0x2b4] sm:$0xf0]  ;;  %v3971_v7 = vld [vmem:[%s6204_s4 + $0x124] sm:$0xf]  ;;  %v3779_v60 = vor.u32 %v4019_v59, %v3776_v58 }
 0x1ef   : > { %1817 = vmatmul.bf16.vlgmr.msra.gmra.mxu0 %v5161_v10  ;;  %1836 = vmatmul.bf16.vlgmr.msra.gmra.mxu1 %v5161_v10  ;;  %v1488_v19 = vadd.f32 %v4070_v9, %v1487_v15  ;;  %v3584_v14 = vld [vmem:[%s6204_s4 + $0x138] sm:$0xf0]  ;;  %v3775_v15 = vor.u32 %v4022_v11, %v3774_v20  ;;  %v3558_v63 = vld [vmem:[%s6204_s4 + $0xf0] sm:$0xf]  ;;  %v3752_v24 = vld [vmem:[%s6204_s4 + $0x288] sm:$0xf0] }
 0x1f0   : > { %1855 = vmatmul.bf16.vlgmr.msra.gmra.mxu2 %v5161_v10  ;;  %1874 = vmatmul.bf16.vlgmr.msra.gmra.mxu3 %v5161_v10  ;;  %v1507_v39 = vmul.f32 %v1503_v17, %v1335_v33  ;;  %v4016_v17 = vld [vmem:[%s6204_s4 + $0x284] sm:$0xf0]  ;;  %v3959_v40 = vld [vmem:[%s6204_s4 + $0xc4] sm:$0xf]  ;;  %v3536_v35 = vld [vmem:[%s6204_s4 + $0xd8] sm:$0xf0] }
 0x1f1   : > { %v1492_v26 = vsel %vm1491_vm2, %v4070_v9, %v1488_v19  ;;  %1908 = vmatpush.bf16.msrb.mxu1 %v3339_v16  ;;  %v3980_v9 = vld [vmem:[%s6204_s4 + $0x164] sm:$0xf0]  ;;  %v3587_v16 = vor.u32 %v3971_v7, %v3584_v14  ;;  %2610 = vmatpush.bf16.msrb.mxu3 %v3775_v15  ;;  %v3539_v54 = vor.u32 %v3959_v40, %v3536_v35  ;;  %v3704_v6 = vld [vmem:[%s6204_s4 + $0x228] sm:$0xf0]  ;;  %v3486_v22 = vld [vmem:[%s6204_s4 + $0x60] sm:$0xf] }
 0x1f2   : > { %v1497_v31 = vsel %vm1494_vm3, %v1496_v28, %v1492_v26  ;;  %1890 = vmatpush.bf16.msrb.mxu0 %v3311_v27  ;;  %v1512_v49 = vmul.f32 %v5112_v48, %v1507_v39  ;;  %v3968_v19 = vld [vmem:[%s6204_s4 + $0x104] sm:$0xf0]  ;;  %v3965_v26 = vld [vmem:[%s6204_s4 + $0xf4] sm:$0xf]  ;;  %v3560_v27 = vld [vmem:[%s6204_s4 + $0x108] sm:$0xf0] }
 0x1f3   : > { %v1498_v38 = vmul.f32 %v1497_v31, %v1473_v23  ;;  %v3750_v23 = vld [vmem:[%s6204_s4 + $0x270] sm:$0xf]  ;;  %v3559_v28 = vor.u32 %v3968_v19, %v3558_v63  ;;  %v3563_v56 = vor.u32 %v3965_v26, %v3560_v27  ;;  %v4013_v31 = vld [vmem:[%s6204_s4 + $0x274] sm:$0xf]  ;;  %v3962_v39 = vld [vmem:[%s6204_s4 + $0xd4] sm:$0xf0] }
 0x1f4   : > { %v1517_v53 = vadd.f32 %v5131_v34, %v1512_v49  ;;  %v3755_v33 = vor.u32 %v4013_v31, %v3752_v24  ;;  %v3510_v49 = vld [vmem:[%s6204_s4 + $0x90] sm:$0xf]  ;;  %v3678_v41 = vld [vmem:[%s6204_s4 + $0x1e0] sm:$0xf]  ;;  %v3947_v2 = vld [vmem:[%s6204_s4 + $0x64] sm:$0xf] }
 0x1f5   : > { %v3243_v8 = vclamps-f32 %v1498_v38, 1.0  ;;  %1909 = vmatpush.bf16.msrb.mxu1 %v3315_v29  ;;  %v3751_v29 = vor.u32 %v4016_v17, %v3750_v23  ;;  %v3534_v38 = vld [vmem:[%s6204_s4 + $0xc0] sm:$0xf]  ;;  %v3488_v20 = vld [vmem:[%s6204_s4 + $0x78] sm:$0xf0] }
 0x1f6   : > { %1891 = vmatpush.bf16.msrb.mxu0 %v3287_v57  ;;  %v3535_v57 = vor.u32 %v3962_v39, %v3534_v38  ;;  %v3680_v11 = vld [vmem:[%s6204_s4 + $0x1f8] sm:$0xf0]  ;;  %v3491_v7 = vor.u32 %v3947_v2, %v3488_v20  ;;  %v3462_v15 = vld [vmem:[%s6204_s4 + $0x30] sm:$0xf]  ;;  %v3992_v63 = vld [vmem:[%s6204_s4 + $0x1c4] sm:$0xf0] }
 0x1f7   : > { %v1504_v55 = vadd.f32 1.0, %v3243_v8  ;;  %2611 = vmatpush.bf16.msrb.mxu3 %v3751_v29  ;;  %v3726_v8 = vld [vmem:[%s6204_s4 + $0x240] sm:$0xf]  ;;  %v3654_v58 = vld [vmem:[%s6204_s4 + $0x1b0] sm:$0xf] }
 0x1f8   : > { %v3655_v19 = vor.u32 %v3992_v63, %v3654_v58  ;;  %v3464_v23 = vld [vmem:[%s6204_s4 + $0x48] sm:$0xf0]  ;;  %v3438_v31 = vld [vmem:[%s6204_s4] sm:$0xf]  ;;  %v3938_v24 = vld [vmem:[%s6204_s4 + $0x14] sm:$0xf0] }
 0x1f9   : > { %v1508_v50 = vmul.f32 %v1504_v55, %v1336_v25  ;;  %1910 = vmatpush.bf16.msrb.mxu1 %v3291_v44  ;;  %v4010_v44 = vld [vmem:[%s6204_s4 + $0x254] sm:$0xf0]  ;;  %v4007_v25 = vld [vmem:[%s6204_s4 + $0x244] sm:$0xf]  ;;  %v3728_v55 = vld [vmem:[%s6204_s4 + $0x258] sm:$0xf0]  ;;  %v3439_v38 = vor.u32 %v3938_v24, %v3438_v31 }
 0x1fa   : > { %1892 = vmatpush.bf16.msrb.mxu0 %v3263_v37  ;;  %v3727_v46 = vor.u32 %v4010_v44, %v3726_v8  ;;  %v3731_v37 = vor.u32 %v4007_v25, %v3728_v55  ;;  %v3656_v17 = vld [vmem:[%s6204_s4 + $0x1c8] sm:$0xf0]  ;;  %v3986_v39 = vld [vmem:[%s6204_s4 + $0x194] sm:$0xf0]  ;;  %v3935_v8 = vld [vmem:[%s6204_s4 + $0x4] sm:$0xf] }
 0x1fb   : > { %v1513_v30 = vmul.f32 %v5112_v48, %v1508_v50  ;;  %v3956_v50 = vld [vmem:[%s6204_s4 + $0xa4] sm:$0xf0]  ;;  %v3440_v44 = vld [vmem:[%s6204_s4 + $0x18] sm:$0xf0]  ;;  %v3983_v40 = vld [vmem:[%s6204_s4 + $0x184] sm:$0xf] }
 0x1fc   : > { %2612 = vmatpush.bf16.msrb.mxu3 %v3727_v46  ;;  %v3632_v35 = vld [vmem:[%s6204_s4 + $0x198] sm:$0xf0]  ;;  %v3972_v58 = vld [vmem:[%s6204_s4 + $0x12c] sm:$0xf]  ;;  %v3566_v31 = vld [vmem:[%s6204_s4 + $0xf8] sm:$0xf] }
 0x1fd   : > { %v1518_v5 = vadd.f32 %v5131_v34, %v1513_v30  ;;  %1911 = vmatpush.bf16.msrb.mxu1 %v3267_v52  ;;  %v3606_v34 = vld [vmem:[%s6204_s4 + $0x150] sm:$0xf]  ;;  %v3511_v30 = vor.u32 %v3956_v50, %v3510_v49  ;;  %v5446_v49 = vld [vmem:[%s6206_s6] sm:$0xf]  ;;  %v3443_v50 = vor.u32 %v3935_v8, %v3440_v44  ;;  %v3966_v44 = vld [vmem:[%s6204_s4 + $0xfc] sm:$0xf] }
 0x1fe   : > { %v3607_v45 = vor.u32 %v3980_v9, %v3606_v34  ;;  %v3702_v52 = vld [vmem:[%s6204_s4 + $0x210] sm:$0xf]  ;;  %v3512_v34 = vld [vmem:[%s6204_s4 + $0xa8] sm:$0xf0]  ;;  %v4001_v9 = vld [vmem:[%s6204_s4 + $0x214] sm:$0xf] }
 0x1ff   : > { %v1568_v32 = vpack.c.bf16 %v1518_v5, %v1517_v53  ;;  %v4004_v53 = vld [vmem:[%s6204_s4 + $0x224] sm:$0xf0]  ;;  %v3953_v5 = vld [vmem:[%s6204_s4 + $0x94] sm:$0xf]  ;;  %v3707_v12 = vor.u32 %v4001_v9, %v3704_v6  ;;  %v3978_v9 = vld [vmem:[%s6204_s4 + $0x15c] sm:$0xf] }
 0x200   : > { %2590 = vmatpush.bf16.msrb.mxu2 %v3607_v45  ;;  %v3515_v45 = vor.u32 %v3953_v5, %v3512_v34  ;;  %v4029_v34 = vld [vmem:[%s6204_s4 + $0x2ec] sm:$0xf0] }
 0x201   : > { %1822 = vmatmul.bf16.gmra.mxu0 %v1568_v32  ;;  %1841 = vmatmul.bf16.gmra.mxu1 %v1568_v32  ;;  %v3969_v24 = vld [vmem:[%s6204_s4 + $0x10c] sm:$0xf0] }
 0x202   : > { %1860 = vmatmul.bf16.gmra.mxu2 %v1568_v32  ;;  %1879 = vmatmul.bf16.gmra.mxu3 %v1568_v32  ;;  %v3567_v8 = vor.u32 %v3969_v24, %v3566_v31 }
 0x203   : > { %2647 = vmatpush.bf16.msra.mxu1 %v3803_v51  ;;  %v3998_v51 = vld [vmem:[%s6204_s4 + $0x1f4] sm:$0xf0] }
 0x204   : > { %2591 = vmatpush.bf16.msrb.mxu2 %v3583_v3  ;;  %v3679_v4 = vor.u32 %v3998_v51, %v3678_v41  ;;  %v3995_v3 = vld [vmem:[%s6204_s4 + $0x1e4] sm:$0xf] }
 0x205   : > { %v3683_v14 = vor.u32 %v3995_v3, %v3680_v11  ;;  %v3590_v3 = vld [vmem:[%s6204_s4 + $0x128] sm:$0xf]  ;;  %v3975_v11 = vld [vmem:[%s6204_s4 + $0x13c] sm:$0xf0] }
 0x207   : > { %2648 = vmatpush.bf16.msra.mxu1 %v3779_v60  ;;  %v3941_v60 = vld [vmem:[%s6204_s4 + $0x34] sm:$0xf] }
 0x208   : > { %2592 = vmatpush.bf16.msrb.mxu2 %v3559_v28  ;;  %v3989_v28 = vld [vmem:[%s6204_s4 + $0x1b4] sm:$0xf]  ;;  %v3467_v26 = vor.u32 %v3941_v60, %v3464_v23  ;;  %v3592_v60 = vld [vmem:[%s6204_s4 + $0x140] sm:$0xf0] }
 0x209   : > { %v3659_v27 = vor.u32 %v3989_v28, %v3656_v17  ;;  %v3784_v23 = vld [vmem:[%s6204_s4 + $0x2c0] sm:$0xf0] }
 0x20b   : > { %2649 = vmatpush.bf16.msra.mxu1 %v3755_v33  ;;  %v3630_v33 = vld [vmem:[%s6204_s4 + $0x180] sm:$0xf] }
 0x20c   : > { %2593 = vmatpush.bf16.msrb.mxu2 %v3535_v57  ;;  %v3631_v57 = vor.u32 %v3986_v39, %v3630_v33  ;;  %v3758_v33 = vld [vmem:[%s6204_s4 + $0x278] sm:$0xf] }
 0x20f   : > { %2650 = vmatpush.bf16.msra.mxu1 %v3731_v37 }
 0x210   : > { %2594 = vmatpush.bf16.msrb.mxu2 %v3511_v30  ;;  %v3614_v30 = vld [vmem:[%s6204_s4 + $0x158] sm:$0xf] }
 0x211   : > { %1893 = vmatmul.bf16.vlgmr.msrb.gmra.mxu0 %v5161_v10  ;;  %1912 = vmatmul.bf16.vlgmr.msrb.gmra.mxu1 %v5161_v10  ;;  %v3977_v10 = vld [vmem:[%s6204_s4 + $0x154] sm:$0xf] }
 0x212   : > { %v3611_v61 = vor.u32 %v3977_v10, %v3608_v13 }
 0x213   : > { %2651 = vmatpush.bf16.msra.mxu1 %v3707_v12  ;;  %v4026_v12 = vld [vmem:[%s6204_s4 + $0x2dc] sm:$0xf] }
 0x214   : > { %2628 = vmatpush.bf16.msra.mxu0 %v3611_v61  ;;  %v3950_v61 = vld [vmem:[%s6204_s4 + $0x74] sm:$0xf0] }
 0x215   : > { %v3487_v1 = vor.u32 %v3950_v61, %v3486_v22  ;;  %v3808_v22 = vld [vmem:[%s6204_s4 + $0x2f0] sm:$0xf0] }
 0x216   : > { %v3811_v51 = vor.u32 %v4026_v12, %v3808_v22 }
 0x217   : > { %2595 = vmatpush.bf16.msrb.mxu2 %v3487_v1  ;;  %2652 = vmatpush.bf16.msra.mxu1 %v3683_v14  ;;  %v1988_v14 = vperm.slane %v5446_v49, 0 }
 0x218   : > { %2629 = vmatpush.bf16.msra.mxu0 %v3587_v16  ;;  %v3944_v16 = vld [vmem:[%s6204_s4 + $0x44] sm:$0xf0] }
 0x219   : > { %v3463_v59 = vor.u32 %v3944_v16, %v3462_v15  ;;  %v1989_v15 = vperm.slane %v5446_v49, 2  ;;  %v3591_v16 = vor.u32 %v3975_v11, %v3590_v3  ;;  %v4008_v3 = vld [vmem:[%s6204_s4 + $0x24c] sm:$0xf] }
 0x21b   : > { %2596 = vmatpush.bf16.msrb.mxu2 %v3463_v59  ;;  %2653 = vmatpush.bf16.msra.mxu1 %v3659_v27  ;;  %v4023_v59 = vld [vmem:[%s6204_s4 + $0x2bc] sm:$0xf0]  ;;  %v5591_v24 = vperm.slane %v1989_v15, 0  ;;  %v3957_v15 = vld [vmem:[%s6204_s4 + $0xac] sm:$0xf0] }
 0x21c   : > { %2630 = vmatpush.bf16.msra.mxu0 %v3563_v56 }
 0x21f   : > { %2597 = vmatpush.bf16.msrb.mxu2 %v3439_v38 }
 0x220   : > { %2631 = vmatpush.bf16.msra.mxu0 %v3539_v54 }
 0x221   : > { %1898 = vmatmul.bf16.gmra.mxu0 %v1568_v32  ;;  %1917 = vmatmul.bf16.gmra.mxu1 %v1568_v32  ;;  %v3703_v32 = vor.u32 %v4004_v53, %v3702_v52  ;;  %v3635_v52 = vor.u32 %v3983_v40, %v3632_v35  ;;  %v3981_v53 = vld [vmem:[%s6204_s4 + $0x16c] sm:$0xf0]  ;;  %v3568_v40 = vld [vmem:[%s6204_s4 + $0x110] sm:$0xf0] }
 0x222   : > { %v3615_v5 = vor.u32 %v3981_v53, %v3614_v30  ;;  %v3760_v30 = vld [vmem:[%s6204_s4 + $0x290] sm:$0xf0]  ;;  %v3542_v53 = vld [vmem:[%s6204_s4 + $0xc8] sm:$0xf] }
 0x223   : > { %2613 = vmatpush.bf16.msrb.mxu3 %v3703_v32  ;;  %v3806_v32 = vld [vmem:[%s6204_s4 + $0x2d8] sm:$0xf]  ;;  %2654 = vmatpush.bf16.msra.mxu1 %v3635_v52  ;;  %v4014_v52 = vld [vmem:[%s6204_s4 + $0x27c] sm:$0xf] }
 0x224   : > { %2632 = vmatpush.bf16.msra.mxu0 %v3515_v45  ;;  %v3807_v6 = vor.u32 %v4029_v34, %v3806_v32  ;;  %v3616_v45 = vld [vmem:[%s6204_s4 + $0x170] sm:$0xf0]  ;;  %2666 = vmatpush.bf16.msra.mxu2 %v3615_v5  ;;  %v3763_v32 = vor.u32 %v4014_v52, %v3760_v30  ;;  %v3963_v34 = vld [vmem:[%s6204_s4 + $0xdc] sm:$0xf0] }
 0x225   : > { %v3619_v1 = vor.u32 %v3978_v9, %v3616_v45  ;;  %v3734_v9 = vld [vmem:[%s6204_s4 + $0x248] sm:$0xf]  ;;  %v3543_v22 = vor.u32 %v3963_v34, %v3542_v53  ;;  %v3712_v53 = vld [vmem:[%s6204_s4 + $0x230] sm:$0xf0] }
 0x227   : > { %2614 = vmatpush.bf16.msrb.mxu3 %v3679_v4  ;;  %2723 = vmatpush.bf16.msrb.mxu1 %v3811_v51  ;;  %v3960_v51 = vld [vmem:[%s6204_s4 + $0xcc] sm:$0xf] }
 0x228   : > { %2633 = vmatpush.bf16.msra.mxu0 %v3491_v7  ;;  %v3782_v7 = vld [vmem:[%s6204_s4 + $0x2a8] sm:$0xf]  ;;  %2667 = vmatpush.bf16.msra.mxu2 %v3591_v16 }
 0x229   : > { %v3783_v63 = vor.u32 %v4023_v59, %v3782_v7 }
 0x22b   : > { %2615 = vmatpush.bf16.msrb.mxu3 %v3655_v19  ;;  %v4020_v19 = vld [vmem:[%s6204_s4 + $0x2ac] sm:$0xf] }
 0x22c   : > { %2634 = vmatpush.bf16.msra.mxu0 %v3467_v26  ;;  %v3595_v26 = vor.u32 %v3972_v58, %v3592_v60  ;;  %v3787_v27 = vor.u32 %v4020_v19, %v3784_v23  ;;  %2668 = vmatpush.bf16.msra.mxu2 %v3567_v8  ;;  %v3736_v58 = vld [vmem:[%s6204_s4 + $0x260] sm:$0xf0]  ;;  %v5581_v19 = vperm.slane %v1988_v14, 0  ;;  %v3518_v8 = vld [vmem:[%s6204_s4 + $0x98] sm:$0xf] }
 0x22d   : > { %v3739_v23 = vor.u32 %v4008_v3, %v3736_v58 }
 0x22e   : > { %2724 = vmatpush.bf16.msrb.mxu1 %v3787_v27 }
 0x22f   : > { %2616 = vmatpush.bf16.msrb.mxu3 %v3631_v57  ;;  %v4017_v57 = vld [vmem:[%s6204_s4 + $0x28c] sm:$0xf0] }
 0x230   : > { %2635 = vmatpush.bf16.msra.mxu0 %v3443_v50  ;;  %v3759_v35 = vor.u32 %v4017_v57, %v3758_v33  ;;  %v3571_v50 = vor.u32 %v3966_v44, %v3568_v40  ;;  %2669 = vmatpush.bf16.msra.mxu2 %v3543_v22  ;;  %v3519_v57 = vor.u32 %v3957_v15, %v3518_v8  ;;  %v4005_v44 = vld [vmem:[%s6204_s4 + $0x22c] sm:$0xf0]  ;;  %v3954_v40 = vld [vmem:[%s6204_s4 + $0x9c] sm:$0xf]  ;;  %v3688_v8 = vld [vmem:[%s6204_s4 + $0x200] sm:$0xf0] }
 0x232   : > { %2725 = vmatpush.bf16.msrb.mxu1 %v3763_v32 }
 0x233   : > { %2685 = vmatpush.bf16.msra.mxu3 %v3807_v6  ;;  %v4011_v6 = vld [vmem:[%s6204_s4 + $0x25c] sm:$0xf0] }
 0x234   : > { %2704 = vmatpush.bf16.msrb.mxu0 %v3619_v1  ;;  %v3735_v1 = vor.u32 %v4011_v6, %v3734_v9  ;;  %2670 = vmatpush.bf16.msra.mxu2 %v3519_v57  ;;  %v3470_v57 = vld [vmem:[%s6204_s4 + $0x38] sm:$0xf] }
 0x236   : > { %2726 = vmatpush.bf16.msrb.mxu1 %v3739_v23  ;;  %v3948_v23 = vld [vmem:[%s6204_s4 + $0x6c] sm:$0xf] }
 0x237   : > { %2686 = vmatpush.bf16.msra.mxu3 %v3783_v63 }
 0x238   : > { %2705 = vmatpush.bf16.msrb.mxu0 %v3595_v26 }
 0x23b   : > { %2687 = vmatpush.bf16.msra.mxu3 %v3759_v35  ;;  %v3520_v35 = vld [vmem:[%s6204_s4 + $0xb0] sm:$0xf0] }
 0x23c   : > { %2706 = vmatpush.bf16.msrb.mxu0 %v3571_v50  ;;  %v3523_v30 = vor.u32 %v3954_v40, %v3520_v35  ;;  %v3993_v35 = vld [vmem:[%s6204_s4 + $0x1cc] sm:$0xf0] }
 0x23f   : > { %2688 = vmatpush.bf16.msra.mxu3 %v3735_v1  ;;  %v3951_v1 = vld [vmem:[%s6204_s4 + $0x7c] sm:$0xf0] }
 0x26c   : > { %v5228_v18 = vpop.f32.mrf.mxu0  ;;  %v5230_v48 = vpop.f32.mrf.mxu1 }
 0x26d   : > { %v1923_v46 = vrot.slane %v5228_v18, 7  ;;  %v1924_v55 = vrot.slane %v5230_v48, 7  ;;  %v3999_v18 = vld [vmem:[%s6204_s4 + $0x1fc] sm:$0xf0] }
 0x273   : > { %v5437_v54 = vpop.f32.mrf.mxu2  ;;  %v5439_v25 = vpop.f32.mrf.mxu3 }
 0x274   : > { %v5304_v43 = vpop.f32.mrf.mxu0  ;;  %v5306_v36 = vpop.f32.mrf.mxu1 }
 0x275   : > { %v1925_v61 = vrot.slane %v5304_v43, 7  ;;  %v1926_v41 = vrot.slane %v5306_v36, 7  ;;  %v3945_v43 = vld [vmem:[%s6204_s4 + $0x4c] sm:$0xf0] }
 0x276   : > { %v3471_v40 = vor.u32 %v3945_v43, %v3470_v57 }
 0x277   : > { %v1935_v32 = vsel %vm904_vm4, %v1923_v46, %v1925_v61 }
 0x27b   : > { %v5522_v38 = vpop.f32.mrf.mxu2  ;;  %v5524_v39 = vpop.f32.mrf.mxu3 }
 0x27e   : > { %v5356_v10 = vpop.f32.mrf.mxu0  ;;  %v5358_v13 = vpop.f32.mrf.mxu1 }
 0x27f   : > { %v1927_v26 = vrot.slane %v5356_v10, 7  ;;  %v1928_v27 = vrot.slane %v5358_v13, 7 }
 0x281   : > { %v1934_v15 = vsel %vm904_vm4, %v1926_v41, %v1928_v27 }
 0x285   : > { %v5634_v34 = vpop.f32.mrf.mxu2  ;;  %v5636_v9 = vpop.f32.mrf.mxu3 }
 0x286   : > { %v5408_v29 = vpop.f32.mrf.mxu0  ;;  %v5410_v56 = vpop.f32.mrf.mxu1 }
 0x287   : > { %v1929_v37 = vrot.slane %v5408_v29, 7  ;;  %v1930_v17 = vrot.slane %v5410_v56, 7 }
 0x289   : > { %v1937_v2 = vsel %vm904_vm4, %v1929_v37, %v1923_v46  ;;  %v1938_v5 = vsel %vm904_vm4, %v1930_v17, %v1924_v55  ;;  %v1949_v46 = vadd.f32 %v1935_v32, %v5522_v38  ;;  %v3496_v38 = vld [vmem:[%s6204_s4 + $0x80] sm:$0xf0] }
 0x28a   : > { %v1939_v28 = vsel %vm909_vm5, %v1937_v2, 0.0  ;;  %v3544_v2 = vld [vmem:[%s6204_s4 + $0xe0] sm:$0xf0]  ;;  %v1940_v63 = vsel %vm909_vm5, %v1938_v5, 0.0  ;;  %v3494_v5 = vld [vmem:[%s6204_s4 + $0x68] sm:$0xf] }
 0x28b   : > { %v3547_v59 = vor.u32 %v3960_v51, %v3544_v2  ;;  %v1947_v33 = vadd.f32 %v1939_v28, %v5437_v54  ;;  %v3710_v54 = vld [vmem:[%s6204_s4 + $0x218] sm:$0xf]  ;;  %v1948_v28 = vadd.f32 %v1940_v63, %v5439_v25  ;;  %v4002_v25 = vld [vmem:[%s6204_s4 + $0x21c] sm:$0xf]  ;;  %v3686_v51 = vld [vmem:[%s6204_s4 + $0x1e8] sm:$0xf]  ;;  %v1936_v2 = vsel %vm904_vm4, %v1924_v55, %v1926_v41 }
 0x28c   : > { %v3711_v52 = vor.u32 %v4005_v44, %v3710_v54  ;;  %v3715_v22 = vor.u32 %v4002_v25, %v3712_v53  ;;  %v3495_v58 = vor.u32 %v3951_v1, %v3494_v5  ;;  %v3687_v63 = vor.u32 %v3999_v18, %v3686_v51  ;;  %v3664_v25 = vld [vmem:[%s6204_s4 + $0x1d0] sm:$0xf0]  ;;  %v3638_v1 = vld [vmem:[%s6204_s4 + $0x188] sm:$0xf] }
 0x28d   : > { %2707 = vmatpush.bf16.msrb.mxu0 %v3547_v59  ;;  %v1950_v48 = vadd.f32 %v1936_v2, %v5524_v39  ;;  %v1933_v39 = vsel %vm904_vm4, %v1925_v61, %v1927_v26  ;;  %v3662_v61 = vld [vmem:[%s6204_s4 + $0x1b8] sm:$0xf]  ;;  %v1944_v18 = vsel %vm911_vm10, %v1934_v15, 0.0  ;;  %v3936_v2 = vld [vmem:[%s6204_s4 + $0xc] sm:$0xf]  ;;  %v1863_v43 = vpop.f32.mrf.mxu2 }
 0x28e   : > { %v5480_v4 = vpop.f32.mrf.mxu0  ;;  %v5482_v20 = vpop.f32.mrf.mxu1  ;;  %2689 = vmatpush.bf16.msra.mxu3 %v3711_v52  ;;  %2727 = vmatpush.bf16.msrb.mxu1 %v3715_v22  ;;  %v3939_v22 = vld [vmem:[%s6204_s4 + $0x1c] sm:$0xf0]  ;;  %v1943_v51 = vsel %vm911_vm10, %v1933_v39, 0.0 }
 0x28f   : > { %v1955_v11 = vrot.slane %v5480_v4, 1  ;;  %v1956_v60 = vrot.slane %v5482_v20, 1  ;;  %2671 = vmatpush.bf16.msra.mxu2 %v3495_v58  ;;  %v3622_v4 = vld [vmem:[%s6204_s4 + $0x160] sm:$0xf] }
 0x291   : > { %2708 = vmatpush.bf16.msrb.mxu0 %v3523_v30  ;;  %v3990_v30 = vld [vmem:[%s6204_s4 + $0x1bc] sm:$0xf] }
 0x292   : > { %2690 = vmatpush.bf16.msra.mxu3 %v3687_v63  ;;  %v3667_v32 = vor.u32 %v3990_v30, %v3664_v25 }
 0x293   : > { %2672 = vmatpush.bf16.msra.mxu2 %v3471_v40 }
 0x296   : > { %v5559_v45 = vpop.f32.mrf.mxu0  ;;  %v5561_v12 = vpop.f32.mrf.mxu1 }
 0x297   : > { %v1957_v7 = vrot.slane %v5559_v45, 1  ;;  %v1958_v16 = vrot.slane %v5561_v12, 1  ;;  %v3942_v45 = vld [vmem:[%s6204_s4 + $0x3c] sm:$0xf] }
 0x299   : > { %v1967_v31 = vsel %vm945_vm6, %v1955_v11, %v1957_v7  ;;  %v1968_v14 = vsel %vm945_vm6, %v1956_v60, %v1958_v16 }
 0x29a   : > { %v1979_v50 = vadd.f32 %v1967_v31, %v1947_v33  ;;  %v1980_v6 = vadd.f32 %v1968_v14, %v1948_v28  ;;  %v3499_v33 = vor.u32 %v3948_v23, %v3496_v38  ;;  %v3996_v14 = vld [vmem:[%s6204_s4 + $0x1ec] sm:$0xf]  ;;  %v3448_v38 = vld [vmem:[%s6204_s4 + $0x20] sm:$0xf0] }
 0x29b   : > { %v3691_v28 = vor.u32 %v3996_v14, %v3688_v8  ;;  %v1951_v14 = vadd.f32 %v1943_v51, %v5634_v34  ;;  %v1931_v34 = vsel %vm904_vm4, %v1927_v26, %v1929_v37  ;;  %v1952_v26 = vadd.f32 %v1944_v18, %v5636_v9  ;;  %v3790_v51 = vld [vmem:[%s6204_s4 + $0x2b0] sm:$0xf]  ;;  %v4024_v18 = vld [vmem:[%s6204_s4 + $0x2c4] sm:$0xf0] }
 0x29c   : > { %v1994_v54 = vadd.f32 %v5581_v19, %v1979_v50  ;;  %v1995_v36 = vadd.f32 %v5591_v24, %v1980_v6  ;;  %v3663_v50 = vor.u32 %v3993_v35, %v3662_v61  ;;  %2709 = vmatpush.bf16.msrb.mxu0 %v3499_v33  ;;  %v3446_v6 = vld [vmem:[%s6204_s4 + $0x8] sm:$0xf]  ;;  %v3640_v33 = vld [vmem:[%s6204_s4 + $0x1a0] sm:$0xf0]  ;;  %v3451_v35 = vor.u32 %v3936_v2, %v3448_v38  ;;  %v3973_v2 = vld [vmem:[%s6204_s4 + $0x134] sm:$0xf] }
 0x29d   : > { %2728 = vmatpush.bf16.msrb.mxu1 %v3691_v28  ;;  %v3447_v23 = vor.u32 %v3939_v22, %v3446_v6  ;;  %v1953_v13 = vadd.f32 %v1931_v34, %v1863_v43  ;;  %v3976_v6 = vld [vmem:[%s6204_s4 + $0x144] sm:$0xf0]  ;;  %v4021_v38 = vld [vmem:[%s6204_s4 + $0x2b4] sm:$0xf]  ;;  %v3967_v43 = vld [vmem:[%s6204_s4 + $0x104] sm:$0xf] }
 0x29e   : > { %v5654_v3 = vpop.f32.mrf.mxu0  ;;  %v5656_v59 = vpop.f32.mrf.mxu1  ;;  %v2002_v8 = vmax.f32 %v1994_v54, 0.0  ;;  %v2003_v39 = vmax.f32 %v1995_v36, 0.0  ;;  %2691 = vmatpush.bf16.msra.mxu3 %v3663_v50  ;;  %v1932_v36 = vsel %vm904_vm4, %v1928_v27, %v1930_v17  ;;  %v3624_v50 = vld [vmem:[%s6204_s4 + $0x178] sm:$0xf0] }
 0x29f   : > { %v1959_v31 = vrot.slane %v5654_v3, 1  ;;  %v1960_v55 = vrot.slane %v5656_v59, 1  ;;  %v1882_v54 = vpop.f32.mrf.mxu3  ;;  %2673 = vmatpush.bf16.msra.mxu2 %v3447_v23  ;;  %v4030_v59 = vld [vmem:[%s6204_s4 + $0x2f4] sm:$0xf0]  ;;  %v3768_v34 = vld [vmem:[%s6204_s4 + $0x298] sm:$0xf0] }
 0x2a0   : > { %v1954_v27 = vadd.f32 %v1932_v36, %v1882_v54  ;;  %v3550_v54 = vld [vmem:[%s6204_s4 + $0xd0] sm:$0xf] }
 0x2a1   : > { %v1965_v41 = vsel %vm945_vm6, %v1957_v7, %v1959_v31  ;;  %v1966_v44 = vsel %vm945_vm6, %v1958_v16, %v1960_v55  ;;  %v3472_v7 = vld [vmem:[%s6204_s4 + $0x50] sm:$0xf0]  ;;  %2729 = vmatpush.bf16.msrb.mxu1 %v3667_v32  ;;  %v3598_v32 = vld [vmem:[%s6204_s4 + $0x130] sm:$0xf] }
 0x2a2   : > { %v1973_v12 = vsel %vm955_vm12, %v1965_v41, 0.0  ;;  %v1974_v16 = vsel %vm955_vm12, %v1966_v44, 0.0  ;;  %v3475_v52 = vor.u32 %v3942_v45, %v3472_v7 }
 0x2a3   : > { %v1981_v53 = vadd.f32 %v1973_v12, %v1949_v46  ;;  %v1982_v5 = vadd.f32 %v1974_v16, %v1950_v48  ;;  %v3987_v46 = vld [vmem:[%s6204_s4 + $0x19c] sm:$0xf0]  ;;  %v3984_v48 = vld [vmem:[%s6204_s4 + $0x18c] sm:$0xf]  ;;  %v3979_v16 = vld [vmem:[%s6204_s4 + $0x164] sm:$0xf] }
 0x2a4   : > { %v3639_v57 = vor.u32 %v3987_v46, %v3638_v1  ;;  %2710 = vmatpush.bf16.msrb.mxu0 %v3475_v52  ;;  %v3643_v45 = vor.u32 %v3984_v48, %v3640_v33  ;;  %v4027_v52 = vld [vmem:[%s6204_s4 + $0x2e4] sm:$0xf]  ;;  %v3599_v1 = vor.u32 %v3976_v6, %v3598_v32  ;;  %v3791_v46 = vor.u32 %v4024_v18, %v3790_v51  ;;  %v3792_v48 = vld [vmem:[%s6204_s4 + $0x2c8] sm:$0xf0]  ;;  %v3720_v6 = vld [vmem:[%s6204_s4 + $0x238] sm:$0xf0] }
 0x2a5   : > { %v1996_v58 = vadd.f32 %v5581_v19, %v1981_v53  ;;  %v1997_v63 = vadd.f32 %v5591_v24, %v1982_v5  ;;  %v5820_v53 = vor.u32 %v3979_v16, %v3624_v50  ;;  %v3816_v5 = vld [vmem:[%s6204_s4 + $0x2f8] sm:$0xf0]  ;;  %v3718_v16 = vld [vmem:[%s6204_s4 + $0x220] sm:$0xf]  ;;  %v4003_v32 = vld [vmem:[%s6204_s4 + $0x224] sm:$0xf] }
 0x2a6   : > { %v1901_v15 = vpop.f32.mrf.mxu0  ;;  %v1920_v28 = vpop.f32.mrf.mxu1  ;;  %2692 = vmatpush.bf16.msra.mxu3 %v3639_v57  ;;  %2730 = vmatpush.bf16.msrb.mxu1 %v3643_v45  ;;  %v5831_v22 = vor.u32 %v4027_v52, %v3816_v5  ;;  %v3766_v57 = vld [vmem:[%s6204_s4 + $0x280] sm:$0xf]  ;;  %v3742_v45 = vld [vmem:[%s6204_s4 + $0x250] sm:$0xf]  ;;  %v4006_v52 = vld [vmem:[%s6204_s4 + $0x234] sm:$0xf0]  ;;  %v5960_v18 = vor.u32 %v4003_v32, %v3720_v6 }
 0x2a7   : > { %v2004_v61 = vmax.f32 %v1996_v58, 0.0  ;;  %v2005_v41 = vmax.f32 %v1997_v63, 0.0  ;;  %v1961_v44 = vrot.slane %v1901_v15, 1  ;;  %v1962_v40 = vrot.slane %v1920_v28, 1  ;;  %v3600_v58 = vld [vmem:[%s6204_s4 + $0x148] sm:$0xf0] }
 0x2a8   : > { %2711 = vmatpush.bf16.msrb.mxu0 %v3451_v35  ;;  %v5848_v23 = vor.u32 %v3973_v2, %v3600_v58  ;;  %v3574_v15 = vld [vmem:[%s6204_s4 + $0x100] sm:$0xf]  ;;  %v3970_v28 = vld [vmem:[%s6204_s4 + $0x114] sm:$0xf0]  ;;  %v3964_v35 = vld [vmem:[%s6204_s4 + $0xe4] sm:$0xf0]  ;;  %v3719_v5 = vor.u32 %v4006_v52, %v3718_v16 }
 0x2a9   : > { %v5770_v7 = vpack.c.bf16 %v2004_v61, %v2002_v8  ;;  %v5772_v12 = vpack.c.bf16 %v2005_v41, %v2003_v39  ;;  %v1963_v10 = vsel %vm945_vm6, %v1959_v31, %v1961_v44  ;;  %v1969_v29 = vsel %vm945_vm6, %v1961_v44, %v1955_v11  ;;  %v3982_v11 = vld [vmem:[%s6204_s4 + $0x174] sm:$0xf0]  ;;  %v3576_v61 = vld [vmem:[%s6204_s4 + $0x118] sm:$0xf0]  ;;  %v3694_v2 = vld [vmem:[%s6204_s4 + $0x1f0] sm:$0xf] }
 0x2aa   : > { %v1977_v56 = vsel %vm957_vm15, %v1969_v29, 0.0  ;;  %v1964_v37 = vsel %vm945_vm6, %v1960_v55, %v1962_v40  ;;  %v1970_v17 = vsel %vm945_vm6, %v1962_v40, %v1956_v60  ;;  %v3623_v20 = vor.u32 %v3982_v11, %v3622_v4  ;;  %v3814_v60 = vld [vmem:[%s6204_s4 + $0x2e0] sm:$0xf]  ;;  %v4015_v40 = vld [vmem:[%s6204_s4 + $0x284] sm:$0xf] }
 0x2ab   : > { %v1978_v3 = vsel %vm957_vm15, %v1970_v17, 0.0  ;;  %2598 = vmatmul.bf16.vlgmr.msrb.gmra.mxu2 %v5770_v7  ;;  %2617 = vmatmul.bf16.vlgmr.msrb.gmra.mxu3 %v5772_v12  ;;  %v1983_v31 = vadd.f32 %v1963_v10, %v1951_v14  ;;  %v1985_v55 = vadd.f32 %v1977_v56, %v1953_v13  ;;  %v3815_v9 = vor.u32 %v4030_v59, %v3814_v60  ;;  %v4012_v10 = vld [vmem:[%s6204_s4 + $0x264] sm:$0xf0]  ;;  %v3961_v17 = vld [vmem:[%s6204_s4 + $0xd4] sm:$0xf] }
 0x2ac   : > { %2636 = vmatmul.bf16.vlgmr.msra.gmra.mxu0 %v5770_v7  ;;  %2655 = vmatmul.bf16.vlgmr.msra.gmra.mxu1 %v5772_v12  ;;  %v1984_v30 = vadd.f32 %v1964_v37, %v1952_v26  ;;  %v1986_v25 = vadd.f32 %v1978_v3, %v1954_v27  ;;  %v5859_v39 = vor.u32 %v4021_v38, %v3792_v48  ;;  %v3552_v26 = vld [vmem:[%s6204_s4 + $0xe8] sm:$0xf0]  ;;  %v4009_v27 = vld [vmem:[%s6204_s4 + $0x254] sm:$0xf]  ;;  %v4000_v58 = vld [vmem:[%s6204_s4 + $0x204] sm:$0xf0] }
 0x2ad   : > { %2742 = vmatpush.bf16.msrb.mxu2 %v3623_v20  ;;  %2761 = vmatpush.bf16.msrb.mxu3 %v3815_v9  ;;  %v1998_v63 = vadd.f32 %v5581_v19, %v1983_v31  ;;  %v2000_v33 = vadd.f32 %v5581_v19, %v1985_v55  ;;  %v3575_v19 = vor.u32 %v3970_v28, %v3574_v15  ;;  %v3744_v3 = vld [vmem:[%s6204_s4 + $0x268] sm:$0xf0]  ;;  %v3526_v55 = vld [vmem:[%s6204_s4 + $0xa0] sm:$0xf]  ;;  %v3958_v9 = vld [vmem:[%s6204_s4 + $0xb4] sm:$0xf0] }
 0x2ae   : > { %2780 = vmatpush.bf16.msra.mxu0 %v5820_v53  ;;  %2799 = vmatpush.bf16.msra.mxu1 %v5831_v22  ;;  %v1999_v14 = vadd.f32 %v5591_v24, %v1984_v30  ;;  %v2001_v8 = vadd.f32 %v5591_v24, %v1986_v25  ;;  %v4018_v24 = vld [vmem:[%s6204_s4 + $0x294] sm:$0xf0]  ;;  %v5880_v44 = vor.u32 %v3967_v43, %v3576_v61  ;;  %v3955_v30 = vld [vmem:[%s6204_s4 + $0xa4] sm:$0xf]  ;;  %v3528_v25 = vld [vmem:[%s6204_s4 + $0xb8] sm:$0xf0] }
 0x2af   : > { %v3767_v41 = vor.u32 %v4018_v24, %v3766_v57  ;;  %v5892_v36 = vor.u32 %v4015_v40, %v3768_v34  ;;  %v2006_v29 = vmax.f32 %v1998_v63, 0.0  ;;  %v2008_v13 = vmax.f32 %v2000_v33, 0.0  ;;  %v3949_v48 = vld [vmem:[%s6204_s4 + $0x74] sm:$0xf]  ;;  %v3504_v33 = vld [vmem:[%s6204_s4 + $0x88] sm:$0xf0] }
 0x2b0   : > { %v2007_v56 = vmax.f32 %v1999_v14, 0.0  ;;  %v2009_v37 = vmax.f32 %v2001_v8, 0.0  ;;  %v3551_v4 = vor.u32 %v3964_v35, %v3550_v54  ;;  %v3743_v11 = vor.u32 %v4012_v10, %v3742_v45  ;;  %v3997_v14 = vld [vmem:[%s6204_s4 + $0x1f4] sm:$0xf]  ;;  %v3696_v8 = vld [vmem:[%s6204_s4 + $0x208] sm:$0xf0] }
 0x2b1   : > { %2743 = vmatpush.bf16.msrb.mxu2 %v3599_v1  ;;  %2762 = vmatpush.bf16.msrb.mxu3 %v3791_v46  ;;  %v5917_v20 = vpack.c.bf16 %v2008_v13, %v2006_v29  ;;  %v5921_v59 = vor.u32 %v3961_v17, %v3552_v26  ;;  %v5923_v31 = vor.u32 %v4009_v27, %v3744_v3  ;;  %v3502_v1 = vld [vmem:[%s6204_s4 + $0x70] sm:$0xf]  ;;  %v3952_v46 = vld [vmem:[%s6204_s4 + $0x84] sm:$0xf0]  ;;  %v3478_v15 = vld [vmem:[%s6204_s4 + $0x40] sm:$0xf] }
 0x2b2   : > { %2781 = vmatpush.bf16.msra.mxu0 %v5848_v23  ;;  %2800 = vmatpush.bf16.msra.mxu1 %v5859_v39  ;;  %v5919_v60 = vpack.c.bf16 %v2009_v37, %v2007_v56  ;;  %v3527_v50 = vor.u32 %v3958_v9, %v3526_v55  ;;  %v5958_v51 = vor.u32 %v3955_v30, %v3528_v25  ;;  %v3946_v28 = vld [vmem:[%s6204_s4 + $0x54] sm:$0xf0]  ;;  %v3670_v57 = vld [vmem:[%s6204_s4 + $0x1c0] sm:$0xf]  ;;  %v3943_v61 = vld [vmem:[%s6204_s4 + $0x44] sm:$0xf] }
 0x2b3   : > { %v3503_v63 = vor.u32 %v3952_v46, %v3502_v1  ;;  %v3695_v38 = vor.u32 %v4000_v58, %v3694_v2  ;;  %v3507_v24 = vor.u32 %v3949_v48, %v3504_v33  ;;  %v3699_v43 = vor.u32 %v3997_v14, %v3696_v8  ;;  %v3991_v54 = vld [vmem:[%s6204_s4 + $0x1c4] sm:$0xf]  ;;  %v3672_v35 = vld [vmem:[%s6204_s4 + $0x1d8] sm:$0xf0]  ;;  %v3454_v45 = vld [vmem:[%s6204_s4 + $0x10] sm:$0xf] }
 0x2b4   : > { %v3479_v40 = vor.u32 %v3946_v28, %v3478_v15  ;;  %v3940_v10 = vld [vmem:[%s6204_s4 + $0x24] sm:$0xf0]  ;;  %v3646_v29 = vld [vmem:[%s6204_s4 + $0x190] sm:$0xf]  ;;  %v3675_v37 = vor.u32 %v3991_v54, %v3672_v35  ;;  %v3937_v17 = vld [vmem:[%s6204_s4 + $0x14] sm:$0xf] }
 0x2b5   : > { %2744 = vmatpush.bf16.msrb.mxu2 %v3575_v19  ;;  %2763 = vmatpush.bf16.msrb.mxu3 %v3767_v41  ;;  %v3994_v19 = vld [vmem:[%s6204_s4 + $0x1d4] sm:$0xf0]  ;;  %v3480_v41 = vld [vmem:[%s6204_s4 + $0x58] sm:$0xf0]  ;;  %v3988_v13 = vld [vmem:[%s6204_s4 + $0x1a4] sm:$0xf0] }
 0x2b6   : > { %2782 = vmatpush.bf16.msra.mxu0 %v5880_v44  ;;  %2801 = vmatpush.bf16.msra.mxu1 %v5892_v36  ;;  %v3671_v34 = vor.u32 %v3994_v19, %v3670_v57  ;;  %v3483_v56 = vor.u32 %v3943_v61, %v3480_v41  ;;  %v3456_v26 = vld [vmem:[%s6204_s4 + $0x28] sm:$0xf0]  ;;  %v3985_v27 = vld [vmem:[%s6204_s4 + $0x194] sm:$0xf] }
 0x2b7   : > { %v3648_v3 = vld [vmem:[%s6204_s4 + $0x1a8] sm:$0xf0]  ;;  %v3459_v55 = vor.u32 %v3937_v17, %v3456_v26 }
 0x2b8   : > { %v3651_v9 = vor.u32 %v3985_v27, %v3648_v3 }
 0x2b9   : > { %2745 = vmatpush.bf16.msrb.mxu2 %v3551_v4  ;;  %2764 = vmatpush.bf16.msrb.mxu3 %v3743_v11  ;;  %v3455_v4 = vor.u32 %v3940_v10, %v3454_v45  ;;  %v3647_v11 = vor.u32 %v3988_v13, %v3646_v29 }
 0x2ba   : > { %2783 = vmatpush.bf16.msra.mxu0 %v5921_v59  ;;  %2802 = vmatpush.bf16.msra.mxu1 %v5923_v31 }
 0x2bb   : > { %2603 = vmatmul.bf16.gmra.mxu2 %v5917_v20  ;;  %2622 = vmatmul.bf16.gmra.mxu3 %v5919_v60 }
 0x2bc   : > { %2641 = vmatmul.bf16.gmra.mxu0 %v5917_v20  ;;  %2660 = vmatmul.bf16.gmra.mxu1 %v5919_v60 }
 0x2bd   : > { %2746 = vmatpush.bf16.msrb.mxu2 %v3527_v50  ;;  %2765 = vmatpush.bf16.msrb.mxu3 %v3719_v5 }
 0x2be   : > { %2784 = vmatpush.bf16.msra.mxu0 %v5958_v51  ;;  %2803 = vmatpush.bf16.msra.mxu1 %v5960_v18 }
 0x2c1   : > { %2747 = vmatpush.bf16.msrb.mxu2 %v3503_v63  ;;  %2766 = vmatpush.bf16.msrb.mxu3 %v3695_v38 }
 0x2c2   : > { %2785 = vmatpush.bf16.msra.mxu0 %v3507_v24  ;;  %2804 = vmatpush.bf16.msra.mxu1 %v3699_v43 }
 0x2c5   : > { %2748 = vmatpush.bf16.msrb.mxu2 %v3479_v40  ;;  %2767 = vmatpush.bf16.msrb.mxu3 %v3671_v34 }
 0x2c6   : > { %2786 = vmatpush.bf16.msra.mxu0 %v3483_v56  ;;  %2805 = vmatpush.bf16.msra.mxu1 %v3675_v37 }
 0x2c9   : > { %2749 = vmatpush.bf16.msrb.mxu2 %v3455_v4  ;;  %2768 = vmatpush.bf16.msrb.mxu3 %v3647_v11 }
 0x2ca   : > { %2787 = vmatpush.bf16.msra.mxu0 %v3459_v55  ;;  %2806 = vmatpush.bf16.msra.mxu1 %v3651_v9 }
 0x2cb   : > { %2674 = vmatmul.bf16.vlgmr.msra.gmra.mxu2 %v5770_v7  ;;  %2693 = vmatmul.bf16.vlgmr.msra.gmra.mxu3 %v5772_v12 }
 0x2cc   : > { %2712 = vmatmul.bf16.vlgmr.msrb.gmra.mxu0 %v5770_v7  ;;  %2731 = vmatmul.bf16.vlgmr.msrb.gmra.mxu1 %v5772_v12 }
 0x2cd   : > { %4031 = vmatpush.bf16.msra.mxu2 %v5820_v53  ;;  %4039 = vmatpush.bf16.msra.mxu3 %v5831_v22 }
 0x2d1   : > { %4032 = vmatpush.bf16.msra.mxu2 %v5848_v23  ;;  %4040 = vmatpush.bf16.msra.mxu3 %v5859_v39 }
 0x2d5   : > { %4033 = vmatpush.bf16.msra.mxu2 %v5880_v44  ;;  %4041 = vmatpush.bf16.msra.mxu3 %v5892_v36 }
 0x2d9   : > { %4034 = vmatpush.bf16.msra.mxu2 %v5921_v59  ;;  %4042 = vmatpush.bf16.msra.mxu3 %v5923_v31 }
 0x2db   : > { %2679 = vmatmul.bf16.gmra.mxu2 %v5917_v20  ;;  %2698 = vmatmul.bf16.gmra.mxu3 %v5919_v60 }
 0x2dc   : > { %2717 = vmatmul.bf16.gmra.mxu0 %v5917_v20  ;;  %2736 = vmatmul.bf16.gmra.mxu1 %v5919_v60 }
 0x2dd   : > { %4035 = vmatpush.bf16.msra.mxu2 %v5958_v51  ;;  %4043 = vmatpush.bf16.msra.mxu3 %v5960_v18 }
 0x2e1   : > { %4036 = vmatpush.bf16.msra.mxu2 %v3507_v24  ;;  %4044 = vmatpush.bf16.msra.mxu3 %v3699_v43 }
 0x2e5   : > { %4037 = vmatpush.bf16.msra.mxu2 %v3483_v56  ;;  %4045 = vmatpush.bf16.msra.mxu3 %v3675_v37 }
 0x2e9   : > { %4038 = vmatpush.bf16.msra.mxu2 %v3459_v55  ;;  %4046 = vmatpush.bf16.msra.mxu3 %v3651_v9 }
 0x2eb   : > { %2750 = vmatmul.bf16.vlgmr.msrb.gmra.mxu2 %v5770_v7  ;;  %2769 = vmatmul.bf16.vlgmr.msrb.gmra.mxu3 %v5772_v12 }
 0x2ec   : > { %2788 = vmatmul.bf16.vlgmr.msra.gmra.mxu0 %v5770_v7  ;;  %2807 = vmatmul.bf16.vlgmr.msra.gmra.mxu1 %v5772_v12 }
 0x2fb   : > { %2755 = vmatmul.bf16.gmra.mxu2 %v5917_v20  ;;  %2774 = vmatmul.bf16.gmra.mxu3 %v5919_v60 }
 0x30b   : > { %2793 = vmatmul.bf16.vlgmr.msra.gmra.mxu2 %v5917_v20  ;;  %2812 = vmatmul.bf16.vlgmr.msra.gmra.mxu3 %v5919_v60 }
 0x329   : > { %v2637_v53 = vpop.f32.mrf.mxu0  ;;  %v2656_v22 = vpop.f32.mrf.mxu1 }
 0x32a   : > { %v2657_v23 = vadd.f32 %v2656_v22, %v2637_v53 }
 0x32c   : > { %v2819_v16 = vrot.slane %v2657_v23, 7  ;;  %v2883_v23 = vperm.slane %v5446_v49, 3 }
 0x32e   : > { %v2599_v39 = vpop.f32.mrf.mxu2  ;;  %v2618_v44 = vpop.f32.mrf.mxu3 }
 0x32f   : > { %v6059_v36 = vadd.f32 %v2618_v44, %v2599_v39 }
 0x331   : > { %v2639_v59 = vpop.f32.mrf.mxu0  ;;  %v2658_v31 = vpop.f32.mrf.mxu1  ;;  %v2818_v60 = vrot.slane %v6059_v36, 7 }
 0x332   : > { %v2659_v7 = vadd.f32 %v2658_v31, %v2639_v59 }
 0x334   : > { %v2821_v12 = vrot.slane %v2659_v7, 7 }
 0x336   : > { %v2601_v50 = vpop.f32.mrf.mxu2  ;;  %v2620_v52 = vpop.f32.mrf.mxu3  ;;  %v6063_v30 = vsel %vm904_vm4, %v2819_v16, %v2821_v12 }
 0x337   : > { %v2621_v20 = vadd.f32 %v2620_v52, %v2601_v50  ;;  %v6116_v50 = vperm.slane %v2883_v23, 1 }
 0x339   : > { %v2820_v25 = vrot.slane %v2621_v20, 7  ;;  %v2642_v5 = vpop.f32.mrf.mxu0  ;;  %v2661_v32 = vpop.f32.mrf.mxu1 }
 0x33a   : > { %v6066_v6 = vadd.f32 %v2661_v32, %v2642_v5  ;;  %v2882_v32 = vperm.slane %v5446_v49, 1 }
 0x33b   : > { %v6070_v1 = vsel %vm904_vm4, %v2818_v60, %v2820_v25 }
 0x33c   : > { %v2823_v51 = vrot.slane %v6066_v6, 7 }
 0x33e   : > { %v2604_v18 = vpop.f32.mrf.mxu2  ;;  %v2623_v46 = vpop.f32.mrf.mxu3  ;;  %v6077_v2 = vsel %vm904_vm4, %v2821_v12, %v2823_v51 }
 0x33f   : > { %v6079_v58 = vadd.f32 %v2623_v46, %v2604_v18 }
 0x341   : > { %v2822_v63 = vrot.slane %v6079_v58, 7  ;;  %v2644_v38 = vpop.f32.mrf.mxu0  ;;  %v2663_v48 = vpop.f32.mrf.mxu1 }
 0x342   : > { %v6100_v56 = vadd.f32 %v2663_v48, %v2644_v38 }
 0x343   : > { %v6086_v33 = vsel %vm904_vm4, %v2820_v25, %v2822_v63 }
 0x344   : > { %v2825_v4 = vrot.slane %v6100_v56, 7 }
 0x346   : > { %v2606_v14 = vpop.f32.mrf.mxu2  ;;  %v2625_v8 = vpop.f32.mrf.mxu3  ;;  %v2833_v9 = vsel %vm904_vm4, %v2825_v4, %v2819_v16 }
 0x347   : > { %v2626_v11 = vadd.f32 %v2625_v8, %v2606_v14  ;;  %v2835_v36 = vsel %vm909_vm5, %v2833_v9, 0.0 }
 0x349   : > { %v2713_v15 = vpop.f32.mrf.mxu0  ;;  %v2732_v28 = vpop.f32.mrf.mxu1  ;;  %v2824_v39 = vrot.slane %v2626_v11, 7 }
 0x34a   : > { %v2733_v55 = vadd.f32 %v2732_v28, %v2713_v15  ;;  %v2886_v15 = vperm.slane %v2882_v32, 1 }
 0x34b   : > { %v2832_v52 = vsel %vm904_vm4, %v2824_v39, %v2818_v60 }
 0x34c   : > { %v2843_v7 = vadd.f32 %v2835_v36, %v2733_v55  ;;  %v2834_v38 = vsel %vm909_vm5, %v2832_v52, 0.0 }
 0x34e   : > { %v2675_v57 = vpop.f32.mrf.mxu2  ;;  %v2694_v19 = vpop.f32.mrf.mxu3 }
 0x34f   : > { %v2695_v16 = vadd.f32 %v2694_v19, %v2675_v57 }
 0x351   : > { %v6088_v24 = vpop.f32.mrf.mxu0  ;;  %v6090_v43 = vpop.f32.mrf.mxu1  ;;  %v2842_v8 = vadd.f32 %v2834_v38, %v2695_v16 }
 0x356   : > { %v2677_v61 = vpop.f32.mrf.mxu2  ;;  %v2696_v41 = vpop.f32.mrf.mxu3 }
 0x359   : > { %v6092_v40 = vpop.f32.mrf.mxu0  ;;  %v6094_v34 = vpop.f32.mrf.mxu1 }
 0x35e   : > { %v2680_v54 = vpop.f32.mrf.mxu2  ;;  %v2699_v35 = vpop.f32.mrf.mxu3 }
 0x35f   : > { %v2700_v23 = vadd.f32 %v2699_v35, %v2680_v54 }
 0x361   : > { %v6096_v45 = vpop.f32.mrf.mxu0  ;;  %v6098_v10 = vpop.f32.mrf.mxu1 }
 0x366   : > { %v2682_v29 = vpop.f32.mrf.mxu2  ;;  %v2701_v13 = vpop.f32.mrf.mxu3 }
 0x369   : > { %v2789_v37 = vpop.f32.mrf.mxu0  ;;  %v2808_v17 = vpop.f32.mrf.mxu1 }
 0x36a   : > { %v6103_v3 = vadd.f32 %v2808_v17, %v2789_v37  ;;  %v2697_v17 = vadd.f32 %v2696_v41, %v2677_v61  ;;  %v2838_v41 = vsel %vm911_vm10, %v6086_v33, 0.0 }
 0x36c   : > { %v2851_v59 = vrot.slane %v6103_v3, 1  ;;  %v2844_v55 = vadd.f32 %v6070_v1, %v2697_v17 }
 0x36e   : > { %v2751_v26 = vpop.f32.mrf.mxu2  ;;  %v2770_v27 = vpop.f32.mrf.mxu3 }
 0x36f   : > { %v2771_v12 = vadd.f32 %v2770_v27, %v2751_v26 }
 0x371   : > { %v2791_v53 = vpop.f32.mrf.mxu0  ;;  %v2810_v22 = vpop.f32.mrf.mxu1  ;;  %v2850_v48 = vrot.slane %v2771_v12, 1  ;;  %v2702_v12 = vadd.f32 %v2701_v13, %v2682_v29 }
 0x372   : > { %v6110_v44 = vadd.f32 %v2810_v22, %v2791_v53 }
 0x374   : > { %v2853_v31 = vrot.slane %v6110_v44, 1  ;;  %v2839_v44 = vsel %vm911_vm10, %v6077_v2, 0.0 }
 0x376   : > { %v2863_v20 = vsel %vm945_vm6, %v2851_v59, %v2853_v31  ;;  %v2753_v25 = vpop.f32.mrf.mxu2  ;;  %v2772_v5 = vpop.f32.mrf.mxu3 }
 0x377   : > { %v2875_v18 = vadd.f32 %v2863_v20, %v2843_v7  ;;  %v2773_v46 = vadd.f32 %v2772_v5, %v2753_v25  ;;  %v2846_v20 = vadd.f32 %v2838_v41, %v2700_v23  ;;  %v2826_v25 = vsel %vm904_vm4, %v2822_v63, %v2824_v39 }
 0x378   : > { %v2848_v5 = vadd.f32 %v2826_v25, %v2702_v12  ;;  %v2735_v63 = vadd.f32 %v6090_v43, %v6088_v24  ;;  %v2738_v24 = vadd.f32 %v6094_v34, %v6092_v40  ;;  %v2827_v40 = vsel %vm904_vm4, %v2823_v51, %v2825_v4 }
 0x379   : > { %v2889_v60 = vadd.f32 %v6116_v50, %v2875_v18  ;;  %v2852_v14 = vrot.slane %v2773_v46, 1 }
 0x37b   : > { %v2897_v49 = vmax.f32 %v2889_v60, 0.0  ;;  %v2862_v28 = vsel %vm945_vm6, %v2850_v48, %v2852_v14 }
 0x37c   : > { %v2874_v57 = vadd.f32 %v2862_v28, %v2842_v8  ;;  %v2845_v8 = vadd.f32 %v6063_v30, %v2735_v63 }
 0x37d   : > { %2905 = vst [vmem:[%s6134_s15 + $0x8] sm:$0xff] %v2897_v49 }
 0x37e   : > { %v2888_v62 = vadd.f32 %v2886_v15, %v2874_v57  ;;  %v2756_v19 = vpop.f32.mrf.mxu2  ;;  %v2775_v37 = vpop.f32.mrf.mxu3  ;;  %v2740_v57 = vadd.f32 %v6098_v10, %v6096_v45 }
 0x37f   : > { %v2776_v11 = vadd.f32 %v2775_v37, %v2756_v19  ;;  %v2847_v19 = vadd.f32 %v2839_v44, %v2738_v24 }
 0x380   : > { %v2896_v26 = vmax.f32 %v2888_v62, 0.0  ;;  %v2849_v34 = vadd.f32 %v2827_v40, %v2740_v57 }
 0x381   : > { %v2854_v27 = vrot.slane %v2776_v11, 1 }
 0x382   : > { %2904 = vst [vmem:[%s6134_s15] sm:$0xff] %v2896_v26 }
 0x383   : > { %v2860_v9 = vsel %vm945_vm6, %v2852_v14, %v2854_v27 }
 0x384   : > { %v2868_v53 = vsel %vm955_vm12, %v2860_v9, 0.0 }
 0x385   : > { %v2876_v22 = vadd.f32 %v2868_v53, %v2844_v55 }
 0x386   : > { %v2758_v36 = vpop.f32.mrf.mxu2  ;;  %v2777_v7 = vpop.f32.mrf.mxu3 }
 0x387   : > { %v2890_v16 = vadd.f32 %v2886_v15, %v2876_v22  ;;  %v2778_v61 = vadd.f32 %v2777_v7, %v2758_v36 }
 0x389   : > { %v2898_v52 = vmax.f32 %v2890_v16, 0.0  ;;  %v2856_v1 = vrot.slane %v2778_v61, 1 }
 0x38b   : > { %2906 = vst [vmem:[%s6134_s15 + $0x10] sm:$0xff] %v2898_v52  ;;  %v2858_v54 = vsel %vm945_vm6, %v2854_v27, %v2856_v1  ;;  %v2864_v35 = vsel %vm945_vm6, %v2856_v1, %v2850_v48 }
 0x38c   : > { %v2872_v33 = vsel %vm957_vm15, %v2864_v35, 0.0  ;;  %v2878_v29 = vadd.f32 %v2858_v54, %v2846_v20 }
 0x38d   : > { %v2880_v13 = vadd.f32 %v2872_v33, %v2848_v5 }
 0x38e   : > { %v2892_v32 = vadd.f32 %v2886_v15, %v2878_v29  ;;  %v2794_v58 = vpop.f32.mrf.mxu2  ;;  %v2813_v18 = vpop.f32.mrf.mxu3 }
 0x38f   : > { %v2894_v39 = vadd.f32 %v2886_v15, %v2880_v13  ;;  %v2814_v46 = vadd.f32 %v2813_v18, %v2794_v58 }
 0x390   : > { %v2900_v38 = vmax.f32 %v2892_v32, 0.0 }
 0x391   : > { %v2902_v60 = vmax.f32 %v2894_v39, 0.0  ;;  %v2855_v14 = vrot.slane %v2814_v46, 1 }
 0x392   : > { %2908 = vst [vmem:[%s6134_s15 + $0x20] sm:$0xff] %v2900_v38 }
 0x393   : > { %2910 = vst [vmem:[%s6134_s15 + $0x30] sm:$0xff] %v2902_v60  ;;  %v2861_v48 = vsel %vm945_vm6, %v2853_v31, %v2855_v14 }
 0x394   : > { %v2869_v49 = vsel %vm955_vm12, %v2861_v48, 0.0 }
 0x395   : > { %v2877_v28 = vadd.f32 %v2869_v49, %v2845_v8 }
 0x396   : > { %v2796_v43 = vpop.f32.mrf.mxu2  ;;  %v2815_v15 = vpop.f32.mrf.mxu3 }
 0x397   : > { %v2891_v30 = vadd.f32 %v6116_v50, %v2877_v28  ;;  %v2816_v62 = vadd.f32 %v2815_v15, %v2796_v43 }
 0x399   : > { %v2899_v31 = vmax.f32 %v2891_v30, 0.0  ;;  %v2857_v47 = vrot.slane %v2816_v62, 1 }
 0x39b   : > { %2907 = vst [vmem:[%s6134_s15 + $0x18] sm:$0xff] %v2899_v31  ;;  %v2859_v45 = vsel %vm945_vm6, %v2855_v14, %v2857_v47  ;;  %v2865_v21 = vsel %vm945_vm6, %v2857_v47, %v2851_v59 }
 0x39c   : > { %v2873_v2 = vsel %vm957_vm15, %v2865_v21, 0.0  ;;  %v2879_v10 = vadd.f32 %v2859_v45, %v2847_v19 }
 0x39d   : > { %v2881_v56 = vadd.f32 %v2873_v2, %v2849_v34 }
 0x39e   : > { %v2893_v6 = vadd.f32 %v6116_v50, %v2879_v10 }
 0x39f   : > { %v2895_v37 = vadd.f32 %v6116_v50, %v2881_v56 }
 0x3a0   : > { %v2901_v51 = vmax.f32 %v2893_v6, 0.0 }
 0x3a1   : > { %v2903_v4 = vmax.f32 %v2895_v37, 0.0 }
 0x3a2   : > { %2909 = vst [vmem:[%s6134_s15 + $0x28] sm:$0xff] %v2901_v51 }
 0x3a3   : > { %2911 = vst [vmem:[%s6134_s15 + $0x38] sm:$0xff] %v2903_v4 }
 0x3a4 PF: > { %s17_s24 = sadd.s32 1, %s4078_s24  }
 0x3a5   : > { %p14_p4 = scmp.ge.s32.totalorder %s17_s24, 6  }
 0x3a7   :  { %16 = sbr.rel (!%p14_p4) target bundleno = 1 (0x1), region = 78 }

</bundles_post_ra>
